<compile_context>
chip_gen: v5e
topology: v5e:2x2
jax: 0.10.0
libtpu: 0.0.40
codegen_flags: <defaults>
</compile_context>

<pallas_src>
import math
import functools

import jax
import jax.numpy as jnp
from jax.experimental import pallas as pl


BF16 = jnp.bfloat16
F32 = jnp.float32

# Parameter ordering shared by the wrapper and the kernel signature.
PARAM_ORDER = (
    # SymbolicExpressionParser
    "wtc", "btc", "emb", "ws1", "bs1", "ws2", "bs2",
    # TransformerEncoderLayer stacks (leading dim = layer index)
    "twq", "tbq", "twk", "tbk", "twv", "tbv",
    "two", "tbo", "tw1", "tb1", "tw2", "tb2",
    "tln1g", "tln1b", "tln2g", "tln2b",
    # DifferentiableSymbolicExecutor (op weights stacked to (H, 7H))
    "wsel", "bsel", "wy7", "wl7", "bex",
    "wt1", "bt1", "wt2", "bt2",
    # integration_layer, weight split into [hidden ; symbolic] halves
    "wih", "wis", "bi",
)


def _gelu(z):
    # TODO(synk): PyTorch nn.GELU()/F.gelu default to the exact erf form; the
    # tanh approximation is used here (and in the JAX reference) for clean EUP
    # lowering — max deviation ~1e-3 on unit-scale inputs.
    c = math.sqrt(2.0 / math.pi)
    return 0.5 * z * (1.0 + jnp.tanh(c * (z + 0.044715 * z * z * z)))


def _nsi_kernel(hs_ref,
                # parser
                wtc_ref, btc_ref, emb_ref, ws1_ref, bs1_ref, ws2_ref, bs2_ref,
                # transformer layer stacks
                twq_ref, tbq_ref, twk_ref, tbk_ref, twv_ref, tbv_ref,
                two_ref, tbo_ref, tw1_ref, tb1_ref, tw2_ref, tb2_ref,
                tln1g_ref, tln1b_ref, tln2g_ref, tln2b_ref,
                # executor
                wsel_ref, bsel_ref, wy7_ref, wl7_ref, bex_ref,
                wt1_ref, bt1_ref, wt2_ref, bt2_ref,
                # integration
                wih_ref, wis_ref, bi_ref,
                # output
                o_ref,
                *, num_layers, num_heads):
    B, S, H = hs_ref.shape
    N = B * S
    hd = H // num_heads

    def mm(a, b):
        # bf16 MXU operands (native on v5e/v6e/v7x; ~3x fewer passes than f32
        # emulation), f32 accumulation.  Casts are no-ops for pre-cast weights.
        return jnp.dot(a.astype(BF16), b.astype(BF16), preferred_element_type=F32)

    def bmm(eq, a, b):
        # Batched matmul (one batch dim) with bf16 operands, f32 accumulate.
        return jnp.einsum(eq, a.astype(BF16), b.astype(BF16),
                          preferred_element_type=F32)

    def softmax(z):
        # f32 VPU math; EUP approximate reciprocal instead of a VPU divide.
        z = z - jnp.max(z, axis=-1, keepdims=True)
        e = jnp.exp(z)
        return e * pl.reciprocal(jnp.sum(e, axis=-1, keepdims=True), approx=True)

    def layer_norm(z, g, b):
        mu = jnp.mean(z, axis=-1, keepdims=True)
        var = jnp.mean(jnp.square(z - mu), axis=-1, keepdims=True)
        return (z - mu) * jax.lax.rsqrt(var + 1e-5) * g + b

    hs3 = hs_ref[...]                     # (B, S, H)
    x = hs3.reshape(N, H)                 # token-flattened view (leading-dim merge)

    # ---------------- SymbolicExpressionParser ------------------------------
    sym_probs = softmax(mm(x, wtc_ref[...]) + btc_ref[...])               # (N, V)
    weighted_symbols = mm(sym_probs, emb_ref[...])                        # (N, H)
    s_hidden = _gelu(mm(x, ws1_ref[...]) + bs1_ref[...])                  # (N, H)
    structure_probs = softmax(mm(s_hidden, ws2_ref[...]) + bs2_ref[...])  # (N, 3)
    p0 = structure_probs[:, 0:1]
    y = weighted_symbols * p0 + x * (1.0 - p0)                            # (N, H)

    # --------- TransformerEncoderLayer stack (post-norm, gelu) --------------
    for l in range(num_layers):                                           # static unroll
        # twq/tbq already carry the folded 1/sqrt(hd) scale (done in wrapper).
        q = mm(y, twq_ref[l]) + tbq_ref[l]
        k = mm(y, twk_ref[l]) + tbk_ref[l]
        v = mm(y, twv_ref[l]) + tbv_ref[l]
        q3 = q.reshape(B, S, H)
        k3 = k.reshape(B, S, H)
        v3 = v.reshape(B, S, H)
        wo = two_ref[l]                                                   # (H, H)

        # TODO(synk): full head batching (single 'bhqd,bhkd->bhqk' chain) needs
        # a (B,S,nh,hd)->(B,nh,S,hd) second-minor transpose / two-batch-dim
        # dot_general that Mosaic does not lower; heads stay statically
        # unrolled (hd=4 lane slices), which costs no extra MXU passes since
        # einsum batch dims unroll on the MXU anyway.
        attn = jnp.zeros((N, H), F32)
        for h in range(num_heads):                                        # static unroll
            sl = slice(h * hd, (h + 1) * hd)
            scores = bmm('bqd,bkd->bqk', q3[:, :, sl], k3[:, :, sl])      # (B, S, S)
            probs = softmax(scores)
            ctx = bmm('bqk,bkd->bqd', probs, v3[:, :, sl])                # (B, S, hd)
            # fold head-concat into the out-projection: accumulate per head
            attn = attn + mm(ctx.reshape(N, hd), wo[sl, :])
        attn = attn + tbo_ref[l]
        # dropout1 = identity (inference)
        y = layer_norm(y + attn, tln1g_ref[l], tln1b_ref[l])
        ff = mm(_gelu(mm(y, tw1_ref[l]) + tb1_ref[l]), tw2_ref[l]) + tb2_ref[l]
        # dropout2 = identity (inference)
        y = layer_norm(y + ff, tln2g_ref[l], tln2b_ref[l])

    # --------------- DifferentiableSymbolicExecutor -------------------------
    op_w = softmax(mm(y, wsel_ref[...]) + bsel_ref[...])                  # (N, 7)
    y3 = y.reshape(B, S, H)
    # Operand mixer is identical for all 5 binary ops -> computed once.
    mix = softmax(bmm('bqh,bkh->bqk', y3, y3) * (1.0 / math.sqrt(H)))
    left = bmm('bqk,bkh->bqh', mix, y3).reshape(N, H)

    # Stacked op weights: 2 wide matmuls (output width 7H = 224 lanes) replace
    # the 12 tiny per-op (H,H) matmuls; wl7 is zero-padded for the unary ops.
    r = mm(y, wy7_ref[...]) + mm(left, wl7_ref[...]) + bex_ref[...]       # (N, 7H)
    executed = jnp.zeros((N, H), F32)
    for i in range(7):                                                    # static unroll
        executed = executed + r[:, i * H:(i + 1) * H] * op_w[:, i:i + 1]
    sym_out = mm(_gelu(mm(executed, wt1_ref[...]) + bt1_ref[...]),
                 wt2_ref[...]) + bt2_ref[...]                             # (N, H)

    # ---------------- integration_layer -------------------------------------
    # cat([hs, sym_out]) @ W folded into two matmuls on pre-split weight halves
    # (a single fused K=2H matmul would need an unaligned lane concat; the win
    # is one MXU pass, so the proven split form is kept).
    out = mm(x, wih_ref[...]) + mm(sym_out, wis_ref[...]) + bi_ref[...]
    o_ref[...] = out.reshape(B, S, H).astype(o_ref.dtype)


def _prepare_params(p, *, num_heads):
    """One-time wrapper-side param prep: stack executor op weights, fold the
    attention scale into Q, and pre-cast matmul weights to bf16."""
    H = p["ws1"].shape[0]
    hd = H // num_heads
    inv = 1.0 / math.sqrt(hd)
    bf = lambda a: a.astype(BF16)

    # (5,H,H)/(2,H,H) op weights -> column-stacked (H, 7H); left-operand
    # weights zero-padded over the two unary ops.
    wy7 = jnp.concatenate(
        [jnp.moveaxis(p["wbx"], 0, 1).reshape(H, 5 * H),
         jnp.moveaxis(p["wu"], 0, 1).reshape(H, 2 * H)], axis=1)
    wl7 = jnp.concatenate(
        [jnp.moveaxis(p["wbl"], 0, 1).reshape(H, 5 * H),
         jnp.zeros((H, 2 * H), F32)], axis=1)
    bex = jnp.concatenate(
        [p["bb"][:, 0, :].reshape(1, 5 * H),
         p["bu"][:, 0, :].reshape(1, 2 * H)], axis=1)

    return {
        # parser
        "wtc": bf(p["wtc"]), "btc": p["btc"], "emb": bf(p["emb"]),
        "ws1": bf(p["ws1"]), "bs1": p["bs1"],
        "ws2": bf(p["ws2"]), "bs2": p["bs2"],
        # transformer (1/sqrt(hd) folded into Q weight + bias)
        "twq": bf(p["twq"] * inv), "tbq": p["tbq"] * inv,
        "twk": bf(p["twk"]), "tbk": p["tbk"],
        "twv": bf(p["twv"]), "tbv": p["tbv"],
        "two": p["two"], "tbo": p["tbo"],      # two sliced per head -> keep f32
        "tw1": bf(p["tw1"]), "tb1": p["tb1"],
        "tw2": bf(p["tw2"]), "tb2": p["tb2"],
        "tln1g": p["tln1g"], "tln1b": p["tln1b"],
        "tln2g": p["tln2g"], "tln2b": p["tln2b"],
        # executor
        "wsel": bf(p["wsel"]), "bsel": p["bsel"],
        "wy7": bf(wy7), "wl7": bf(wl7), "bex": bex,
        "wt1": bf(p["wt1"]), "bt1": p["bt1"],
        "wt2": bf(p["wt2"]), "bt2": p["bt2"],
        # integration
        "wih": bf(p["wih"]), "wis": bf(p["wis"]), "bi": p["bi"],
    }


def neural_symbolic_integration(hidden_states, params, *, num_layers, num_heads):
    B, S, H = hidden_states.shape
    prepped = _prepare_params(params, num_heads=num_heads)
    kernel = functools.partial(_nsi_kernel, num_layers=num_layers, num_heads=num_heads)
    args = (hidden_states,) + tuple(prepped[k] for k in PARAM_ORDER)
    # Single invocation (no grid): every operand fits comfortably in VMEM at
    # these shapes (~100 KB total), so whole-array blocks (default specs) are
    # used.  Scaling note: if H/L/B grow, switch to a grid over layers
    # ("arbitrary") / batch ("parallel") with per-layer weight BlockSpecs.
    return pl.pallas_call(
        kernel,
        out_shape=jax.ShapeDtypeStruct((B, S, H), hidden_states.dtype),
    )(*args)


# ------------------------------ JAX reference --------------------------------
def reference_jax(hs, p, *, num_layers, num_heads):
    """Direct transcription of the PyTorch forward (inference mode, f32)."""
    B, S, H = hs.shape
    hd = H // num_heads

    def layer_norm(z, g, b):
        mu = z.mean(-1, keepdims=True)
        var = ((z - mu) ** 2).mean(-1, keepdims=True)
        return (z - mu) * jax.lax.rsqrt(var + 1e-5) * g + b

    x = hs
    # parser
    sym_probs = jax.nn.softmax(x @ p["wtc"] + p["btc"], axis=-1)
    weighted_symbols = sym_probs @ p["emb"]
    s_hidden = _gelu(x @ p["ws1"] + p["bs1"])
    structure_probs = jax.nn.softmax(s_hidden @ p["ws2"] + p["bs2"], axis=-1)
    p0 = structure_probs[..., 0:1]
    y = weighted_symbols * p0 + x * (1.0 - p0)

    for l in range(num_layers):
        q = y @ p["twq"][l] + p["tbq"][l]
        k = y @ p["twk"][l] + p["tbk"][l]
        v = y @ p["twv"][l] + p["tbv"][l]
        q = q.reshape(B, S, num_heads, hd).transpose(0, 2, 1, 3)
        k = k.reshape(B, S, num_heads, hd).transpose(0, 2, 1, 3)
        v = v.reshape(B, S, num_heads, hd).transpose(0, 2, 1, 3)
        scores = (q / math.sqrt(hd)) @ jnp.swapaxes(k, -1, -2)
        probs = jax.nn.softmax(scores, axis=-1)
        ctx = (probs @ v).transpose(0, 2, 1, 3).reshape(B, S, H)
        attn = ctx @ p["two"][l] + p["tbo"][l]
        y = layer_norm(y + attn, p["tln1g"][l], p["tln1b"][l])
        ff = _gelu(y @ p["tw1"][l] + p["tb1"][l]) @ p["tw2"][l] + p["tb2"][l]
        y = layer_norm(y + ff, p["tln2g"][l], p["tln2b"][l])

    # executor
    op_w = jax.nn.softmax(y @ p["wsel"] + p["bsel"], axis=-1)
    mix = jax.nn.softmax(y @ jnp.swapaxes(y, -1, -2) / math.sqrt(H), axis=-1)
    left = mix @ y
    combined = jnp.concatenate([y, left], axis=-1)
    executed = jnp.zeros_like(y)
    for i in range(5):
        wb = jnp.concatenate([p["wbx"][i], p["wbl"][i]], axis=0)
        executed = executed + (combined @ wb + p["bb"][i]) * op_w[..., i:i + 1]
    for j in range(2):
        executed = executed + (y @ p["wu"][j] + p["bu"][j]) * op_w[..., 5 + j:6 + j]
    sym_out = _gelu(executed @ p["wt1"] + p["bt1"]) @ p["wt2"] + p["bt2"]

    w_int = jnp.concatenate([p["wih"], p["wis"]], axis=0)
    return jnp.concatenate([hs, sym_out], axis=-1) @ w_int + p["bi"]


def make_params(key, *, H, V, L, FF):
    kit = iter(jax.random.split(key, 64))

    def w(shape, scale=0.08):
        return (scale * jax.random.normal(next(kit), shape)).astype(jnp.float32)

    return {
        # parser
        "wtc": w((H, V)), "btc": w((1, V)),
        "emb": w((V, H), 0.3),
        "ws1": w((H, H)), "bs1": w((1, H)),
        "ws2": w((H, 3)), "bs2": w((1, 3)),
        # transformer stacks (leading dim = layer)
        "twq": w((L, H, H)), "tbq": w((L, 1, H)),
        "twk": w((L, H, H)), "tbk": w((L, 1, H)),
        "twv": w((L, H, H)), "tbv": w((L, 1, H)),
        "two": w((L, H, H)), "tbo": w((L, 1, H)),
        "tw1": w((L, H, FF)), "tb1": w((L, 1, FF)),
        "tw2": w((L, FF, H)), "tb2": w((L, 1, H)),
        "tln1g": 1.0 + w((L, 1, H), 0.05), "tln1b": w((L, 1, H), 0.05),
        "tln2g": 1.0 + w((L, 1, H), 0.05), "tln2b": w((L, 1, H), 0.05),
        # executor
        "wsel": w((H, 7)), "bsel": w((1, 7)),
        "wbx": w((5, H, H)), "wbl": w((5, H, H)), "bb": w((5, 1, H)),
        "wu": w((2, H, H)), "bu": w((2, 1, H)),
        "wt1": w((H, H)), "bt1": w((1, H)),
        "wt2": w((H, H)), "bt2": w((1, H)),
        # integration (split halves of the (2H, H) weight)
        "wih": w((H, H)), "wis": w((H, H)), "bi": w((1, H)),
    }


if __name__ == "__main__":
    B, S, H = 2, 8, 32          # batch, seq, hidden_size
    V, L, NH = 64, 2, 8         # symbol vocab, symbolic_integration_layers, nhead
    FF = 4 * H                  # dim_feedforward

    root = jax.random.PRNGKey(0)
    k_hs, k_p = jax.random.split(root)
    hidden_states = jax.random.normal(k_hs, (B, S, H), dtype=jnp.float32)
    params = make_params(k_p, H=H, V=V, L=L, FF=FF)

    out = neural_symbolic_integration(hidden_states, params,
                                      num_layers=L, num_heads=NH)
    out = jax.block_until_ready(out)

    ref = reference_jax(hidden_states, params, num_layers=L, num_heads=NH)
    assert out.shape == (B, S, H)
    # bf16 MXU operands (per perf review) + EUP approximate-reciprocal softmax
    # denominators vs. the exact f32 reference: budget ~1e-2 end-to-end drift.
    assert jnp.allclose(out, ref, atol=2e-2, rtol=2e-2), "mismatch vs JAX reference"

    print("KERNEL_OK")
</pallas_src>

<mosaic_0001>
module attributes {stable_mosaic.version = 11 : i64} {
  func.func @_nsi_kernel(%arg0: memref<2x8x32xf32, #tpu.memory_space<vmem>>, %arg1: memref<32x64xbf16, #tpu.memory_space<vmem>>, %arg2: memref<1x64xf32, #tpu.memory_space<vmem>>, %arg3: memref<64x32xbf16, #tpu.memory_space<vmem>>, %arg4: memref<32x32xbf16, #tpu.memory_space<vmem>>, %arg5: memref<1x32xf32, #tpu.memory_space<vmem>>, %arg6: memref<32x3xbf16, #tpu.memory_space<vmem>>, %arg7: memref<1x3xf32, #tpu.memory_space<vmem>>, %arg8: memref<2x32x32xbf16, #tpu.memory_space<vmem>>, %arg9: memref<2x1x32xf32, #tpu.memory_space<vmem>>, %arg10: memref<2x32x32xbf16, #tpu.memory_space<vmem>>, %arg11: memref<2x1x32xf32, #tpu.memory_space<vmem>>, %arg12: memref<2x32x32xbf16, #tpu.memory_space<vmem>>, %arg13: memref<2x1x32xf32, #tpu.memory_space<vmem>>, %arg14: memref<2x32x32xf32, #tpu.memory_space<vmem>>, %arg15: memref<2x1x32xf32, #tpu.memory_space<vmem>>, %arg16: memref<2x32x128xbf16, #tpu.memory_space<vmem>>, %arg17: memref<2x1x128xf32, #tpu.memory_space<vmem>>, %arg18: memref<2x128x32xbf16, #tpu.memory_space<vmem>>, %arg19: memref<2x1x32xf32, #tpu.memory_space<vmem>>, %arg20: memref<2x1x32xf32, #tpu.memory_space<vmem>>, %arg21: memref<2x1x32xf32, #tpu.memory_space<vmem>>, %arg22: memref<2x1x32xf32, #tpu.memory_space<vmem>>, %arg23: memref<2x1x32xf32, #tpu.memory_space<vmem>>, %arg24: memref<32x7xbf16, #tpu.memory_space<vmem>>, %arg25: memref<1x7xf32, #tpu.memory_space<vmem>>, %arg26: memref<32x224xbf16, #tpu.memory_space<vmem>>, %arg27: memref<32x224xbf16, #tpu.memory_space<vmem>>, %arg28: memref<1x224xf32, #tpu.memory_space<vmem>>, %arg29: memref<32x32xbf16, #tpu.memory_space<vmem>>, %arg30: memref<1x32xf32, #tpu.memory_space<vmem>>, %arg31: memref<32x32xbf16, #tpu.memory_space<vmem>>, %arg32: memref<1x32xf32, #tpu.memory_space<vmem>>, %arg33: memref<32x32xbf16, #tpu.memory_space<vmem>>, %arg34: memref<32x32xbf16, #tpu.memory_space<vmem>>, %arg35: memref<1x32xf32, #tpu.memory_space<vmem>>, %arg36: memref<2x8x32xf32, #tpu.memory_space<vmem>>) attributes {dimension_semantics = [], scalar_prefetch = 0 : i64, scratch_operands = 0 : i64, tpu.core_type = #tpu.core_type<tc>} {
    %c0 = arith.constant 0 : index
    %c0_0 = arith.constant 0 : index
    %c0_1 = arith.constant 0 : index
    %0 = vector.load %arg0[%c0, %c0_0, %c0_1] : memref<2x8x32xf32, #tpu.memory_space<vmem>>, vector<2x8x32xf32>
    %1 = vector.shape_cast %0 : vector<2x8x32xf32> to vector<16x32xf32>
    %c0_2 = arith.constant 0 : index
    %c0_3 = arith.constant 0 : index
    %2 = vector.load %arg1[%c0_2, %c0_3] : memref<32x64xbf16, #tpu.memory_space<vmem>>, vector<32x64xbf16>
    %3 = arith.truncf %1 : vector<16x32xf32> to vector<16x32xbf16>
    %cst = arith.constant dense<0.000000e+00> : vector<16x64xf32>
    %4 = tpu.matmul %3, %2, %cst {dimension_numbers = #tpu.dot_dimension_numbers<[1], [0], [0], [1], [0, 0, 1, 1], [], []>} : vector<16x32xbf16>, vector<32x64xbf16>, vector<16x64xf32> -> vector<16x64xf32>
    %c0_4 = arith.constant 0 : index
    %c0_5 = arith.constant 0 : index
    %5 = vector.load %arg2[%c0_4, %c0_5] : memref<1x64xf32, #tpu.memory_space<vmem>>, vector<1x64xf32>
    %6 = vector.broadcast %5 : vector<1x64xf32> to vector<16x64xf32>
    %7 = arith.addf %4, %6 : vector<16x64xf32>
    %cst_6 = arith.constant dense<0xFF800000> : vector<16xf32>
    %8 = vector.multi_reduction <maximumf>, %7, %cst_6 [1] : vector<16x64xf32> to vector<16xf32>
    %9 = vector.shape_cast %8 : vector<16xf32> to vector<16x1xf32>
    %10 = vector.broadcast %9 : vector<16x1xf32> to vector<16x64xf32>
    %11 = arith.subf %7, %10 : vector<16x64xf32>
    %12 = math.exp %11 : vector<16x64xf32>
    %cst_7 = arith.constant dense<0.000000e+00> : vector<16xf32>
    %13 = vector.multi_reduction <add>, %12, %cst_7 [1] : vector<16x64xf32> to vector<16xf32>
    %14 = vector.shape_cast %13 : vector<16xf32> to vector<16x1xf32>
    %15 = tpu.reciprocal %14 {approx = true} : vector<16x1xf32> -> vector<16x1xf32>
    %16 = vector.broadcast %15 : vector<16x1xf32> to vector<16x64xf32>
    %17 = arith.mulf %12, %16 : vector<16x64xf32>
    %c0_8 = arith.constant 0 : index
    %c0_9 = arith.constant 0 : index
    %18 = vector.load %arg3[%c0_8, %c0_9] : memref<64x32xbf16, #tpu.memory_space<vmem>>, vector<64x32xbf16>
    %19 = arith.truncf %17 : vector<16x64xf32> to vector<16x64xbf16>
    %cst_10 = arith.constant dense<0.000000e+00> : vector<16x32xf32>
    %20 = tpu.matmul %19, %18, %cst_10 {dimension_numbers = #tpu.dot_dimension_numbers<[1], [0], [0], [1], [0, 0, 1, 1], [], []>} : vector<16x64xbf16>, vector<64x32xbf16>, vector<16x32xf32> -> vector<16x32xf32>
    %c0_11 = arith.constant 0 : index
    %c0_12 = arith.constant 0 : index
    %21 = vector.load %arg4[%c0_11, %c0_12] : memref<32x32xbf16, #tpu.memory_space<vmem>>, vector<32x32xbf16>
    %22 = arith.truncf %1 : vector<16x32xf32> to vector<16x32xbf16>
    %cst_13 = arith.constant dense<0.000000e+00> : vector<16x32xf32>
    %23 = tpu.matmul %22, %21, %cst_13 {dimension_numbers = #tpu.dot_dimension_numbers<[1], [0], [0], [1], [0, 0, 1, 1], [], []>} : vector<16x32xbf16>, vector<32x32xbf16>, vector<16x32xf32> -> vector<16x32xf32>
    %c0_14 = arith.constant 0 : index
    %c0_15 = arith.constant 0 : index
    %24 = vector.load %arg5[%c0_14, %c0_15] : memref<1x32xf32, #tpu.memory_space<vmem>>, vector<1x32xf32>
    %25 = vector.broadcast %24 : vector<1x32xf32> to vector<16x32xf32>
    %26 = arith.addf %23, %25 : vector<16x32xf32>
    %cst_16 = arith.constant 5.000000e-01 : f32
    %27 = vector.broadcast %cst_16 : f32 to vector<16x32xf32>
    %28 = arith.mulf %27, %26 : vector<16x32xf32>
    %cst_17 = arith.constant 4.471500e-02 : f32
    %29 = vector.broadcast %cst_17 : f32 to vector<16x32xf32>
    %30 = arith.mulf %29, %26 : vector<16x32xf32>
    %31 = arith.mulf %30, %26 : vector<16x32xf32>
    %32 = arith.mulf %31, %26 : vector<16x32xf32>
    %33 = arith.addf %26, %32 : vector<16x32xf32>
    %cst_18 = arith.constant 0.797884583 : f32
    %34 = vector.broadcast %cst_18 : f32 to vector<16x32xf32>
    %35 = arith.mulf %34, %33 : vector<16x32xf32>
    %36 = math.tanh %35 : vector<16x32xf32>
    %cst_19 = arith.constant 1.000000e+00 : f32
    %37 = vector.broadcast %cst_19 : f32 to vector<16x32xf32>
    %38 = arith.addf %37, %36 : vector<16x32xf32>
    %39 = arith.mulf %28, %38 : vector<16x32xf32>
    %c0_20 = arith.constant 0 : index
    %c0_21 = arith.constant 0 : index
    %40 = vector.load %arg6[%c0_20, %c0_21] : memref<32x3xbf16, #tpu.memory_space<vmem>>, vector<32x3xbf16>
    %41 = arith.truncf %39 : vector<16x32xf32> to vector<16x32xbf16>
    %cst_22 = arith.constant dense<0.000000e+00> : vector<16x3xf32>
    %42 = tpu.matmul %41, %40, %cst_22 {dimension_numbers = #tpu.dot_dimension_numbers<[1], [0], [0], [1], [0, 0, 1, 1], [], []>} : vector<16x32xbf16>, vector<32x3xbf16>, vector<16x3xf32> -> vector<16x3xf32>
    %c0_23 = arith.constant 0 : index
    %c0_24 = arith.constant 0 : index
    %43 = vector.load %arg7[%c0_23, %c0_24] : memref<1x3xf32, #tpu.memory_space<vmem>>, vector<1x3xf32>
    %44 = vector.broadcast %43 : vector<1x3xf32> to vector<16x3xf32>
    %45 = arith.addf %42, %44 : vector<16x3xf32>
    %cst_25 = arith.constant dense<0xFF800000> : vector<16xf32>
    %46 = vector.multi_reduction <maximumf>, %45, %cst_25 [1] : vector<16x3xf32> to vector<16xf32>
    %47 = vector.shape_cast %46 : vector<16xf32> to vector<16x1xf32>
    %48 = vector.broadcast %47 : vector<16x1xf32> to vector<16x3xf32>
    %49 = arith.subf %45, %48 : vector<16x3xf32>
    %50 = math.exp %49 : vector<16x3xf32>
    %cst_26 = arith.constant dense<0.000000e+00> : vector<16xf32>
    %51 = vector.multi_reduction <add>, %50, %cst_26 [1] : vector<16x3xf32> to vector<16xf32>
    %52 = vector.shape_cast %51 : vector<16xf32> to vector<16x1xf32>
    %53 = tpu.reciprocal %52 {approx = true} : vector<16x1xf32> -> vector<16x1xf32>
    %54 = vector.broadcast %53 : vector<16x1xf32> to vector<16x3xf32>
    %55 = arith.mulf %50, %54 : vector<16x3xf32>
    %56 = vector.extract_strided_slice %55 {offsets = [0, 0], sizes = [16, 1], strides = [1, 1]} : vector<16x3xf32> to vector<16x1xf32>
    %57 = vector.broadcast %56 : vector<16x1xf32> to vector<16x32xf32>
    %58 = arith.mulf %20, %57 : vector<16x32xf32>
    %cst_27 = arith.constant 1.000000e+00 : f32
    %59 = vector.broadcast %cst_27 : f32 to vector<16x1xf32>
    %60 = arith.subf %59, %56 : vector<16x1xf32>
    %61 = vector.broadcast %60 : vector<16x1xf32> to vector<16x32xf32>
    %62 = arith.mulf %1, %61 : vector<16x32xf32>
    %63 = arith.addf %58, %62 : vector<16x32xf32>
    %c0_28 = arith.constant 0 : index
    %c0_29 = arith.constant 0 : index
    %c0_30 = arith.constant 0 : index
    %64 = vector.load %arg8[%c0_28, %c0_29, %c0_30] : memref<2x32x32xbf16, #tpu.memory_space<vmem>>, vector<1x32x32xbf16>
    %65 = vector.shape_cast %64 : vector<1x32x32xbf16> to vector<32x32xbf16>
    %66 = arith.truncf %63 : vector<16x32xf32> to vector<16x32xbf16>
    %cst_31 = arith.constant dense<0.000000e+00> : vector<16x32xf32>
    %67 = tpu.matmul %66, %65, %cst_31 {dimension_numbers = #tpu.dot_dimension_numbers<[1], [0], [0], [1], [0, 0, 1, 1], [], []>} : vector<16x32xbf16>, vector<32x32xbf16>, vector<16x32xf32> -> vector<16x32xf32>
    %c0_32 = arith.constant 0 : index
    %c0_33 = arith.constant 0 : index
    %c0_34 = arith.constant 0 : index
    %68 = vector.load %arg9[%c0_32, %c0_33, %c0_34] : memref<2x1x32xf32, #tpu.memory_space<vmem>>, vector<1x1x32xf32>
    %69 = vector.shape_cast %68 : vector<1x1x32xf32> to vector<1x32xf32>
    %70 = vector.broadcast %69 : vector<1x32xf32> to vector<16x32xf32>
    %71 = arith.addf %67, %70 : vector<16x32xf32>
    %c0_35 = arith.constant 0 : index
    %c0_36 = arith.constant 0 : index
    %c0_37 = arith.constant 0 : index
    %72 = vector.load %arg10[%c0_35, %c0_36, %c0_37] : memref<2x32x32xbf16, #tpu.memory_space<vmem>>, vector<1x32x32xbf16>
    %73 = vector.shape_cast %72 : vector<1x32x32xbf16> to vector<32x32xbf16>
    %74 = arith.truncf %63 : vector<16x32xf32> to vector<16x32xbf16>
    %cst_38 = arith.constant dense<0.000000e+00> : vector<16x32xf32>
    %75 = tpu.matmul %74, %73, %cst_38 {dimension_numbers = #tpu.dot_dimension_numbers<[1], [0], [0], [1], [0, 0, 1, 1], [], []>} : vector<16x32xbf16>, vector<32x32xbf16>, vector<16x32xf32> -> vector<16x32xf32>
    %c0_39 = arith.constant 0 : index
    %c0_40 = arith.constant 0 : index
    %c0_41 = arith.constant 0 : index
    %76 = vector.load %arg11[%c0_39, %c0_40, %c0_41] : memref<2x1x32xf32, #tpu.memory_space<vmem>>, vector<1x1x32xf32>
    %77 = vector.shape_cast %76 : vector<1x1x32xf32> to vector<1x32xf32>
    %78 = vector.broadcast %77 : vector<1x32xf32> to vector<16x32xf32>
    %79 = arith.addf %75, %78 : vector<16x32xf32>
    %c0_42 = arith.constant 0 : index
    %c0_43 = arith.constant 0 : index
    %c0_44 = arith.constant 0 : index
    %80 = vector.load %arg12[%c0_42, %c0_43, %c0_44] : memref<2x32x32xbf16, #tpu.memory_space<vmem>>, vector<1x32x32xbf16>
    %81 = vector.shape_cast %80 : vector<1x32x32xbf16> to vector<32x32xbf16>
    %82 = arith.truncf %63 : vector<16x32xf32> to vector<16x32xbf16>
    %cst_45 = arith.constant dense<0.000000e+00> : vector<16x32xf32>
    %83 = tpu.matmul %82, %81, %cst_45 {dimension_numbers = #tpu.dot_dimension_numbers<[1], [0], [0], [1], [0, 0, 1, 1], [], []>} : vector<16x32xbf16>, vector<32x32xbf16>, vector<16x32xf32> -> vector<16x32xf32>
    %c0_46 = arith.constant 0 : index
    %c0_47 = arith.constant 0 : index
    %c0_48 = arith.constant 0 : index
    %84 = vector.load %arg13[%c0_46, %c0_47, %c0_48] : memref<2x1x32xf32, #tpu.memory_space<vmem>>, vector<1x1x32xf32>
    %85 = vector.shape_cast %84 : vector<1x1x32xf32> to vector<1x32xf32>
    %86 = vector.broadcast %85 : vector<1x32xf32> to vector<16x32xf32>
    %87 = arith.addf %83, %86 : vector<16x32xf32>
    %88 = vector.shape_cast %71 : vector<16x32xf32> to vector<2x8x32xf32>
    %89 = vector.shape_cast %79 : vector<16x32xf32> to vector<2x8x32xf32>
    %90 = vector.shape_cast %87 : vector<16x32xf32> to vector<2x8x32xf32>
    %c0_49 = arith.constant 0 : index
    %c0_50 = arith.constant 0 : index
    %c0_51 = arith.constant 0 : index
    %91 = vector.load %arg14[%c0_49, %c0_50, %c0_51] : memref<2x32x32xf32, #tpu.memory_space<vmem>>, vector<1x32x32xf32>
    %92 = vector.shape_cast %91 : vector<1x32x32xf32> to vector<32x32xf32>
    %cst_52 = arith.constant 0.000000e+00 : f32
    %93 = vector.broadcast %cst_52 : f32 to vector<16x32xf32>
    %94 = vector.extract_strided_slice %88 {offsets = [0, 0, 0], sizes = [2, 8, 4], strides = [1, 1, 1]} : vector<2x8x32xf32> to vector<2x8x4xf32>
    %95 = vector.extract_strided_slice %89 {offsets = [0, 0, 0], sizes = [2, 8, 4], strides = [1, 1, 1]} : vector<2x8x32xf32> to vector<2x8x4xf32>
    %96 = arith.truncf %94 : vector<2x8x4xf32> to vector<2x8x4xbf16>
    %97 = arith.truncf %95 : vector<2x8x4xf32> to vector<2x8x4xbf16>
    "tpu.trace_start"() <{level = 10 : i32, message = "bqd,bkd->bqk"}> : () -> ()
    %cst_53 = arith.constant dense<0.000000e+00> : vector<2x8x8xf32>
    %98 = tpu.matmul %96, %97, %cst_53 {dimension_numbers = #tpu.dot_dimension_numbers<[2], [2], [1], [1], [0, 0, 0, 1, 1, 1], [0], [0]>} : vector<2x8x4xbf16>, vector<2x8x4xbf16>, vector<2x8x8xf32> -> vector<2x8x8xf32>
    "tpu.trace_stop"() : () -> ()
    %cst_54 = arith.constant dense<0xFF800000> : vector<2x8xf32>
    %99 = vector.multi_reduction <maximumf>, %98, %cst_54 [2] : vector<2x8x8xf32> to vector<2x8xf32>
    %100 = vector.shape_cast %99 : vector<2x8xf32> to vector<2x8x1xf32>
    %101 = vector.broadcast %100 : vector<2x8x1xf32> to vector<2x8x8xf32>
    %102 = arith.subf %98, %101 : vector<2x8x8xf32>
    %103 = math.exp %102 : vector<2x8x8xf32>
    %cst_55 = arith.constant dense<0.000000e+00> : vector<2x8xf32>
    %104 = vector.multi_reduction <add>, %103, %cst_55 [2] : vector<2x8x8xf32> to vector<2x8xf32>
    %105 = vector.shape_cast %104 : vector<2x8xf32> to vector<2x8x1xf32>
    %106 = tpu.reciprocal %105 {approx = true} : vector<2x8x1xf32> -> vector<2x8x1xf32>
    %107 = vector.broadcast %106 : vector<2x8x1xf32> to vector<2x8x8xf32>
    %108 = arith.mulf %103, %107 : vector<2x8x8xf32>
    %109 = vector.extract_strided_slice %90 {offsets = [0, 0, 0], sizes = [2, 8, 4], strides = [1, 1, 1]} : vector<2x8x32xf32> to vector<2x8x4xf32>
    %110 = arith.truncf %108 : vector<2x8x8xf32> to vector<2x8x8xbf16>
    %111 = arith.truncf %109 : vector<2x8x4xf32> to vector<2x8x4xbf16>
    "tpu.trace_start"() <{level = 10 : i32, message = "bqk,bkd->bqd"}> : () -> ()
    %cst_56 = arith.constant dense<0.000000e+00> : vector<2x8x4xf32>
    %112 = tpu.matmul %110, %111, %cst_56 {dimension_numbers = #tpu.dot_dimension_numbers<[2], [1], [1], [2], [0, 0, 0, 1, 1, 2], [0], [0]>} : vector<2x8x8xbf16>, vector<2x8x4xbf16>, vector<2x8x4xf32> -> vector<2x8x4xf32>
    "tpu.trace_stop"() : () -> ()
    %113 = vector.shape_cast %112 : vector<2x8x4xf32> to vector<16x4xf32>
    %114 = vector.extract_strided_slice %92 {offsets = [0, 0], sizes = [4, 32], strides = [1, 1]} : vector<32x32xf32> to vector<4x32xf32>
    %115 = arith.truncf %113 : vector<16x4xf32> to vector<16x4xbf16>
    %116 = arith.truncf %114 : vector<4x32xf32> to vector<4x32xbf16>
    %cst_57 = arith.constant dense<0.000000e+00> : vector<16x32xf32>
    %117 = tpu.matmul %115, %116, %cst_57 {dimension_numbers = #tpu.dot_dimension_numbers<[1], [0], [0], [1], [0, 0, 1, 1], [], []>} : vector<16x4xbf16>, vector<4x32xbf16>, vector<16x32xf32> -> vector<16x32xf32>
    %118 = arith.addf %93, %117 : vector<16x32xf32>
    %119 = vector.extract_strided_slice %88 {offsets = [0, 0, 4], sizes = [2, 8, 4], strides = [1, 1, 1]} : vector<2x8x32xf32> to vector<2x8x4xf32>
    %120 = vector.extract_strided_slice %89 {offsets = [0, 0, 4], sizes = [2, 8, 4], strides = [1, 1, 1]} : vector<2x8x32xf32> to vector<2x8x4xf32>
    %121 = arith.truncf %119 : vector<2x8x4xf32> to vector<2x8x4xbf16>
    %122 = arith.truncf %120 : vector<2x8x4xf32> to vector<2x8x4xbf16>
    "tpu.trace_start"() <{level = 10 : i32, message = "bqd,bkd->bqk"}> : () -> ()
    %cst_58 = arith.constant dense<0.000000e+00> : vector<2x8x8xf32>
    %123 = tpu.matmul %121, %122, %cst_58 {dimension_numbers = #tpu.dot_dimension_numbers<[2], [2], [1], [1], [0, 0, 0, 1, 1, 1], [0], [0]>} : vector<2x8x4xbf16>, vector<2x8x4xbf16>, vector<2x8x8xf32> -> vector<2x8x8xf32>
    "tpu.trace_stop"() : () -> ()
    %cst_59 = arith.constant dense<0xFF800000> : vector<2x8xf32>
    %124 = vector.multi_reduction <maximumf>, %123, %cst_59 [2] : vector<2x8x8xf32> to vector<2x8xf32>
    %125 = vector.shape_cast %124 : vector<2x8xf32> to vector<2x8x1xf32>
    %126 = vector.broadcast %125 : vector<2x8x1xf32> to vector<2x8x8xf32>
    %127 = arith.subf %123, %126 : vector<2x8x8xf32>
    %128 = math.exp %127 : vector<2x8x8xf32>
    %cst_60 = arith.constant dense<0.000000e+00> : vector<2x8xf32>
    %129 = vector.multi_reduction <add>, %128, %cst_60 [2] : vector<2x8x8xf32> to vector<2x8xf32>
    %130 = vector.shape_cast %129 : vector<2x8xf32> to vector<2x8x1xf32>
    %131 = tpu.reciprocal %130 {approx = true} : vector<2x8x1xf32> -> vector<2x8x1xf32>
    %132 = vector.broadcast %131 : vector<2x8x1xf32> to vector<2x8x8xf32>
    %133 = arith.mulf %128, %132 : vector<2x8x8xf32>
    %134 = vector.extract_strided_slice %90 {offsets = [0, 0, 4], sizes = [2, 8, 4], strides = [1, 1, 1]} : vector<2x8x32xf32> to vector<2x8x4xf32>
    %135 = arith.truncf %133 : vector<2x8x8xf32> to vector<2x8x8xbf16>
    %136 = arith.truncf %134 : vector<2x8x4xf32> to vector<2x8x4xbf16>
    "tpu.trace_start"() <{level = 10 : i32, message = "bqk,bkd->bqd"}> : () -> ()
    %cst_61 = arith.constant dense<0.000000e+00> : vector<2x8x4xf32>
    %137 = tpu.matmul %135, %136, %cst_61 {dimension_numbers = #tpu.dot_dimension_numbers<[2], [1], [1], [2], [0, 0, 0, 1, 1, 2], [0], [0]>} : vector<2x8x8xbf16>, vector<2x8x4xbf16>, vector<2x8x4xf32> -> vector<2x8x4xf32>
    "tpu.trace_stop"() : () -> ()
    %138 = vector.shape_cast %137 : vector<2x8x4xf32> to vector<16x4xf32>
    %139 = vector.extract_strided_slice %92 {offsets = [4, 0], sizes = [4, 32], strides = [1, 1]} : vector<32x32xf32> to vector<4x32xf32>
    %140 = arith.truncf %138 : vector<16x4xf32> to vector<16x4xbf16>
    %141 = arith.truncf %139 : vector<4x32xf32> to vector<4x32xbf16>
    %cst_62 = arith.constant dense<0.000000e+00> : vector<16x32xf32>
    %142 = tpu.matmul %140, %141, %cst_62 {dimension_numbers = #tpu.dot_dimension_numbers<[1], [0], [0], [1], [0, 0, 1, 1], [], []>} : vector<16x4xbf16>, vector<4x32xbf16>, vector<16x32xf32> -> vector<16x32xf32>
    %143 = arith.addf %118, %142 : vector<16x32xf32>
    %144 = vector.extract_strided_slice %88 {offsets = [0, 0, 8], sizes = [2, 8, 4], strides = [1, 1, 1]} : vector<2x8x32xf32> to vector<2x8x4xf32>
    %145 = vector.extract_strided_slice %89 {offsets = [0, 0, 8], sizes = [2, 8, 4], strides = [1, 1, 1]} : vector<2x8x32xf32> to vector<2x8x4xf32>
    %146 = arith.truncf %144 : vector<2x8x4xf32> to vector<2x8x4xbf16>
    %147 = arith.truncf %145 : vector<2x8x4xf32> to vector<2x8x4xbf16>
    "tpu.trace_start"() <{level = 10 : i32, message = "bqd,bkd->bqk"}> : () -> ()
    %cst_63 = arith.constant dense<0.000000e+00> : vector<2x8x8xf32>
    %148 = tpu.matmul %146, %147, %cst_63 {dimension_numbers = #tpu.dot_dimension_numbers<[2], [2], [1], [1], [0, 0, 0, 1, 1, 1], [0], [0]>} : vector<2x8x4xbf16>, vector<2x8x4xbf16>, vector<2x8x8xf32> -> vector<2x8x8xf32>
    "tpu.trace_stop"() : () -> ()
    %cst_64 = arith.constant dense<0xFF800000> : vector<2x8xf32>
    %149 = vector.multi_reduction <maximumf>, %148, %cst_64 [2] : vector<2x8x8xf32> to vector<2x8xf32>
    %150 = vector.shape_cast %149 : vector<2x8xf32> to vector<2x8x1xf32>
    %151 = vector.broadcast %150 : vector<2x8x1xf32> to vector<2x8x8xf32>
    %152 = arith.subf %148, %151 : vector<2x8x8xf32>
    %153 = math.exp %152 : vector<2x8x8xf32>
    %cst_65 = arith.constant dense<0.000000e+00> : vector<2x8xf32>
    %154 = vector.multi_reduction <add>, %153, %cst_65 [2] : vector<2x8x8xf32> to vector<2x8xf32>
    %155 = vector.shape_cast %154 : vector<2x8xf32> to vector<2x8x1xf32>
    %156 = tpu.reciprocal %155 {approx = true} : vector<2x8x1xf32> -> vector<2x8x1xf32>
    %157 = vector.broadcast %156 : vector<2x8x1xf32> to vector<2x8x8xf32>
    %158 = arith.mulf %153, %157 : vector<2x8x8xf32>
    %159 = vector.extract_strided_slice %90 {offsets = [0, 0, 8], sizes = [2, 8, 4], strides = [1, 1, 1]} : vector<2x8x32xf32> to vector<2x8x4xf32>
    %160 = arith.truncf %158 : vector<2x8x8xf32> to vector<2x8x8xbf16>
    %161 = arith.truncf %159 : vector<2x8x4xf32> to vector<2x8x4xbf16>
    "tpu.trace_start"() <{level = 10 : i32, message = "bqk,bkd->bqd"}> : () -> ()
    %cst_66 = arith.constant dense<0.000000e+00> : vector<2x8x4xf32>
    %162 = tpu.matmul %160, %161, %cst_66 {dimension_numbers = #tpu.dot_dimension_numbers<[2], [1], [1], [2], [0, 0, 0, 1, 1, 2], [0], [0]>} : vector<2x8x8xbf16>, vector<2x8x4xbf16>, vector<2x8x4xf32> -> vector<2x8x4xf32>
    "tpu.trace_stop"() : () -> ()
    %163 = vector.shape_cast %162 : vector<2x8x4xf32> to vector<16x4xf32>
    %164 = vector.extract_strided_slice %92 {offsets = [8, 0], sizes = [4, 32], strides = [1, 1]} : vector<32x32xf32> to vector<4x32xf32>
    %165 = arith.truncf %163 : vector<16x4xf32> to vector<16x4xbf16>
    %166 = arith.truncf %164 : vector<4x32xf32> to vector<4x32xbf16>
    %cst_67 = arith.constant dense<0.000000e+00> : vector<16x32xf32>
    %167 = tpu.matmul %165, %166, %cst_67 {dimension_numbers = #tpu.dot_dimension_numbers<[1], [0], [0], [1], [0, 0, 1, 1], [], []>} : vector<16x4xbf16>, vector<4x32xbf16>, vector<16x32xf32> -> vector<16x32xf32>
    %168 = arith.addf %143, %167 : vector<16x32xf32>
    %169 = vector.extract_strided_slice %88 {offsets = [0, 0, 12], sizes = [2, 8, 4], strides = [1, 1, 1]} : vector<2x8x32xf32> to vector<2x8x4xf32>
    %170 = vector.extract_strided_slice %89 {offsets = [0, 0, 12], sizes = [2, 8, 4], strides = [1, 1, 1]} : vector<2x8x32xf32> to vector<2x8x4xf32>
    %171 = arith.truncf %169 : vector<2x8x4xf32> to vector<2x8x4xbf16>
    %172 = arith.truncf %170 : vector<2x8x4xf32> to vector<2x8x4xbf16>
    "tpu.trace_start"() <{level = 10 : i32, message = "bqd,bkd->bqk"}> : () -> ()
    %cst_68 = arith.constant dense<0.000000e+00> : vector<2x8x8xf32>
    %173 = tpu.matmul %171, %172, %cst_68 {dimension_numbers = #tpu.dot_dimension_numbers<[2], [2], [1], [1], [0, 0, 0, 1, 1, 1], [0], [0]>} : vector<2x8x4xbf16>, vector<2x8x4xbf16>, vector<2x8x8xf32> -> vector<2x8x8xf32>
    "tpu.trace_stop"() : () -> ()
    %cst_69 = arith.constant dense<0xFF800000> : vector<2x8xf32>
    %174 = vector.multi_reduction <maximumf>, %173, %cst_69 [2] : vector<2x8x8xf32> to vector<2x8xf32>
    %175 = vector.shape_cast %174 : vector<2x8xf32> to vector<2x8x1xf32>
    %176 = vector.broadcast %175 : vector<2x8x1xf32> to vector<2x8x8xf32>
    %177 = arith.subf %173, %176 : vector<2x8x8xf32>
    %178 = math.exp %177 : vector<2x8x8xf32>
    %cst_70 = arith.constant dense<0.000000e+00> : vector<2x8xf32>
    %179 = vector.multi_reduction <add>, %178, %cst_70 [2] : vector<2x8x8xf32> to vector<2x8xf32>
    %180 = vector.shape_cast %179 : vector<2x8xf32> to vector<2x8x1xf32>
    %181 = tpu.reciprocal %180 {approx = true} : vector<2x8x1xf32> -> vector<2x8x1xf32>
    %182 = vector.broadcast %181 : vector<2x8x1xf32> to vector<2x8x8xf32>
    %183 = arith.mulf %178, %182 : vector<2x8x8xf32>
    %184 = vector.extract_strided_slice %90 {offsets = [0, 0, 12], sizes = [2, 8, 4], strides = [1, 1, 1]} : vector<2x8x32xf32> to vector<2x8x4xf32>
    %185 = arith.truncf %183 : vector<2x8x8xf32> to vector<2x8x8xbf16>
    %186 = arith.truncf %184 : vector<2x8x4xf32> to vector<2x8x4xbf16>
    "tpu.trace_start"() <{level = 10 : i32, message = "bqk,bkd->bqd"}> : () -> ()
    %cst_71 = arith.constant dense<0.000000e+00> : vector<2x8x4xf32>
    %187 = tpu.matmul %185, %186, %cst_71 {dimension_numbers = #tpu.dot_dimension_numbers<[2], [1], [1], [2], [0, 0, 0, 1, 1, 2], [0], [0]>} : vector<2x8x8xbf16>, vector<2x8x4xbf16>, vector<2x8x4xf32> -> vector<2x8x4xf32>
    "tpu.trace_stop"() : () -> ()
    %188 = vector.shape_cast %187 : vector<2x8x4xf32> to vector<16x4xf32>
    %189 = vector.extract_strided_slice %92 {offsets = [12, 0], sizes = [4, 32], strides = [1, 1]} : vector<32x32xf32> to vector<4x32xf32>
    %190 = arith.truncf %188 : vector<16x4xf32> to vector<16x4xbf16>
    %191 = arith.truncf %189 : vector<4x32xf32> to vector<4x32xbf16>
    %cst_72 = arith.constant dense<0.000000e+00> : vector<16x32xf32>
    %192 = tpu.matmul %190, %191, %cst_72 {dimension_numbers = #tpu.dot_dimension_numbers<[1], [0], [0], [1], [0, 0, 1, 1], [], []>} : vector<16x4xbf16>, vector<4x32xbf16>, vector<16x32xf32> -> vector<16x32xf32>
    %193 = arith.addf %168, %192 : vector<16x32xf32>
    %194 = vector.extract_strided_slice %88 {offsets = [0, 0, 16], sizes = [2, 8, 4], strides = [1, 1, 1]} : vector<2x8x32xf32> to vector<2x8x4xf32>
    %195 = vector.extract_strided_slice %89 {offsets = [0, 0, 16], sizes = [2, 8, 4], strides = [1, 1, 1]} : vector<2x8x32xf32> to vector<2x8x4xf32>
    %196 = arith.truncf %194 : vector<2x8x4xf32> to vector<2x8x4xbf16>
    %197 = arith.truncf %195 : vector<2x8x4xf32> to vector<2x8x4xbf16>
    "tpu.trace_start"() <{level = 10 : i32, message = "bqd,bkd->bqk"}> : () -> ()
    %cst_73 = arith.constant dense<0.000000e+00> : vector<2x8x8xf32>
    %198 = tpu.matmul %196, %197, %cst_73 {dimension_numbers = #tpu.dot_dimension_numbers<[2], [2], [1], [1], [0, 0, 0, 1, 1, 1], [0], [0]>} : vector<2x8x4xbf16>, vector<2x8x4xbf16>, vector<2x8x8xf32> -> vector<2x8x8xf32>
    "tpu.trace_stop"() : () -> ()
    %cst_74 = arith.constant dense<0xFF800000> : vector<2x8xf32>
    %199 = vector.multi_reduction <maximumf>, %198, %cst_74 [2] : vector<2x8x8xf32> to vector<2x8xf32>
    %200 = vector.shape_cast %199 : vector<2x8xf32> to vector<2x8x1xf32>
    %201 = vector.broadcast %200 : vector<2x8x1xf32> to vector<2x8x8xf32>
    %202 = arith.subf %198, %201 : vector<2x8x8xf32>
    %203 = math.exp %202 : vector<2x8x8xf32>
    %cst_75 = arith.constant dense<0.000000e+00> : vector<2x8xf32>
    %204 = vector.multi_reduction <add>, %203, %cst_75 [2] : vector<2x8x8xf32> to vector<2x8xf32>
    %205 = vector.shape_cast %204 : vector<2x8xf32> to vector<2x8x1xf32>
    %206 = tpu.reciprocal %205 {approx = true} : vector<2x8x1xf32> -> vector<2x8x1xf32>
    %207 = vector.broadcast %206 : vector<2x8x1xf32> to vector<2x8x8xf32>
    %208 = arith.mulf %203, %207 : vector<2x8x8xf32>
    %209 = vector.extract_strided_slice %90 {offsets = [0, 0, 16], sizes = [2, 8, 4], strides = [1, 1, 1]} : vector<2x8x32xf32> to vector<2x8x4xf32>
    %210 = arith.truncf %208 : vector<2x8x8xf32> to vector<2x8x8xbf16>
    %211 = arith.truncf %209 : vector<2x8x4xf32> to vector<2x8x4xbf16>
    "tpu.trace_start"() <{level = 10 : i32, message = "bqk,bkd->bqd"}> : () -> ()
    %cst_76 = arith.constant dense<0.000000e+00> : vector<2x8x4xf32>
    %212 = tpu.matmul %210, %211, %cst_76 {dimension_numbers = #tpu.dot_dimension_numbers<[2], [1], [1], [2], [0, 0, 0, 1, 1, 2], [0], [0]>} : vector<2x8x8xbf16>, vector<2x8x4xbf16>, vector<2x8x4xf32> -> vector<2x8x4xf32>
    "tpu.trace_stop"() : () -> ()
    %213 = vector.shape_cast %212 : vector<2x8x4xf32> to vector<16x4xf32>
    %214 = vector.extract_strided_slice %92 {offsets = [16, 0], sizes = [4, 32], strides = [1, 1]} : vector<32x32xf32> to vector<4x32xf32>
    %215 = arith.truncf %213 : vector<16x4xf32> to vector<16x4xbf16>
    %216 = arith.truncf %214 : vector<4x32xf32> to vector<4x32xbf16>
    %cst_77 = arith.constant dense<0.000000e+00> : vector<16x32xf32>
    %217 = tpu.matmul %215, %216, %cst_77 {dimension_numbers = #tpu.dot_dimension_numbers<[1], [0], [0], [1], [0, 0, 1, 1], [], []>} : vector<16x4xbf16>, vector<4x32xbf16>, vector<16x32xf32> -> vector<16x32xf32>
    %218 = arith.addf %193, %217 : vector<16x32xf32>
    %219 = vector.extract_strided_slice %88 {offsets = [0, 0, 20], sizes = [2, 8, 4], strides = [1, 1, 1]} : vector<2x8x32xf32> to vector<2x8x4xf32>
    %220 = vector.extract_strided_slice %89 {offsets = [0, 0, 20], sizes = [2, 8, 4], strides = [1, 1, 1]} : vector<2x8x32xf32> to vector<2x8x4xf32>
    %221 = arith.truncf %219 : vector<2x8x4xf32> to vector<2x8x4xbf16>
    %222 = arith.truncf %220 : vector<2x8x4xf32> to vector<2x8x4xbf16>
    "tpu.trace_start"() <{level = 10 : i32, message = "bqd,bkd->bqk"}> : () -> ()
    %cst_78 = arith.constant dense<0.000000e+00> : vector<2x8x8xf32>
    %223 = tpu.matmul %221, %222, %cst_78 {dimension_numbers = #tpu.dot_dimension_numbers<[2], [2], [1], [1], [0, 0, 0, 1, 1, 1], [0], [0]>} : vector<2x8x4xbf16>, vector<2x8x4xbf16>, vector<2x8x8xf32> -> vector<2x8x8xf32>
    "tpu.trace_stop"() : () -> ()
    %cst_79 = arith.constant dense<0xFF800000> : vector<2x8xf32>
    %224 = vector.multi_reduction <maximumf>, %223, %cst_79 [2] : vector<2x8x8xf32> to vector<2x8xf32>
    %225 = vector.shape_cast %224 : vector<2x8xf32> to vector<2x8x1xf32>
    %226 = vector.broadcast %225 : vector<2x8x1xf32> to vector<2x8x8xf32>
    %227 = arith.subf %223, %226 : vector<2x8x8xf32>
    %228 = math.exp %227 : vector<2x8x8xf32>
    %cst_80 = arith.constant dense<0.000000e+00> : vector<2x8xf32>
    %229 = vector.multi_reduction <add>, %228, %cst_80 [2] : vector<2x8x8xf32> to vector<2x8xf32>
    %230 = vector.shape_cast %229 : vector<2x8xf32> to vector<2x8x1xf32>
    %231 = tpu.reciprocal %230 {approx = true} : vector<2x8x1xf32> -> vector<2x8x1xf32>
    %232 = vector.broadcast %231 : vector<2x8x1xf32> to vector<2x8x8xf32>
    %233 = arith.mulf %228, %232 : vector<2x8x8xf32>
    %234 = vector.extract_strided_slice %90 {offsets = [0, 0, 20], sizes = [2, 8, 4], strides = [1, 1, 1]} : vector<2x8x32xf32> to vector<2x8x4xf32>
    %235 = arith.truncf %233 : vector<2x8x8xf32> to vector<2x8x8xbf16>
    %236 = arith.truncf %234 : vector<2x8x4xf32> to vector<2x8x4xbf16>
    "tpu.trace_start"() <{level = 10 : i32, message = "bqk,bkd->bqd"}> : () -> ()
    %cst_81 = arith.constant dense<0.000000e+00> : vector<2x8x4xf32>
    %237 = tpu.matmul %235, %236, %cst_81 {dimension_numbers = #tpu.dot_dimension_numbers<[2], [1], [1], [2], [0, 0, 0, 1, 1, 2], [0], [0]>} : vector<2x8x8xbf16>, vector<2x8x4xbf16>, vector<2x8x4xf32> -> vector<2x8x4xf32>
    "tpu.trace_stop"() : () -> ()
    %238 = vector.shape_cast %237 : vector<2x8x4xf32> to vector<16x4xf32>
    %239 = vector.extract_strided_slice %92 {offsets = [20, 0], sizes = [4, 32], strides = [1, 1]} : vector<32x32xf32> to vector<4x32xf32>
    %240 = arith.truncf %238 : vector<16x4xf32> to vector<16x4xbf16>
    %241 = arith.truncf %239 : vector<4x32xf32> to vector<4x32xbf16>
    %cst_82 = arith.constant dense<0.000000e+00> : vector<16x32xf32>
    %242 = tpu.matmul %240, %241, %cst_82 {dimension_numbers = #tpu.dot_dimension_numbers<[1], [0], [0], [1], [0, 0, 1, 1], [], []>} : vector<16x4xbf16>, vector<4x32xbf16>, vector<16x32xf32> -> vector<16x32xf32>
    %243 = arith.addf %218, %242 : vector<16x32xf32>
    %244 = vector.extract_strided_slice %88 {offsets = [0, 0, 24], sizes = [2, 8, 4], strides = [1, 1, 1]} : vector<2x8x32xf32> to vector<2x8x4xf32>
    %245 = vector.extract_strided_slice %89 {offsets = [0, 0, 24], sizes = [2, 8, 4], strides = [1, 1, 1]} : vector<2x8x32xf32> to vector<2x8x4xf32>
    %246 = arith.truncf %244 : vector<2x8x4xf32> to vector<2x8x4xbf16>
    %247 = arith.truncf %245 : vector<2x8x4xf32> to vector<2x8x4xbf16>
    "tpu.trace_start"() <{level = 10 : i32, message = "bqd,bkd->bqk"}> : () -> ()
    %cst_83 = arith.constant dense<0.000000e+00> : vector<2x8x8xf32>
    %248 = tpu.matmul %246, %247, %cst_83 {dimension_numbers = #tpu.dot_dimension_numbers<[2], [2], [1], [1], [0, 0, 0, 1, 1, 1], [0], [0]>} : vector<2x8x4xbf16>, vector<2x8x4xbf16>, vector<2x8x8xf32> -> vector<2x8x8xf32>
    "tpu.trace_stop"() : () -> ()
    %cst_84 = arith.constant dense<0xFF800000> : vector<2x8xf32>
    %249 = vector.multi_reduction <maximumf>, %248, %cst_84 [2] : vector<2x8x8xf32> to vector<2x8xf32>
    %250 = vector.shape_cast %249 : vector<2x8xf32> to vector<2x8x1xf32>
    %251 = vector.broadcast %250 : vector<2x8x1xf32> to vector<2x8x8xf32>
    %252 = arith.subf %248, %251 : vector<2x8x8xf32>
    %253 = math.exp %252 : vector<2x8x8xf32>
    %cst_85 = arith.constant dense<0.000000e+00> : vector<2x8xf32>
    %254 = vector.multi_reduction <add>, %253, %cst_85 [2] : vector<2x8x8xf32> to vector<2x8xf32>
    %255 = vector.shape_cast %254 : vector<2x8xf32> to vector<2x8x1xf32>
    %256 = tpu.reciprocal %255 {approx = true} : vector<2x8x1xf32> -> vector<2x8x1xf32>
    %257 = vector.broadcast %256 : vector<2x8x1xf32> to vector<2x8x8xf32>
    %258 = arith.mulf %253, %257 : vector<2x8x8xf32>
    %259 = vector.extract_strided_slice %90 {offsets = [0, 0, 24], sizes = [2, 8, 4], strides = [1, 1, 1]} : vector<2x8x32xf32> to vector<2x8x4xf32>
    %260 = arith.truncf %258 : vector<2x8x8xf32> to vector<2x8x8xbf16>
    %261 = arith.truncf %259 : vector<2x8x4xf32> to vector<2x8x4xbf16>
    "tpu.trace_start"() <{level = 10 : i32, message = "bqk,bkd->bqd"}> : () -> ()
    %cst_86 = arith.constant dense<0.000000e+00> : vector<2x8x4xf32>
    %262 = tpu.matmul %260, %261, %cst_86 {dimension_numbers = #tpu.dot_dimension_numbers<[2], [1], [1], [2], [0, 0, 0, 1, 1, 2], [0], [0]>} : vector<2x8x8xbf16>, vector<2x8x4xbf16>, vector<2x8x4xf32> -> vector<2x8x4xf32>
    "tpu.trace_stop"() : () -> ()
    %263 = vector.shape_cast %262 : vector<2x8x4xf32> to vector<16x4xf32>
    %264 = vector.extract_strided_slice %92 {offsets = [24, 0], sizes = [4, 32], strides = [1, 1]} : vector<32x32xf32> to vector<4x32xf32>
    %265 = arith.truncf %263 : vector<16x4xf32> to vector<16x4xbf16>
    %266 = arith.truncf %264 : vector<4x32xf32> to vector<4x32xbf16>
    %cst_87 = arith.constant dense<0.000000e+00> : vector<16x32xf32>
    %267 = tpu.matmul %265, %266, %cst_87 {dimension_numbers = #tpu.dot_dimension_numbers<[1], [0], [0], [1], [0, 0, 1, 1], [], []>} : vector<16x4xbf16>, vector<4x32xbf16>, vector<16x32xf32> -> vector<16x32xf32>
    %268 = arith.addf %243, %267 : vector<16x32xf32>
    %269 = vector.extract_strided_slice %88 {offsets = [0, 0, 28], sizes = [2, 8, 4], strides = [1, 1, 1]} : vector<2x8x32xf32> to vector<2x8x4xf32>
    %270 = vector.extract_strided_slice %89 {offsets = [0, 0, 28], sizes = [2, 8, 4], strides = [1, 1, 1]} : vector<2x8x32xf32> to vector<2x8x4xf32>
    %271 = arith.truncf %269 : vector<2x8x4xf32> to vector<2x8x4xbf16>
    %272 = arith.truncf %270 : vector<2x8x4xf32> to vector<2x8x4xbf16>
    "tpu.trace_start"() <{level = 10 : i32, message = "bqd,bkd->bqk"}> : () -> ()
    %cst_88 = arith.constant dense<0.000000e+00> : vector<2x8x8xf32>
    %273 = tpu.matmul %271, %272, %cst_88 {dimension_numbers = #tpu.dot_dimension_numbers<[2], [2], [1], [1], [0, 0, 0, 1, 1, 1], [0], [0]>} : vector<2x8x4xbf16>, vector<2x8x4xbf16>, vector<2x8x8xf32> -> vector<2x8x8xf32>
    "tpu.trace_stop"() : () -> ()
    %cst_89 = arith.constant dense<0xFF800000> : vector<2x8xf32>
    %274 = vector.multi_reduction <maximumf>, %273, %cst_89 [2] : vector<2x8x8xf32> to vector<2x8xf32>
    %275 = vector.shape_cast %274 : vector<2x8xf32> to vector<2x8x1xf32>
    %276 = vector.broadcast %275 : vector<2x8x1xf32> to vector<2x8x8xf32>
    %277 = arith.subf %273, %276 : vector<2x8x8xf32>
    %278 = math.exp %277 : vector<2x8x8xf32>
    %cst_90 = arith.constant dense<0.000000e+00> : vector<2x8xf32>
    %279 = vector.multi_reduction <add>, %278, %cst_90 [2] : vector<2x8x8xf32> to vector<2x8xf32>
    %280 = vector.shape_cast %279 : vector<2x8xf32> to vector<2x8x1xf32>
    %281 = tpu.reciprocal %280 {approx = true} : vector<2x8x1xf32> -> vector<2x8x1xf32>
    %282 = vector.broadcast %281 : vector<2x8x1xf32> to vector<2x8x8xf32>
    %283 = arith.mulf %278, %282 : vector<2x8x8xf32>
    %284 = vector.extract_strided_slice %90 {offsets = [0, 0, 28], sizes = [2, 8, 4], strides = [1, 1, 1]} : vector<2x8x32xf32> to vector<2x8x4xf32>
    %285 = arith.truncf %283 : vector<2x8x8xf32> to vector<2x8x8xbf16>
    %286 = arith.truncf %284 : vector<2x8x4xf32> to vector<2x8x4xbf16>
    "tpu.trace_start"() <{level = 10 : i32, message = "bqk,bkd->bqd"}> : () -> ()
    %cst_91 = arith.constant dense<0.000000e+00> : vector<2x8x4xf32>
    %287 = tpu.matmul %285, %286, %cst_91 {dimension_numbers = #tpu.dot_dimension_numbers<[2], [1], [1], [2], [0, 0, 0, 1, 1, 2], [0], [0]>} : vector<2x8x8xbf16>, vector<2x8x4xbf16>, vector<2x8x4xf32> -> vector<2x8x4xf32>
    "tpu.trace_stop"() : () -> ()
    %288 = vector.shape_cast %287 : vector<2x8x4xf32> to vector<16x4xf32>
    %289 = vector.extract_strided_slice %92 {offsets = [28, 0], sizes = [4, 32], strides = [1, 1]} : vector<32x32xf32> to vector<4x32xf32>
    %290 = arith.truncf %288 : vector<16x4xf32> to vector<16x4xbf16>
    %291 = arith.truncf %289 : vector<4x32xf32> to vector<4x32xbf16>
    %cst_92 = arith.constant dense<0.000000e+00> : vector<16x32xf32>
    %292 = tpu.matmul %290, %291, %cst_92 {dimension_numbers = #tpu.dot_dimension_numbers<[1], [0], [0], [1], [0, 0, 1, 1], [], []>} : vector<16x4xbf16>, vector<4x32xbf16>, vector<16x32xf32> -> vector<16x32xf32>
    %293 = arith.addf %268, %292 : vector<16x32xf32>
    %c0_93 = arith.constant 0 : index
    %c0_94 = arith.constant 0 : index
    %c0_95 = arith.constant 0 : index
    %294 = vector.load %arg15[%c0_93, %c0_94, %c0_95] : memref<2x1x32xf32, #tpu.memory_space<vmem>>, vector<1x1x32xf32>
    %295 = vector.shape_cast %294 : vector<1x1x32xf32> to vector<1x32xf32>
    %296 = vector.broadcast %295 : vector<1x32xf32> to vector<16x32xf32>
    %297 = arith.addf %293, %296 : vector<16x32xf32>
    %298 = arith.addf %63, %297 : vector<16x32xf32>
    %c0_96 = arith.constant 0 : index
    %c0_97 = arith.constant 0 : index
    %c0_98 = arith.constant 0 : index
    %299 = vector.load %arg20[%c0_96, %c0_97, %c0_98] : memref<2x1x32xf32, #tpu.memory_space<vmem>>, vector<1x1x32xf32>
    %300 = vector.shape_cast %299 : vector<1x1x32xf32> to vector<1x32xf32>
    %c0_99 = arith.constant 0 : index
    %c0_100 = arith.constant 0 : index
    %c0_101 = arith.constant 0 : index
    %301 = vector.load %arg21[%c0_99, %c0_100, %c0_101] : memref<2x1x32xf32, #tpu.memory_space<vmem>>, vector<1x1x32xf32>
    %302 = vector.shape_cast %301 : vector<1x1x32xf32> to vector<1x32xf32>
    %cst_102 = arith.constant dense<0.000000e+00> : vector<16xf32>
    %303 = vector.multi_reduction <add>, %298, %cst_102 [1] : vector<16x32xf32> to vector<16xf32>
    %304 = vector.shape_cast %303 : vector<16xf32> to vector<16x1xf32>
    %cst_103 = arith.constant 3.200000e+01 : f32
    %305 = vector.broadcast %cst_103 : f32 to vector<16x1xf32>
    %306 = arith.divf %304, %305 : vector<16x1xf32>
    %307 = vector.broadcast %306 : vector<16x1xf32> to vector<16x32xf32>
    %308 = arith.subf %298, %307 : vector<16x32xf32>
    %309 = arith.mulf %308, %308 : vector<16x32xf32>
    %cst_104 = arith.constant dense<0.000000e+00> : vector<16xf32>
    %310 = vector.multi_reduction <add>, %309, %cst_104 [1] : vector<16x32xf32> to vector<16xf32>
    %311 = vector.shape_cast %310 : vector<16xf32> to vector<16x1xf32>
    %cst_105 = arith.constant 3.200000e+01 : f32
    %312 = vector.broadcast %cst_105 : f32 to vector<16x1xf32>
    %313 = arith.divf %311, %312 : vector<16x1xf32>
    %314 = vector.broadcast %306 : vector<16x1xf32> to vector<16x32xf32>
    %315 = arith.subf %298, %314 : vector<16x32xf32>
    %cst_106 = arith.constant 9.99999974E-6 : f32
    %316 = vector.broadcast %cst_106 : f32 to vector<16x1xf32>
    %317 = arith.addf %313, %316 : vector<16x1xf32>
    %318 = math.rsqrt %317 : vector<16x1xf32>
    %319 = vector.broadcast %318 : vector<16x1xf32> to vector<16x32xf32>
    %320 = arith.mulf %315, %319 : vector<16x32xf32>
    %321 = vector.broadcast %300 : vector<1x32xf32> to vector<16x32xf32>
    %322 = arith.mulf %320, %321 : vector<16x32xf32>
    %323 = vector.broadcast %302 : vector<1x32xf32> to vector<16x32xf32>
    %324 = arith.addf %322, %323 : vector<16x32xf32>
    %c0_107 = arith.constant 0 : index
    %c0_108 = arith.constant 0 : index
    %c0_109 = arith.constant 0 : index
    %325 = vector.load %arg16[%c0_107, %c0_108, %c0_109] : memref<2x32x128xbf16, #tpu.memory_space<vmem>>, vector<1x32x128xbf16>
    %326 = vector.shape_cast %325 : vector<1x32x128xbf16> to vector<32x128xbf16>
    %327 = arith.truncf %324 : vector<16x32xf32> to vector<16x32xbf16>
    %cst_110 = arith.constant dense<0.000000e+00> : vector<16x128xf32>
    %328 = tpu.matmul %327, %326, %cst_110 {dimension_numbers = #tpu.dot_dimension_numbers<[1], [0], [0], [1], [0, 0, 1, 1], [], []>} : vector<16x32xbf16>, vector<32x128xbf16>, vector<16x128xf32> -> vector<16x128xf32>
    %c0_111 = arith.constant 0 : index
    %c0_112 = arith.constant 0 : index
    %c0_113 = arith.constant 0 : index
    %329 = vector.load %arg17[%c0_111, %c0_112, %c0_113] : memref<2x1x128xf32, #tpu.memory_space<vmem>>, vector<1x1x128xf32>
    %330 = vector.shape_cast %329 : vector<1x1x128xf32> to vector<1x128xf32>
    %331 = vector.broadcast %330 : vector<1x128xf32> to vector<16x128xf32>
    %332 = arith.addf %328, %331 : vector<16x128xf32>
    %cst_114 = arith.constant 5.000000e-01 : f32
    %333 = vector.broadcast %cst_114 : f32 to vector<16x128xf32>
    %334 = arith.mulf %333, %332 : vector<16x128xf32>
    %cst_115 = arith.constant 4.471500e-02 : f32
    %335 = vector.broadcast %cst_115 : f32 to vector<16x128xf32>
    %336 = arith.mulf %335, %332 : vector<16x128xf32>
    %337 = arith.mulf %336, %332 : vector<16x128xf32>
    %338 = arith.mulf %337, %332 : vector<16x128xf32>
    %339 = arith.addf %332, %338 : vector<16x128xf32>
    %cst_116 = arith.constant 0.797884583 : f32
    %340 = vector.broadcast %cst_116 : f32 to vector<16x128xf32>
    %341 = arith.mulf %340, %339 : vector<16x128xf32>
    %342 = math.tanh %341 : vector<16x128xf32>
    %cst_117 = arith.constant 1.000000e+00 : f32
    %343 = vector.broadcast %cst_117 : f32 to vector<16x128xf32>
    %344 = arith.addf %343, %342 : vector<16x128xf32>
    %345 = arith.mulf %334, %344 : vector<16x128xf32>
    %c0_118 = arith.constant 0 : index
    %c0_119 = arith.constant 0 : index
    %c0_120 = arith.constant 0 : index
    %346 = vector.load %arg18[%c0_118, %c0_119, %c0_120] : memref<2x128x32xbf16, #tpu.memory_space<vmem>>, vector<1x128x32xbf16>
    %347 = vector.shape_cast %346 : vector<1x128x32xbf16> to vector<128x32xbf16>
    %348 = arith.truncf %345 : vector<16x128xf32> to vector<16x128xbf16>
    %cst_121 = arith.constant dense<0.000000e+00> : vector<16x32xf32>
    %349 = tpu.matmul %348, %347, %cst_121 {dimension_numbers = #tpu.dot_dimension_numbers<[1], [0], [0], [1], [0, 0, 1, 1], [], []>} : vector<16x128xbf16>, vector<128x32xbf16>, vector<16x32xf32> -> vector<16x32xf32>
    %c0_122 = arith.constant 0 : index
    %c0_123 = arith.constant 0 : index
    %c0_124 = arith.constant 0 : index
    %350 = vector.load %arg19[%c0_122, %c0_123, %c0_124] : memref<2x1x32xf32, #tpu.memory_space<vmem>>, vector<1x1x32xf32>
    %351 = vector.shape_cast %350 : vector<1x1x32xf32> to vector<1x32xf32>
    %352 = vector.broadcast %351 : vector<1x32xf32> to vector<16x32xf32>
    %353 = arith.addf %349, %352 : vector<16x32xf32>
    %354 = arith.addf %324, %353 : vector<16x32xf32>
    %c0_125 = arith.constant 0 : index
    %c0_126 = arith.constant 0 : index
    %c0_127 = arith.constant 0 : index
    %355 = vector.load %arg22[%c0_125, %c0_126, %c0_127] : memref<2x1x32xf32, #tpu.memory_space<vmem>>, vector<1x1x32xf32>
    %356 = vector.shape_cast %355 : vector<1x1x32xf32> to vector<1x32xf32>
    %c0_128 = arith.constant 0 : index
    %c0_129 = arith.constant 0 : index
    %c0_130 = arith.constant 0 : index
    %357 = vector.load %arg23[%c0_128, %c0_129, %c0_130] : memref<2x1x32xf32, #tpu.memory_space<vmem>>, vector<1x1x32xf32>
    %358 = vector.shape_cast %357 : vector<1x1x32xf32> to vector<1x32xf32>
    %cst_131 = arith.constant dense<0.000000e+00> : vector<16xf32>
    %359 = vector.multi_reduction <add>, %354, %cst_131 [1] : vector<16x32xf32> to vector<16xf32>
    %360 = vector.shape_cast %359 : vector<16xf32> to vector<16x1xf32>
    %cst_132 = arith.constant 3.200000e+01 : f32
    %361 = vector.broadcast %cst_132 : f32 to vector<16x1xf32>
    %362 = arith.divf %360, %361 : vector<16x1xf32>
    %363 = vector.broadcast %362 : vector<16x1xf32> to vector<16x32xf32>
    %364 = arith.subf %354, %363 : vector<16x32xf32>
    %365 = arith.mulf %364, %364 : vector<16x32xf32>
    %cst_133 = arith.constant dense<0.000000e+00> : vector<16xf32>
    %366 = vector.multi_reduction <add>, %365, %cst_133 [1] : vector<16x32xf32> to vector<16xf32>
    %367 = vector.shape_cast %366 : vector<16xf32> to vector<16x1xf32>
    %cst_134 = arith.constant 3.200000e+01 : f32
    %368 = vector.broadcast %cst_134 : f32 to vector<16x1xf32>
    %369 = arith.divf %367, %368 : vector<16x1xf32>
    %370 = vector.broadcast %362 : vector<16x1xf32> to vector<16x32xf32>
    %371 = arith.subf %354, %370 : vector<16x32xf32>
    %cst_135 = arith.constant 9.99999974E-6 : f32
    %372 = vector.broadcast %cst_135 : f32 to vector<16x1xf32>
    %373 = arith.addf %369, %372 : vector<16x1xf32>
    %374 = math.rsqrt %373 : vector<16x1xf32>
    %375 = vector.broadcast %374 : vector<16x1xf32> to vector<16x32xf32>
    %376 = arith.mulf %371, %375 : vector<16x32xf32>
    %377 = vector.broadcast %356 : vector<1x32xf32> to vector<16x32xf32>
    %378 = arith.mulf %376, %377 : vector<16x32xf32>
    %379 = vector.broadcast %358 : vector<1x32xf32> to vector<16x32xf32>
    %380 = arith.addf %378, %379 : vector<16x32xf32>
    %c1 = arith.constant 1 : index
    %c0_136 = arith.constant 0 : index
    %c0_137 = arith.constant 0 : index
    %381 = vector.load %arg8[%c1, %c0_136, %c0_137] : memref<2x32x32xbf16, #tpu.memory_space<vmem>>, vector<1x32x32xbf16>
    %382 = vector.shape_cast %381 : vector<1x32x32xbf16> to vector<32x32xbf16>
    %383 = arith.truncf %380 : vector<16x32xf32> to vector<16x32xbf16>
    %cst_138 = arith.constant dense<0.000000e+00> : vector<16x32xf32>
    %384 = tpu.matmul %383, %382, %cst_138 {dimension_numbers = #tpu.dot_dimension_numbers<[1], [0], [0], [1], [0, 0, 1, 1], [], []>} : vector<16x32xbf16>, vector<32x32xbf16>, vector<16x32xf32> -> vector<16x32xf32>
    %c1_139 = arith.constant 1 : index
    %c0_140 = arith.constant 0 : index
    %c0_141 = arith.constant 0 : index
    %385 = vector.load %arg9[%c1_139, %c0_140, %c0_141] : memref<2x1x32xf32, #tpu.memory_space<vmem>>, vector<1x1x32xf32>
    %386 = vector.shape_cast %385 : vector<1x1x32xf32> to vector<1x32xf32>
    %387 = vector.broadcast %386 : vector<1x32xf32> to vector<16x32xf32>
    %388 = arith.addf %384, %387 : vector<16x32xf32>
    %c1_142 = arith.constant 1 : index
    %c0_143 = arith.constant 0 : index
    %c0_144 = arith.constant 0 : index
    %389 = vector.load %arg10[%c1_142, %c0_143, %c0_144] : memref<2x32x32xbf16, #tpu.memory_space<vmem>>, vector<1x32x32xbf16>
    %390 = vector.shape_cast %389 : vector<1x32x32xbf16> to vector<32x32xbf16>
    %391 = arith.truncf %380 : vector<16x32xf32> to vector<16x32xbf16>
    %cst_145 = arith.constant dense<0.000000e+00> : vector<16x32xf32>
    %392 = tpu.matmul %391, %390, %cst_145 {dimension_numbers = #tpu.dot_dimension_numbers<[1], [0], [0], [1], [0, 0, 1, 1], [], []>} : vector<16x32xbf16>, vector<32x32xbf16>, vector<16x32xf32> -> vector<16x32xf32>
    %c1_146 = arith.constant 1 : index
    %c0_147 = arith.constant 0 : index
    %c0_148 = arith.constant 0 : index
    %393 = vector.load %arg11[%c1_146, %c0_147, %c0_148] : memref<2x1x32xf32, #tpu.memory_space<vmem>>, vector<1x1x32xf32>
    %394 = vector.shape_cast %393 : vector<1x1x32xf32> to vector<1x32xf32>
    %395 = vector.broadcast %394 : vector<1x32xf32> to vector<16x32xf32>
    %396 = arith.addf %392, %395 : vector<16x32xf32>
    %c1_149 = arith.constant 1 : index
    %c0_150 = arith.constant 0 : index
    %c0_151 = arith.constant 0 : index
    %397 = vector.load %arg12[%c1_149, %c0_150, %c0_151] : memref<2x32x32xbf16, #tpu.memory_space<vmem>>, vector<1x32x32xbf16>
    %398 = vector.shape_cast %397 : vector<1x32x32xbf16> to vector<32x32xbf16>
    %399 = arith.truncf %380 : vector<16x32xf32> to vector<16x32xbf16>
    %cst_152 = arith.constant dense<0.000000e+00> : vector<16x32xf32>
    %400 = tpu.matmul %399, %398, %cst_152 {dimension_numbers = #tpu.dot_dimension_numbers<[1], [0], [0], [1], [0, 0, 1, 1], [], []>} : vector<16x32xbf16>, vector<32x32xbf16>, vector<16x32xf32> -> vector<16x32xf32>
    %c1_153 = arith.constant 1 : index
    %c0_154 = arith.constant 0 : index
    %c0_155 = arith.constant 0 : index
    %401 = vector.load %arg13[%c1_153, %c0_154, %c0_155] : memref<2x1x32xf32, #tpu.memory_space<vmem>>, vector<1x1x32xf32>
    %402 = vector.shape_cast %401 : vector<1x1x32xf32> to vector<1x32xf32>
    %403 = vector.broadcast %402 : vector<1x32xf32> to vector<16x32xf32>
    %404 = arith.addf %400, %403 : vector<16x32xf32>
    %405 = vector.shape_cast %388 : vector<16x32xf32> to vector<2x8x32xf32>
    %406 = vector.shape_cast %396 : vector<16x32xf32> to vector<2x8x32xf32>
    %407 = vector.shape_cast %404 : vector<16x32xf32> to vector<2x8x32xf32>
    %c1_156 = arith.constant 1 : index
    %c0_157 = arith.constant 0 : index
    %c0_158 = arith.constant 0 : index
    %408 = vector.load %arg14[%c1_156, %c0_157, %c0_158] : memref<2x32x32xf32, #tpu.memory_space<vmem>>, vector<1x32x32xf32>
    %409 = vector.shape_cast %408 : vector<1x32x32xf32> to vector<32x32xf32>
    %cst_159 = arith.constant 0.000000e+00 : f32
    %410 = vector.broadcast %cst_159 : f32 to vector<16x32xf32>
    %411 = vector.extract_strided_slice %405 {offsets = [0, 0, 0], sizes = [2, 8, 4], strides = [1, 1, 1]} : vector<2x8x32xf32> to vector<2x8x4xf32>
    %412 = vector.extract_strided_slice %406 {offsets = [0, 0, 0], sizes = [2, 8, 4], strides = [1, 1, 1]} : vector<2x8x32xf32> to vector<2x8x4xf32>
    %413 = arith.truncf %411 : vector<2x8x4xf32> to vector<2x8x4xbf16>
    %414 = arith.truncf %412 : vector<2x8x4xf32> to vector<2x8x4xbf16>
    "tpu.trace_start"() <{level = 10 : i32, message = "bqd,bkd->bqk"}> : () -> ()
    %cst_160 = arith.constant dense<0.000000e+00> : vector<2x8x8xf32>
    %415 = tpu.matmul %413, %414, %cst_160 {dimension_numbers = #tpu.dot_dimension_numbers<[2], [2], [1], [1], [0, 0, 0, 1, 1, 1], [0], [0]>} : vector<2x8x4xbf16>, vector<2x8x4xbf16>, vector<2x8x8xf32> -> vector<2x8x8xf32>
    "tpu.trace_stop"() : () -> ()
    %cst_161 = arith.constant dense<0xFF800000> : vector<2x8xf32>
    %416 = vector.multi_reduction <maximumf>, %415, %cst_161 [2] : vector<2x8x8xf32> to vector<2x8xf32>
    %417 = vector.shape_cast %416 : vector<2x8xf32> to vector<2x8x1xf32>
    %418 = vector.broadcast %417 : vector<2x8x1xf32> to vector<2x8x8xf32>
    %419 = arith.subf %415, %418 : vector<2x8x8xf32>
    %420 = math.exp %419 : vector<2x8x8xf32>
    %cst_162 = arith.constant dense<0.000000e+00> : vector<2x8xf32>
    %421 = vector.multi_reduction <add>, %420, %cst_162 [2] : vector<2x8x8xf32> to vector<2x8xf32>
    %422 = vector.shape_cast %421 : vector<2x8xf32> to vector<2x8x1xf32>
    %423 = tpu.reciprocal %422 {approx = true} : vector<2x8x1xf32> -> vector<2x8x1xf32>
    %424 = vector.broadcast %423 : vector<2x8x1xf32> to vector<2x8x8xf32>
    %425 = arith.mulf %420, %424 : vector<2x8x8xf32>
    %426 = vector.extract_strided_slice %407 {offsets = [0, 0, 0], sizes = [2, 8, 4], strides = [1, 1, 1]} : vector<2x8x32xf32> to vector<2x8x4xf32>
    %427 = arith.truncf %425 : vector<2x8x8xf32> to vector<2x8x8xbf16>
    %428 = arith.truncf %426 : vector<2x8x4xf32> to vector<2x8x4xbf16>
    "tpu.trace_start"() <{level = 10 : i32, message = "bqk,bkd->bqd"}> : () -> ()
    %cst_163 = arith.constant dense<0.000000e+00> : vector<2x8x4xf32>
    %429 = tpu.matmul %427, %428, %cst_163 {dimension_numbers = #tpu.dot_dimension_numbers<[2], [1], [1], [2], [0, 0, 0, 1, 1, 2], [0], [0]>} : vector<2x8x8xbf16>, vector<2x8x4xbf16>, vector<2x8x4xf32> -> vector<2x8x4xf32>
    "tpu.trace_stop"() : () -> ()
    %430 = vector.shape_cast %429 : vector<2x8x4xf32> to vector<16x4xf32>
    %431 = vector.extract_strided_slice %409 {offsets = [0, 0], sizes = [4, 32], strides = [1, 1]} : vector<32x32xf32> to vector<4x32xf32>
    %432 = arith.truncf %430 : vector<16x4xf32> to vector<16x4xbf16>
    %433 = arith.truncf %431 : vector<4x32xf32> to vector<4x32xbf16>
    %cst_164 = arith.constant dense<0.000000e+00> : vector<16x32xf32>
    %434 = tpu.matmul %432, %433, %cst_164 {dimension_numbers = #tpu.dot_dimension_numbers<[1], [0], [0], [1], [0, 0, 1, 1], [], []>} : vector<16x4xbf16>, vector<4x32xbf16>, vector<16x32xf32> -> vector<16x32xf32>
    %435 = arith.addf %410, %434 : vector<16x32xf32>
    %436 = vector.extract_strided_slice %405 {offsets = [0, 0, 4], sizes = [2, 8, 4], strides = [1, 1, 1]} : vector<2x8x32xf32> to vector<2x8x4xf32>
    %437 = vector.extract_strided_slice %406 {offsets = [0, 0, 4], sizes = [2, 8, 4], strides = [1, 1, 1]} : vector<2x8x32xf32> to vector<2x8x4xf32>
    %438 = arith.truncf %436 : vector<2x8x4xf32> to vector<2x8x4xbf16>
    %439 = arith.truncf %437 : vector<2x8x4xf32> to vector<2x8x4xbf16>
    "tpu.trace_start"() <{level = 10 : i32, message = "bqd,bkd->bqk"}> : () -> ()
    %cst_165 = arith.constant dense<0.000000e+00> : vector<2x8x8xf32>
    %440 = tpu.matmul %438, %439, %cst_165 {dimension_numbers = #tpu.dot_dimension_numbers<[2], [2], [1], [1], [0, 0, 0, 1, 1, 1], [0], [0]>} : vector<2x8x4xbf16>, vector<2x8x4xbf16>, vector<2x8x8xf32> -> vector<2x8x8xf32>
    "tpu.trace_stop"() : () -> ()
    %cst_166 = arith.constant dense<0xFF800000> : vector<2x8xf32>
    %441 = vector.multi_reduction <maximumf>, %440, %cst_166 [2] : vector<2x8x8xf32> to vector<2x8xf32>
    %442 = vector.shape_cast %441 : vector<2x8xf32> to vector<2x8x1xf32>
    %443 = vector.broadcast %442 : vector<2x8x1xf32> to vector<2x8x8xf32>
    %444 = arith.subf %440, %443 : vector<2x8x8xf32>
    %445 = math.exp %444 : vector<2x8x8xf32>
    %cst_167 = arith.constant dense<0.000000e+00> : vector<2x8xf32>
    %446 = vector.multi_reduction <add>, %445, %cst_167 [2] : vector<2x8x8xf32> to vector<2x8xf32>
    %447 = vector.shape_cast %446 : vector<2x8xf32> to vector<2x8x1xf32>
    %448 = tpu.reciprocal %447 {approx = true} : vector<2x8x1xf32> -> vector<2x8x1xf32>
    %449 = vector.broadcast %448 : vector<2x8x1xf32> to vector<2x8x8xf32>
    %450 = arith.mulf %445, %449 : vector<2x8x8xf32>
    %451 = vector.extract_strided_slice %407 {offsets = [0, 0, 4], sizes = [2, 8, 4], strides = [1, 1, 1]} : vector<2x8x32xf32> to vector<2x8x4xf32>
    %452 = arith.truncf %450 : vector<2x8x8xf32> to vector<2x8x8xbf16>
    %453 = arith.truncf %451 : vector<2x8x4xf32> to vector<2x8x4xbf16>
    "tpu.trace_start"() <{level = 10 : i32, message = "bqk,bkd->bqd"}> : () -> ()
    %cst_168 = arith.constant dense<0.000000e+00> : vector<2x8x4xf32>
    %454 = tpu.matmul %452, %453, %cst_168 {dimension_numbers = #tpu.dot_dimension_numbers<[2], [1], [1], [2], [0, 0, 0, 1, 1, 2], [0], [0]>} : vector<2x8x8xbf16>, vector<2x8x4xbf16>, vector<2x8x4xf32> -> vector<2x8x4xf32>
    "tpu.trace_stop"() : () -> ()
    %455 = vector.shape_cast %454 : vector<2x8x4xf32> to vector<16x4xf32>
    %456 = vector.extract_strided_slice %409 {offsets = [4, 0], sizes = [4, 32], strides = [1, 1]} : vector<32x32xf32> to vector<4x32xf32>
    %457 = arith.truncf %455 : vector<16x4xf32> to vector<16x4xbf16>
    %458 = arith.truncf %456 : vector<4x32xf32> to vector<4x32xbf16>
    %cst_169 = arith.constant dense<0.000000e+00> : vector<16x32xf32>
    %459 = tpu.matmul %457, %458, %cst_169 {dimension_numbers = #tpu.dot_dimension_numbers<[1], [0], [0], [1], [0, 0, 1, 1], [], []>} : vector<16x4xbf16>, vector<4x32xbf16>, vector<16x32xf32> -> vector<16x32xf32>
    %460 = arith.addf %435, %459 : vector<16x32xf32>
    %461 = vector.extract_strided_slice %405 {offsets = [0, 0, 8], sizes = [2, 8, 4], strides = [1, 1, 1]} : vector<2x8x32xf32> to vector<2x8x4xf32>
    %462 = vector.extract_strided_slice %406 {offsets = [0, 0, 8], sizes = [2, 8, 4], strides = [1, 1, 1]} : vector<2x8x32xf32> to vector<2x8x4xf32>
    %463 = arith.truncf %461 : vector<2x8x4xf32> to vector<2x8x4xbf16>
    %464 = arith.truncf %462 : vector<2x8x4xf32> to vector<2x8x4xbf16>
    "tpu.trace_start"() <{level = 10 : i32, message = "bqd,bkd->bqk"}> : () -> ()
    %cst_170 = arith.constant dense<0.000000e+00> : vector<2x8x8xf32>
    %465 = tpu.matmul %463, %464, %cst_170 {dimension_numbers = #tpu.dot_dimension_numbers<[2], [2], [1], [1], [0, 0, 0, 1, 1, 1], [0], [0]>} : vector<2x8x4xbf16>, vector<2x8x4xbf16>, vector<2x8x8xf32> -> vector<2x8x8xf32>
    "tpu.trace_stop"() : () -> ()
    %cst_171 = arith.constant dense<0xFF800000> : vector<2x8xf32>
    %466 = vector.multi_reduction <maximumf>, %465, %cst_171 [2] : vector<2x8x8xf32> to vector<2x8xf32>
    %467 = vector.shape_cast %466 : vector<2x8xf32> to vector<2x8x1xf32>
    %468 = vector.broadcast %467 : vector<2x8x1xf32> to vector<2x8x8xf32>
    %469 = arith.subf %465, %468 : vector<2x8x8xf32>
    %470 = math.exp %469 : vector<2x8x8xf32>
    %cst_172 = arith.constant dense<0.000000e+00> : vector<2x8xf32>
    %471 = vector.multi_reduction <add>, %470, %cst_172 [2] : vector<2x8x8xf32> to vector<2x8xf32>
    %472 = vector.shape_cast %471 : vector<2x8xf32> to vector<2x8x1xf32>
    %473 = tpu.reciprocal %472 {approx = true} : vector<2x8x1xf32> -> vector<2x8x1xf32>
    %474 = vector.broadcast %473 : vector<2x8x1xf32> to vector<2x8x8xf32>
    %475 = arith.mulf %470, %474 : vector<2x8x8xf32>
    %476 = vector.extract_strided_slice %407 {offsets = [0, 0, 8], sizes = [2, 8, 4], strides = [1, 1, 1]} : vector<2x8x32xf32> to vector<2x8x4xf32>
    %477 = arith.truncf %475 : vector<2x8x8xf32> to vector<2x8x8xbf16>
    %478 = arith.truncf %476 : vector<2x8x4xf32> to vector<2x8x4xbf16>
    "tpu.trace_start"() <{level = 10 : i32, message = "bqk,bkd->bqd"}> : () -> ()
    %cst_173 = arith.constant dense<0.000000e+00> : vector<2x8x4xf32>
    %479 = tpu.matmul %477, %478, %cst_173 {dimension_numbers = #tpu.dot_dimension_numbers<[2], [1], [1], [2], [0, 0, 0, 1, 1, 2], [0], [0]>} : vector<2x8x8xbf16>, vector<2x8x4xbf16>, vector<2x8x4xf32> -> vector<2x8x4xf32>
    "tpu.trace_stop"() : () -> ()
    %480 = vector.shape_cast %479 : vector<2x8x4xf32> to vector<16x4xf32>
    %481 = vector.extract_strided_slice %409 {offsets = [8, 0], sizes = [4, 32], strides = [1, 1]} : vector<32x32xf32> to vector<4x32xf32>
    %482 = arith.truncf %480 : vector<16x4xf32> to vector<16x4xbf16>
    %483 = arith.truncf %481 : vector<4x32xf32> to vector<4x32xbf16>
    %cst_174 = arith.constant dense<0.000000e+00> : vector<16x32xf32>
    %484 = tpu.matmul %482, %483, %cst_174 {dimension_numbers = #tpu.dot_dimension_numbers<[1], [0], [0], [1], [0, 0, 1, 1], [], []>} : vector<16x4xbf16>, vector<4x32xbf16>, vector<16x32xf32> -> vector<16x32xf32>
    %485 = arith.addf %460, %484 : vector<16x32xf32>
    %486 = vector.extract_strided_slice %405 {offsets = [0, 0, 12], sizes = [2, 8, 4], strides = [1, 1, 1]} : vector<2x8x32xf32> to vector<2x8x4xf32>
    %487 = vector.extract_strided_slice %406 {offsets = [0, 0, 12], sizes = [2, 8, 4], strides = [1, 1, 1]} : vector<2x8x32xf32> to vector<2x8x4xf32>
    %488 = arith.truncf %486 : vector<2x8x4xf32> to vector<2x8x4xbf16>
    %489 = arith.truncf %487 : vector<2x8x4xf32> to vector<2x8x4xbf16>
    "tpu.trace_start"() <{level = 10 : i32, message = "bqd,bkd->bqk"}> : () -> ()
    %cst_175 = arith.constant dense<0.000000e+00> : vector<2x8x8xf32>
    %490 = tpu.matmul %488, %489, %cst_175 {dimension_numbers = #tpu.dot_dimension_numbers<[2], [2], [1], [1], [0, 0, 0, 1, 1, 1], [0], [0]>} : vector<2x8x4xbf16>, vector<2x8x4xbf16>, vector<2x8x8xf32> -> vector<2x8x8xf32>
    "tpu.trace_stop"() : () -> ()
    %cst_176 = arith.constant dense<0xFF800000> : vector<2x8xf32>
    %491 = vector.multi_reduction <maximumf>, %490, %cst_176 [2] : vector<2x8x8xf32> to vector<2x8xf32>
    %492 = vector.shape_cast %491 : vector<2x8xf32> to vector<2x8x1xf32>
    %493 = vector.broadcast %492 : vector<2x8x1xf32> to vector<2x8x8xf32>
    %494 = arith.subf %490, %493 : vector<2x8x8xf32>
    %495 = math.exp %494 : vector<2x8x8xf32>
    %cst_177 = arith.constant dense<0.000000e+00> : vector<2x8xf32>
    %496 = vector.multi_reduction <add>, %495, %cst_177 [2] : vector<2x8x8xf32> to vector<2x8xf32>
    %497 = vector.shape_cast %496 : vector<2x8xf32> to vector<2x8x1xf32>
    %498 = tpu.reciprocal %497 {approx = true} : vector<2x8x1xf32> -> vector<2x8x1xf32>
    %499 = vector.broadcast %498 : vector<2x8x1xf32> to vector<2x8x8xf32>
    %500 = arith.mulf %495, %499 : vector<2x8x8xf32>
    %501 = vector.extract_strided_slice %407 {offsets = [0, 0, 12], sizes = [2, 8, 4], strides = [1, 1, 1]} : vector<2x8x32xf32> to vector<2x8x4xf32>
    %502 = arith.truncf %500 : vector<2x8x8xf32> to vector<2x8x8xbf16>
    %503 = arith.truncf %501 : vector<2x8x4xf32> to vector<2x8x4xbf16>
    "tpu.trace_start"() <{level = 10 : i32, message = "bqk,bkd->bqd"}> : () -> ()
    %cst_178 = arith.constant dense<0.000000e+00> : vector<2x8x4xf32>
    %504 = tpu.matmul %502, %503, %cst_178 {dimension_numbers = #tpu.dot_dimension_numbers<[2], [1], [1], [2], [0, 0, 0, 1, 1, 2], [0], [0]>} : vector<2x8x8xbf16>, vector<2x8x4xbf16>, vector<2x8x4xf32> -> vector<2x8x4xf32>
    "tpu.trace_stop"() : () -> ()
    %505 = vector.shape_cast %504 : vector<2x8x4xf32> to vector<16x4xf32>
    %506 = vector.extract_strided_slice %409 {offsets = [12, 0], sizes = [4, 32], strides = [1, 1]} : vector<32x32xf32> to vector<4x32xf32>
    %507 = arith.truncf %505 : vector<16x4xf32> to vector<16x4xbf16>
    %508 = arith.truncf %506 : vector<4x32xf32> to vector<4x32xbf16>
    %cst_179 = arith.constant dense<0.000000e+00> : vector<16x32xf32>
    %509 = tpu.matmul %507, %508, %cst_179 {dimension_numbers = #tpu.dot_dimension_numbers<[1], [0], [0], [1], [0, 0, 1, 1], [], []>} : vector<16x4xbf16>, vector<4x32xbf16>, vector<16x32xf32> -> vector<16x32xf32>
    %510 = arith.addf %485, %509 : vector<16x32xf32>
    %511 = vector.extract_strided_slice %405 {offsets = [0, 0, 16], sizes = [2, 8, 4], strides = [1, 1, 1]} : vector<2x8x32xf32> to vector<2x8x4xf32>
    %512 = vector.extract_strided_slice %406 {offsets = [0, 0, 16], sizes = [2, 8, 4], strides = [1, 1, 1]} : vector<2x8x32xf32> to vector<2x8x4xf32>
    %513 = arith.truncf %511 : vector<2x8x4xf32> to vector<2x8x4xbf16>
    %514 = arith.truncf %512 : vector<2x8x4xf32> to vector<2x8x4xbf16>
    "tpu.trace_start"() <{level = 10 : i32, message = "bqd,bkd->bqk"}> : () -> ()
    %cst_180 = arith.constant dense<0.000000e+00> : vector<2x8x8xf32>
    %515 = tpu.matmul %513, %514, %cst_180 {dimension_numbers = #tpu.dot_dimension_numbers<[2], [2], [1], [1], [0, 0, 0, 1, 1, 1], [0], [0]>} : vector<2x8x4xbf16>, vector<2x8x4xbf16>, vector<2x8x8xf32> -> vector<2x8x8xf32>
    "tpu.trace_stop"() : () -> ()
    %cst_181 = arith.constant dense<0xFF800000> : vector<2x8xf32>
    %516 = vector.multi_reduction <maximumf>, %515, %cst_181 [2] : vector<2x8x8xf32> to vector<2x8xf32>
    %517 = vector.shape_cast %516 : vector<2x8xf32> to vector<2x8x1xf32>
    %518 = vector.broadcast %517 : vector<2x8x1xf32> to vector<2x8x8xf32>
    %519 = arith.subf %515, %518 : vector<2x8x8xf32>
    %520 = math.exp %519 : vector<2x8x8xf32>
    %cst_182 = arith.constant dense<0.000000e+00> : vector<2x8xf32>
    %521 = vector.multi_reduction <add>, %520, %cst_182 [2] : vector<2x8x8xf32> to vector<2x8xf32>
    %522 = vector.shape_cast %521 : vector<2x8xf32> to vector<2x8x1xf32>
    %523 = tpu.reciprocal %522 {approx = true} : vector<2x8x1xf32> -> vector<2x8x1xf32>
    %524 = vector.broadcast %523 : vector<2x8x1xf32> to vector<2x8x8xf32>
    %525 = arith.mulf %520, %524 : vector<2x8x8xf32>
    %526 = vector.extract_strided_slice %407 {offsets = [0, 0, 16], sizes = [2, 8, 4], strides = [1, 1, 1]} : vector<2x8x32xf32> to vector<2x8x4xf32>
    %527 = arith.truncf %525 : vector<2x8x8xf32> to vector<2x8x8xbf16>
    %528 = arith.truncf %526 : vector<2x8x4xf32> to vector<2x8x4xbf16>
    "tpu.trace_start"() <{level = 10 : i32, message = "bqk,bkd->bqd"}> : () -> ()
    %cst_183 = arith.constant dense<0.000000e+00> : vector<2x8x4xf32>
    %529 = tpu.matmul %527, %528, %cst_183 {dimension_numbers = #tpu.dot_dimension_numbers<[2], [1], [1], [2], [0, 0, 0, 1, 1, 2], [0], [0]>} : vector<2x8x8xbf16>, vector<2x8x4xbf16>, vector<2x8x4xf32> -> vector<2x8x4xf32>
    "tpu.trace_stop"() : () -> ()
    %530 = vector.shape_cast %529 : vector<2x8x4xf32> to vector<16x4xf32>
    %531 = vector.extract_strided_slice %409 {offsets = [16, 0], sizes = [4, 32], strides = [1, 1]} : vector<32x32xf32> to vector<4x32xf32>
    %532 = arith.truncf %530 : vector<16x4xf32> to vector<16x4xbf16>
    %533 = arith.truncf %531 : vector<4x32xf32> to vector<4x32xbf16>
    %cst_184 = arith.constant dense<0.000000e+00> : vector<16x32xf32>
    %534 = tpu.matmul %532, %533, %cst_184 {dimension_numbers = #tpu.dot_dimension_numbers<[1], [0], [0], [1], [0, 0, 1, 1], [], []>} : vector<16x4xbf16>, vector<4x32xbf16>, vector<16x32xf32> -> vector<16x32xf32>
    %535 = arith.addf %510, %534 : vector<16x32xf32>
    %536 = vector.extract_strided_slice %405 {offsets = [0, 0, 20], sizes = [2, 8, 4], strides = [1, 1, 1]} : vector<2x8x32xf32> to vector<2x8x4xf32>
    %537 = vector.extract_strided_slice %406 {offsets = [0, 0, 20], sizes = [2, 8, 4], strides = [1, 1, 1]} : vector<2x8x32xf32> to vector<2x8x4xf32>
    %538 = arith.truncf %536 : vector<2x8x4xf32> to vector<2x8x4xbf16>
    %539 = arith.truncf %537 : vector<2x8x4xf32> to vector<2x8x4xbf16>
    "tpu.trace_start"() <{level = 10 : i32, message = "bqd,bkd->bqk"}> : () -> ()
    %cst_185 = arith.constant dense<0.000000e+00> : vector<2x8x8xf32>
    %540 = tpu.matmul %538, %539, %cst_185 {dimension_numbers = #tpu.dot_dimension_numbers<[2], [2], [1], [1], [0, 0, 0, 1, 1, 1], [0], [0]>} : vector<2x8x4xbf16>, vector<2x8x4xbf16>, vector<2x8x8xf32> -> vector<2x8x8xf32>
    "tpu.trace_stop"() : () -> ()
    %cst_186 = arith.constant dense<0xFF800000> : vector<2x8xf32>
    %541 = vector.multi_reduction <maximumf>, %540, %cst_186 [2] : vector<2x8x8xf32> to vector<2x8xf32>
    %542 = vector.shape_cast %541 : vector<2x8xf32> to vector<2x8x1xf32>
    %543 = vector.broadcast %542 : vector<2x8x1xf32> to vector<2x8x8xf32>
    %544 = arith.subf %540, %543 : vector<2x8x8xf32>
    %545 = math.exp %544 : vector<2x8x8xf32>
    %cst_187 = arith.constant dense<0.000000e+00> : vector<2x8xf32>
    %546 = vector.multi_reduction <add>, %545, %cst_187 [2] : vector<2x8x8xf32> to vector<2x8xf32>
    %547 = vector.shape_cast %546 : vector<2x8xf32> to vector<2x8x1xf32>
    %548 = tpu.reciprocal %547 {approx = true} : vector<2x8x1xf32> -> vector<2x8x1xf32>
    %549 = vector.broadcast %548 : vector<2x8x1xf32> to vector<2x8x8xf32>
    %550 = arith.mulf %545, %549 : vector<2x8x8xf32>
    %551 = vector.extract_strided_slice %407 {offsets = [0, 0, 20], sizes = [2, 8, 4], strides = [1, 1, 1]} : vector<2x8x32xf32> to vector<2x8x4xf32>
    %552 = arith.truncf %550 : vector<2x8x8xf32> to vector<2x8x8xbf16>
    %553 = arith.truncf %551 : vector<2x8x4xf32> to vector<2x8x4xbf16>
    "tpu.trace_start"() <{level = 10 : i32, message = "bqk,bkd->bqd"}> : () -> ()
    %cst_188 = arith.constant dense<0.000000e+00> : vector<2x8x4xf32>
    %554 = tpu.matmul %552, %553, %cst_188 {dimension_numbers = #tpu.dot_dimension_numbers<[2], [1], [1], [2], [0, 0, 0, 1, 1, 2], [0], [0]>} : vector<2x8x8xbf16>, vector<2x8x4xbf16>, vector<2x8x4xf32> -> vector<2x8x4xf32>
    "tpu.trace_stop"() : () -> ()
    %555 = vector.shape_cast %554 : vector<2x8x4xf32> to vector<16x4xf32>
    %556 = vector.extract_strided_slice %409 {offsets = [20, 0], sizes = [4, 32], strides = [1, 1]} : vector<32x32xf32> to vector<4x32xf32>
    %557 = arith.truncf %555 : vector<16x4xf32> to vector<16x4xbf16>
    %558 = arith.truncf %556 : vector<4x32xf32> to vector<4x32xbf16>
    %cst_189 = arith.constant dense<0.000000e+00> : vector<16x32xf32>
    %559 = tpu.matmul %557, %558, %cst_189 {dimension_numbers = #tpu.dot_dimension_numbers<[1], [0], [0], [1], [0, 0, 1, 1], [], []>} : vector<16x4xbf16>, vector<4x32xbf16>, vector<16x32xf32> -> vector<16x32xf32>
    %560 = arith.addf %535, %559 : vector<16x32xf32>
    %561 = vector.extract_strided_slice %405 {offsets = [0, 0, 24], sizes = [2, 8, 4], strides = [1, 1, 1]} : vector<2x8x32xf32> to vector<2x8x4xf32>
    %562 = vector.extract_strided_slice %406 {offsets = [0, 0, 24], sizes = [2, 8, 4], strides = [1, 1, 1]} : vector<2x8x32xf32> to vector<2x8x4xf32>
    %563 = arith.truncf %561 : vector<2x8x4xf32> to vector<2x8x4xbf16>
    %564 = arith.truncf %562 : vector<2x8x4xf32> to vector<2x8x4xbf16>
    "tpu.trace_start"() <{level = 10 : i32, message = "bqd,bkd->bqk"}> : () -> ()
    %cst_190 = arith.constant dense<0.000000e+00> : vector<2x8x8xf32>
    %565 = tpu.matmul %563, %564, %cst_190 {dimension_numbers = #tpu.dot_dimension_numbers<[2], [2], [1], [1], [0, 0, 0, 1, 1, 1], [0], [0]>} : vector<2x8x4xbf16>, vector<2x8x4xbf16>, vector<2x8x8xf32> -> vector<2x8x8xf32>
    "tpu.trace_stop"() : () -> ()
    %cst_191 = arith.constant dense<0xFF800000> : vector<2x8xf32>
    %566 = vector.multi_reduction <maximumf>, %565, %cst_191 [2] : vector<2x8x8xf32> to vector<2x8xf32>
    %567 = vector.shape_cast %566 : vector<2x8xf32> to vector<2x8x1xf32>
    %568 = vector.broadcast %567 : vector<2x8x1xf32> to vector<2x8x8xf32>
    %569 = arith.subf %565, %568 : vector<2x8x8xf32>
    %570 = math.exp %569 : vector<2x8x8xf32>
    %cst_192 = arith.constant dense<0.000000e+00> : vector<2x8xf32>
    %571 = vector.multi_reduction <add>, %570, %cst_192 [2] : vector<2x8x8xf32> to vector<2x8xf32>
    %572 = vector.shape_cast %571 : vector<2x8xf32> to vector<2x8x1xf32>
    %573 = tpu.reciprocal %572 {approx = true} : vector<2x8x1xf32> -> vector<2x8x1xf32>
    %574 = vector.broadcast %573 : vector<2x8x1xf32> to vector<2x8x8xf32>
    %575 = arith.mulf %570, %574 : vector<2x8x8xf32>
    %576 = vector.extract_strided_slice %407 {offsets = [0, 0, 24], sizes = [2, 8, 4], strides = [1, 1, 1]} : vector<2x8x32xf32> to vector<2x8x4xf32>
    %577 = arith.truncf %575 : vector<2x8x8xf32> to vector<2x8x8xbf16>
    %578 = arith.truncf %576 : vector<2x8x4xf32> to vector<2x8x4xbf16>
    "tpu.trace_start"() <{level = 10 : i32, message = "bqk,bkd->bqd"}> : () -> ()
    %cst_193 = arith.constant dense<0.000000e+00> : vector<2x8x4xf32>
    %579 = tpu.matmul %577, %578, %cst_193 {dimension_numbers = #tpu.dot_dimension_numbers<[2], [1], [1], [2], [0, 0, 0, 1, 1, 2], [0], [0]>} : vector<2x8x8xbf16>, vector<2x8x4xbf16>, vector<2x8x4xf32> -> vector<2x8x4xf32>
    "tpu.trace_stop"() : () -> ()
    %580 = vector.shape_cast %579 : vector<2x8x4xf32> to vector<16x4xf32>
    %581 = vector.extract_strided_slice %409 {offsets = [24, 0], sizes = [4, 32], strides = [1, 1]} : vector<32x32xf32> to vector<4x32xf32>
    %582 = arith.truncf %580 : vector<16x4xf32> to vector<16x4xbf16>
    %583 = arith.truncf %581 : vector<4x32xf32> to vector<4x32xbf16>
    %cst_194 = arith.constant dense<0.000000e+00> : vector<16x32xf32>
    %584 = tpu.matmul %582, %583, %cst_194 {dimension_numbers = #tpu.dot_dimension_numbers<[1], [0], [0], [1], [0, 0, 1, 1], [], []>} : vector<16x4xbf16>, vector<4x32xbf16>, vector<16x32xf32> -> vector<16x32xf32>
    %585 = arith.addf %560, %584 : vector<16x32xf32>
    %586 = vector.extract_strided_slice %405 {offsets = [0, 0, 28], sizes = [2, 8, 4], strides = [1, 1, 1]} : vector<2x8x32xf32> to vector<2x8x4xf32>
    %587 = vector.extract_strided_slice %406 {offsets = [0, 0, 28], sizes = [2, 8, 4], strides = [1, 1, 1]} : vector<2x8x32xf32> to vector<2x8x4xf32>
    %588 = arith.truncf %586 : vector<2x8x4xf32> to vector<2x8x4xbf16>
    %589 = arith.truncf %587 : vector<2x8x4xf32> to vector<2x8x4xbf16>
    "tpu.trace_start"() <{level = 10 : i32, message = "bqd,bkd->bqk"}> : () -> ()
    %cst_195 = arith.constant dense<0.000000e+00> : vector<2x8x8xf32>
    %590 = tpu.matmul %588, %589, %cst_195 {dimension_numbers = #tpu.dot_dimension_numbers<[2], [2], [1], [1], [0, 0, 0, 1, 1, 1], [0], [0]>} : vector<2x8x4xbf16>, vector<2x8x4xbf16>, vector<2x8x8xf32> -> vector<2x8x8xf32>
    "tpu.trace_stop"() : () -> ()
    %cst_196 = arith.constant dense<0xFF800000> : vector<2x8xf32>
    %591 = vector.multi_reduction <maximumf>, %590, %cst_196 [2] : vector<2x8x8xf32> to vector<2x8xf32>
    %592 = vector.shape_cast %591 : vector<2x8xf32> to vector<2x8x1xf32>
    %593 = vector.broadcast %592 : vector<2x8x1xf32> to vector<2x8x8xf32>
    %594 = arith.subf %590, %593 : vector<2x8x8xf32>
    %595 = math.exp %594 : vector<2x8x8xf32>
    %cst_197 = arith.constant dense<0.000000e+00> : vector<2x8xf32>
    %596 = vector.multi_reduction <add>, %595, %cst_197 [2] : vector<2x8x8xf32> to vector<2x8xf32>
    %597 = vector.shape_cast %596 : vector<2x8xf32> to vector<2x8x1xf32>
    %598 = tpu.reciprocal %597 {approx = true} : vector<2x8x1xf32> -> vector<2x8x1xf32>
    %599 = vector.broadcast %598 : vector<2x8x1xf32> to vector<2x8x8xf32>
    %600 = arith.mulf %595, %599 : vector<2x8x8xf32>
    %601 = vector.extract_strided_slice %407 {offsets = [0, 0, 28], sizes = [2, 8, 4], strides = [1, 1, 1]} : vector<2x8x32xf32> to vector<2x8x4xf32>
    %602 = arith.truncf %600 : vector<2x8x8xf32> to vector<2x8x8xbf16>
    %603 = arith.truncf %601 : vector<2x8x4xf32> to vector<2x8x4xbf16>
    "tpu.trace_start"() <{level = 10 : i32, message = "bqk,bkd->bqd"}> : () -> ()
    %cst_198 = arith.constant dense<0.000000e+00> : vector<2x8x4xf32>
    %604 = tpu.matmul %602, %603, %cst_198 {dimension_numbers = #tpu.dot_dimension_numbers<[2], [1], [1], [2], [0, 0, 0, 1, 1, 2], [0], [0]>} : vector<2x8x8xbf16>, vector<2x8x4xbf16>, vector<2x8x4xf32> -> vector<2x8x4xf32>
    "tpu.trace_stop"() : () -> ()
    %605 = vector.shape_cast %604 : vector<2x8x4xf32> to vector<16x4xf32>
    %606 = vector.extract_strided_slice %409 {offsets = [28, 0], sizes = [4, 32], strides = [1, 1]} : vector<32x32xf32> to vector<4x32xf32>
    %607 = arith.truncf %605 : vector<16x4xf32> to vector<16x4xbf16>
    %608 = arith.truncf %606 : vector<4x32xf32> to vector<4x32xbf16>
    %cst_199 = arith.constant dense<0.000000e+00> : vector<16x32xf32>
    %609 = tpu.matmul %607, %608, %cst_199 {dimension_numbers = #tpu.dot_dimension_numbers<[1], [0], [0], [1], [0, 0, 1, 1], [], []>} : vector<16x4xbf16>, vector<4x32xbf16>, vector<16x32xf32> -> vector<16x32xf32>
    %610 = arith.addf %585, %609 : vector<16x32xf32>
    %c1_200 = arith.constant 1 : index
    %c0_201 = arith.constant 0 : index
    %c0_202 = arith.constant 0 : index
    %611 = vector.load %arg15[%c1_200, %c0_201, %c0_202] : memref<2x1x32xf32, #tpu.memory_space<vmem>>, vector<1x1x32xf32>
    %612 = vector.shape_cast %611 : vector<1x1x32xf32> to vector<1x32xf32>
    %613 = vector.broadcast %612 : vector<1x32xf32> to vector<16x32xf32>
    %614 = arith.addf %610, %613 : vector<16x32xf32>
    %615 = arith.addf %380, %614 : vector<16x32xf32>
    %c1_203 = arith.constant 1 : index
    %c0_204 = arith.constant 0 : index
    %c0_205 = arith.constant 0 : index
    %616 = vector.load %arg20[%c1_203, %c0_204, %c0_205] : memref<2x1x32xf32, #tpu.memory_space<vmem>>, vector<1x1x32xf32>
    %617 = vector.shape_cast %616 : vector<1x1x32xf32> to vector<1x32xf32>
    %c1_206 = arith.constant 1 : index
    %c0_207 = arith.constant 0 : index
    %c0_208 = arith.constant 0 : index
    %618 = vector.load %arg21[%c1_206, %c0_207, %c0_208] : memref<2x1x32xf32, #tpu.memory_space<vmem>>, vector<1x1x32xf32>
    %619 = vector.shape_cast %618 : vector<1x1x32xf32> to vector<1x32xf32>
    %cst_209 = arith.constant dense<0.000000e+00> : vector<16xf32>
    %620 = vector.multi_reduction <add>, %615, %cst_209 [1] : vector<16x32xf32> to vector<16xf32>
    %621 = vector.shape_cast %620 : vector<16xf32> to vector<16x1xf32>
    %cst_210 = arith.constant 3.200000e+01 : f32
    %622 = vector.broadcast %cst_210 : f32 to vector<16x1xf32>
    %623 = arith.divf %621, %622 : vector<16x1xf32>
    %624 = vector.broadcast %623 : vector<16x1xf32> to vector<16x32xf32>
    %625 = arith.subf %615, %624 : vector<16x32xf32>
    %626 = arith.mulf %625, %625 : vector<16x32xf32>
    %cst_211 = arith.constant dense<0.000000e+00> : vector<16xf32>
    %627 = vector.multi_reduction <add>, %626, %cst_211 [1] : vector<16x32xf32> to vector<16xf32>
    %628 = vector.shape_cast %627 : vector<16xf32> to vector<16x1xf32>
    %cst_212 = arith.constant 3.200000e+01 : f32
    %629 = vector.broadcast %cst_212 : f32 to vector<16x1xf32>
    %630 = arith.divf %628, %629 : vector<16x1xf32>
    %631 = vector.broadcast %623 : vector<16x1xf32> to vector<16x32xf32>
    %632 = arith.subf %615, %631 : vector<16x32xf32>
    %cst_213 = arith.constant 9.99999974E-6 : f32
    %633 = vector.broadcast %cst_213 : f32 to vector<16x1xf32>
    %634 = arith.addf %630, %633 : vector<16x1xf32>
    %635 = math.rsqrt %634 : vector<16x1xf32>
    %636 = vector.broadcast %635 : vector<16x1xf32> to vector<16x32xf32>
    %637 = arith.mulf %632, %636 : vector<16x32xf32>
    %638 = vector.broadcast %617 : vector<1x32xf32> to vector<16x32xf32>
    %639 = arith.mulf %637, %638 : vector<16x32xf32>
    %640 = vector.broadcast %619 : vector<1x32xf32> to vector<16x32xf32>
    %641 = arith.addf %639, %640 : vector<16x32xf32>
    %c1_214 = arith.constant 1 : index
    %c0_215 = arith.constant 0 : index
    %c0_216 = arith.constant 0 : index
    %642 = vector.load %arg16[%c1_214, %c0_215, %c0_216] : memref<2x32x128xbf16, #tpu.memory_space<vmem>>, vector<1x32x128xbf16>
    %643 = vector.shape_cast %642 : vector<1x32x128xbf16> to vector<32x128xbf16>
    %644 = arith.truncf %641 : vector<16x32xf32> to vector<16x32xbf16>
    %cst_217 = arith.constant dense<0.000000e+00> : vector<16x128xf32>
    %645 = tpu.matmul %644, %643, %cst_217 {dimension_numbers = #tpu.dot_dimension_numbers<[1], [0], [0], [1], [0, 0, 1, 1], [], []>} : vector<16x32xbf16>, vector<32x128xbf16>, vector<16x128xf32> -> vector<16x128xf32>
    %c1_218 = arith.constant 1 : index
    %c0_219 = arith.constant 0 : index
    %c0_220 = arith.constant 0 : index
    %646 = vector.load %arg17[%c1_218, %c0_219, %c0_220] : memref<2x1x128xf32, #tpu.memory_space<vmem>>, vector<1x1x128xf32>
    %647 = vector.shape_cast %646 : vector<1x1x128xf32> to vector<1x128xf32>
    %648 = vector.broadcast %647 : vector<1x128xf32> to vector<16x128xf32>
    %649 = arith.addf %645, %648 : vector<16x128xf32>
    %cst_221 = arith.constant 5.000000e-01 : f32
    %650 = vector.broadcast %cst_221 : f32 to vector<16x128xf32>
    %651 = arith.mulf %650, %649 : vector<16x128xf32>
    %cst_222 = arith.constant 4.471500e-02 : f32
    %652 = vector.broadcast %cst_222 : f32 to vector<16x128xf32>
    %653 = arith.mulf %652, %649 : vector<16x128xf32>
    %654 = arith.mulf %653, %649 : vector<16x128xf32>
    %655 = arith.mulf %654, %649 : vector<16x128xf32>
    %656 = arith.addf %649, %655 : vector<16x128xf32>
    %cst_223 = arith.constant 0.797884583 : f32
    %657 = vector.broadcast %cst_223 : f32 to vector<16x128xf32>
    %658 = arith.mulf %657, %656 : vector<16x128xf32>
    %659 = math.tanh %658 : vector<16x128xf32>
    %cst_224 = arith.constant 1.000000e+00 : f32
    %660 = vector.broadcast %cst_224 : f32 to vector<16x128xf32>
    %661 = arith.addf %660, %659 : vector<16x128xf32>
    %662 = arith.mulf %651, %661 : vector<16x128xf32>
    %c1_225 = arith.constant 1 : index
    %c0_226 = arith.constant 0 : index
    %c0_227 = arith.constant 0 : index
    %663 = vector.load %arg18[%c1_225, %c0_226, %c0_227] : memref<2x128x32xbf16, #tpu.memory_space<vmem>>, vector<1x128x32xbf16>
    %664 = vector.shape_cast %663 : vector<1x128x32xbf16> to vector<128x32xbf16>
    %665 = arith.truncf %662 : vector<16x128xf32> to vector<16x128xbf16>
    %cst_228 = arith.constant dense<0.000000e+00> : vector<16x32xf32>
    %666 = tpu.matmul %665, %664, %cst_228 {dimension_numbers = #tpu.dot_dimension_numbers<[1], [0], [0], [1], [0, 0, 1, 1], [], []>} : vector<16x128xbf16>, vector<128x32xbf16>, vector<16x32xf32> -> vector<16x32xf32>
    %c1_229 = arith.constant 1 : index
    %c0_230 = arith.constant 0 : index
    %c0_231 = arith.constant 0 : index
    %667 = vector.load %arg19[%c1_229, %c0_230, %c0_231] : memref<2x1x32xf32, #tpu.memory_space<vmem>>, vector<1x1x32xf32>
    %668 = vector.shape_cast %667 : vector<1x1x32xf32> to vector<1x32xf32>
    %669 = vector.broadcast %668 : vector<1x32xf32> to vector<16x32xf32>
    %670 = arith.addf %666, %669 : vector<16x32xf32>
    %671 = arith.addf %641, %670 : vector<16x32xf32>
    %c1_232 = arith.constant 1 : index
    %c0_233 = arith.constant 0 : index
    %c0_234 = arith.constant 0 : index
    %672 = vector.load %arg22[%c1_232, %c0_233, %c0_234] : memref<2x1x32xf32, #tpu.memory_space<vmem>>, vector<1x1x32xf32>
    %673 = vector.shape_cast %672 : vector<1x1x32xf32> to vector<1x32xf32>
    %c1_235 = arith.constant 1 : index
    %c0_236 = arith.constant 0 : index
    %c0_237 = arith.constant 0 : index
    %674 = vector.load %arg23[%c1_235, %c0_236, %c0_237] : memref<2x1x32xf32, #tpu.memory_space<vmem>>, vector<1x1x32xf32>
    %675 = vector.shape_cast %674 : vector<1x1x32xf32> to vector<1x32xf32>
    %cst_238 = arith.constant dense<0.000000e+00> : vector<16xf32>
    %676 = vector.multi_reduction <add>, %671, %cst_238 [1] : vector<16x32xf32> to vector<16xf32>
    %677 = vector.shape_cast %676 : vector<16xf32> to vector<16x1xf32>
    %cst_239 = arith.constant 3.200000e+01 : f32
    %678 = vector.broadcast %cst_239 : f32 to vector<16x1xf32>
    %679 = arith.divf %677, %678 : vector<16x1xf32>
    %680 = vector.broadcast %679 : vector<16x1xf32> to vector<16x32xf32>
    %681 = arith.subf %671, %680 : vector<16x32xf32>
    %682 = arith.mulf %681, %681 : vector<16x32xf32>
    %cst_240 = arith.constant dense<0.000000e+00> : vector<16xf32>
    %683 = vector.multi_reduction <add>, %682, %cst_240 [1] : vector<16x32xf32> to vector<16xf32>
    %684 = vector.shape_cast %683 : vector<16xf32> to vector<16x1xf32>
    %cst_241 = arith.constant 3.200000e+01 : f32
    %685 = vector.broadcast %cst_241 : f32 to vector<16x1xf32>
    %686 = arith.divf %684, %685 : vector<16x1xf32>
    %687 = vector.broadcast %679 : vector<16x1xf32> to vector<16x32xf32>
    %688 = arith.subf %671, %687 : vector<16x32xf32>
    %cst_242 = arith.constant 9.99999974E-6 : f32
    %689 = vector.broadcast %cst_242 : f32 to vector<16x1xf32>
    %690 = arith.addf %686, %689 : vector<16x1xf32>
    %691 = math.rsqrt %690 : vector<16x1xf32>
    %692 = vector.broadcast %691 : vector<16x1xf32> to vector<16x32xf32>
    %693 = arith.mulf %688, %692 : vector<16x32xf32>
    %694 = vector.broadcast %673 : vector<1x32xf32> to vector<16x32xf32>
    %695 = arith.mulf %693, %694 : vector<16x32xf32>
    %696 = vector.broadcast %675 : vector<1x32xf32> to vector<16x32xf32>
    %697 = arith.addf %695, %696 : vector<16x32xf32>
    %c0_243 = arith.constant 0 : index
    %c0_244 = arith.constant 0 : index
    %698 = vector.load %arg24[%c0_243, %c0_244] : memref<32x7xbf16, #tpu.memory_space<vmem>>, vector<32x7xbf16>
    %699 = arith.truncf %697 : vector<16x32xf32> to vector<16x32xbf16>
    %cst_245 = arith.constant dense<0.000000e+00> : vector<16x7xf32>
    %700 = tpu.matmul %699, %698, %cst_245 {dimension_numbers = #tpu.dot_dimension_numbers<[1], [0], [0], [1], [0, 0, 1, 1], [], []>} : vector<16x32xbf16>, vector<32x7xbf16>, vector<16x7xf32> -> vector<16x7xf32>
    %c0_246 = arith.constant 0 : index
    %c0_247 = arith.constant 0 : index
    %701 = vector.load %arg25[%c0_246, %c0_247] : memref<1x7xf32, #tpu.memory_space<vmem>>, vector<1x7xf32>
    %702 = vector.broadcast %701 : vector<1x7xf32> to vector<16x7xf32>
    %703 = arith.addf %700, %702 : vector<16x7xf32>
    %cst_248 = arith.constant dense<0xFF800000> : vector<16xf32>
    %704 = vector.multi_reduction <maximumf>, %703, %cst_248 [1] : vector<16x7xf32> to vector<16xf32>
    %705 = vector.shape_cast %704 : vector<16xf32> to vector<16x1xf32>
    %706 = vector.broadcast %705 : vector<16x1xf32> to vector<16x7xf32>
    %707 = arith.subf %703, %706 : vector<16x7xf32>
    %708 = math.exp %707 : vector<16x7xf32>
    %cst_249 = arith.constant dense<0.000000e+00> : vector<16xf32>
    %709 = vector.multi_reduction <add>, %708, %cst_249 [1] : vector<16x7xf32> to vector<16xf32>
    %710 = vector.shape_cast %709 : vector<16xf32> to vector<16x1xf32>
    %711 = tpu.reciprocal %710 {approx = true} : vector<16x1xf32> -> vector<16x1xf32>
    %712 = vector.broadcast %711 : vector<16x1xf32> to vector<16x7xf32>
    %713 = arith.mulf %708, %712 : vector<16x7xf32>
    %714 = vector.shape_cast %697 : vector<16x32xf32> to vector<2x8x32xf32>
    %715 = arith.truncf %714 : vector<2x8x32xf32> to vector<2x8x32xbf16>
    %716 = arith.truncf %714 : vector<2x8x32xf32> to vector<2x8x32xbf16>
    "tpu.trace_start"() <{level = 10 : i32, message = "bqh,bkh->bqk"}> : () -> ()
    %cst_250 = arith.constant dense<0.000000e+00> : vector<2x8x8xf32>
    %717 = tpu.matmul %715, %716, %cst_250 {dimension_numbers = #tpu.dot_dimension_numbers<[2], [2], [1], [1], [0, 0, 0, 1, 1, 1], [0], [0]>} : vector<2x8x32xbf16>, vector<2x8x32xbf16>, vector<2x8x8xf32> -> vector<2x8x8xf32>
    "tpu.trace_stop"() : () -> ()
    %cst_251 = arith.constant 0.176776692 : f32
    %718 = vector.broadcast %cst_251 : f32 to vector<2x8x8xf32>
    %719 = arith.mulf %717, %718 : vector<2x8x8xf32>
    %cst_252 = arith.constant dense<0xFF800000> : vector<2x8xf32>
    %720 = vector.multi_reduction <maximumf>, %719, %cst_252 [2] : vector<2x8x8xf32> to vector<2x8xf32>
    %721 = vector.shape_cast %720 : vector<2x8xf32> to vector<2x8x1xf32>
    %722 = vector.broadcast %721 : vector<2x8x1xf32> to vector<2x8x8xf32>
    %723 = arith.subf %719, %722 : vector<2x8x8xf32>
    %724 = math.exp %723 : vector<2x8x8xf32>
    %cst_253 = arith.constant dense<0.000000e+00> : vector<2x8xf32>
    %725 = vector.multi_reduction <add>, %724, %cst_253 [2] : vector<2x8x8xf32> to vector<2x8xf32>
    %726 = vector.shape_cast %725 : vector<2x8xf32> to vector<2x8x1xf32>
    %727 = tpu.reciprocal %726 {approx = true} : vector<2x8x1xf32> -> vector<2x8x1xf32>
    %728 = vector.broadcast %727 : vector<2x8x1xf32> to vector<2x8x8xf32>
    %729 = arith.mulf %724, %728 : vector<2x8x8xf32>
    %730 = arith.truncf %729 : vector<2x8x8xf32> to vector<2x8x8xbf16>
    %731 = arith.truncf %714 : vector<2x8x32xf32> to vector<2x8x32xbf16>
    "tpu.trace_start"() <{level = 10 : i32, message = "bqk,bkh->bqh"}> : () -> ()
    %cst_254 = arith.constant dense<0.000000e+00> : vector<2x8x32xf32>
    %732 = tpu.matmul %730, %731, %cst_254 {dimension_numbers = #tpu.dot_dimension_numbers<[2], [1], [1], [2], [0, 0, 0, 1, 1, 2], [0], [0]>} : vector<2x8x8xbf16>, vector<2x8x32xbf16>, vector<2x8x32xf32> -> vector<2x8x32xf32>
    "tpu.trace_stop"() : () -> ()
    %733 = vector.shape_cast %732 : vector<2x8x32xf32> to vector<16x32xf32>
    %c0_255 = arith.constant 0 : index
    %c0_256 = arith.constant 0 : index
    %734 = vector.load %arg26[%c0_255, %c0_256] : memref<32x224xbf16, #tpu.memory_space<vmem>>, vector<32x224xbf16>
    %735 = arith.truncf %697 : vector<16x32xf32> to vector<16x32xbf16>
    %cst_257 = arith.constant dense<0.000000e+00> : vector<16x224xf32>
    %736 = tpu.matmul %735, %734, %cst_257 {dimension_numbers = #tpu.dot_dimension_numbers<[1], [0], [0], [1], [0, 0, 1, 1], [], []>} : vector<16x32xbf16>, vector<32x224xbf16>, vector<16x224xf32> -> vector<16x224xf32>
    %c0_258 = arith.constant 0 : index
    %c0_259 = arith.constant 0 : index
    %737 = vector.load %arg27[%c0_258, %c0_259] : memref<32x224xbf16, #tpu.memory_space<vmem>>, vector<32x224xbf16>
    %738 = arith.truncf %733 : vector<16x32xf32> to vector<16x32xbf16>
    %cst_260 = arith.constant dense<0.000000e+00> : vector<16x224xf32>
    %739 = tpu.matmul %738, %737, %cst_260 {dimension_numbers = #tpu.dot_dimension_numbers<[1], [0], [0], [1], [0, 0, 1, 1], [], []>} : vector<16x32xbf16>, vector<32x224xbf16>, vector<16x224xf32> -> vector<16x224xf32>
    %740 = arith.addf %736, %739 : vector<16x224xf32>
    %c0_261 = arith.constant 0 : index
    %c0_262 = arith.constant 0 : index
    %741 = vector.load %arg28[%c0_261, %c0_262] : memref<1x224xf32, #tpu.memory_space<vmem>>, vector<1x224xf32>
    %742 = vector.broadcast %741 : vector<1x224xf32> to vector<16x224xf32>
    %743 = arith.addf %740, %742 : vector<16x224xf32>
    %cst_263 = arith.constant 0.000000e+00 : f32
    %744 = vector.broadcast %cst_263 : f32 to vector<16x32xf32>
    %745 = vector.extract_strided_slice %743 {offsets = [0, 0], sizes = [16, 32], strides = [1, 1]} : vector<16x224xf32> to vector<16x32xf32>
    %746 = vector.extract_strided_slice %713 {offsets = [0, 0], sizes = [16, 1], strides = [1, 1]} : vector<16x7xf32> to vector<16x1xf32>
    %747 = vector.broadcast %746 : vector<16x1xf32> to vector<16x32xf32>
    %748 = arith.mulf %745, %747 : vector<16x32xf32>
    %749 = arith.addf %744, %748 : vector<16x32xf32>
    %750 = vector.extract_strided_slice %743 {offsets = [0, 32], sizes = [16, 32], strides = [1, 1]} : vector<16x224xf32> to vector<16x32xf32>
    %751 = vector.extract_strided_slice %713 {offsets = [0, 1], sizes = [16, 1], strides = [1, 1]} : vector<16x7xf32> to vector<16x1xf32>
    %752 = vector.broadcast %751 : vector<16x1xf32> to vector<16x32xf32>
    %753 = arith.mulf %750, %752 : vector<16x32xf32>
    %754 = arith.addf %749, %753 : vector<16x32xf32>
    %755 = vector.extract_strided_slice %743 {offsets = [0, 64], sizes = [16, 32], strides = [1, 1]} : vector<16x224xf32> to vector<16x32xf32>
    %756 = vector.extract_strided_slice %713 {offsets = [0, 2], sizes = [16, 1], strides = [1, 1]} : vector<16x7xf32> to vector<16x1xf32>
    %757 = vector.broadcast %756 : vector<16x1xf32> to vector<16x32xf32>
    %758 = arith.mulf %755, %757 : vector<16x32xf32>
    %759 = arith.addf %754, %758 : vector<16x32xf32>
    %760 = vector.extract_strided_slice %743 {offsets = [0, 96], sizes = [16, 32], strides = [1, 1]} : vector<16x224xf32> to vector<16x32xf32>
    %761 = vector.extract_strided_slice %713 {offsets = [0, 3], sizes = [16, 1], strides = [1, 1]} : vector<16x7xf32> to vector<16x1xf32>
    %762 = vector.broadcast %761 : vector<16x1xf32> to vector<16x32xf32>
    %763 = arith.mulf %760, %762 : vector<16x32xf32>
    %764 = arith.addf %759, %763 : vector<16x32xf32>
    %765 = vector.extract_strided_slice %743 {offsets = [0, 128], sizes = [16, 32], strides = [1, 1]} : vector<16x224xf32> to vector<16x32xf32>
    %766 = vector.extract_strided_slice %713 {offsets = [0, 4], sizes = [16, 1], strides = [1, 1]} : vector<16x7xf32> to vector<16x1xf32>
    %767 = vector.broadcast %766 : vector<16x1xf32> to vector<16x32xf32>
    %768 = arith.mulf %765, %767 : vector<16x32xf32>
    %769 = arith.addf %764, %768 : vector<16x32xf32>
    %770 = vector.extract_strided_slice %743 {offsets = [0, 160], sizes = [16, 32], strides = [1, 1]} : vector<16x224xf32> to vector<16x32xf32>
    %771 = vector.extract_strided_slice %713 {offsets = [0, 5], sizes = [16, 1], strides = [1, 1]} : vector<16x7xf32> to vector<16x1xf32>
    %772 = vector.broadcast %771 : vector<16x1xf32> to vector<16x32xf32>
    %773 = arith.mulf %770, %772 : vector<16x32xf32>
    %774 = arith.addf %769, %773 : vector<16x32xf32>
    %775 = vector.extract_strided_slice %743 {offsets = [0, 192], sizes = [16, 32], strides = [1, 1]} : vector<16x224xf32> to vector<16x32xf32>
    %776 = vector.extract_strided_slice %713 {offsets = [0, 6], sizes = [16, 1], strides = [1, 1]} : vector<16x7xf32> to vector<16x1xf32>
    %777 = vector.broadcast %776 : vector<16x1xf32> to vector<16x32xf32>
    %778 = arith.mulf %775, %777 : vector<16x32xf32>
    %779 = arith.addf %774, %778 : vector<16x32xf32>
    %c0_264 = arith.constant 0 : index
    %c0_265 = arith.constant 0 : index
    %780 = vector.load %arg29[%c0_264, %c0_265] : memref<32x32xbf16, #tpu.memory_space<vmem>>, vector<32x32xbf16>
    %781 = arith.truncf %779 : vector<16x32xf32> to vector<16x32xbf16>
    %cst_266 = arith.constant dense<0.000000e+00> : vector<16x32xf32>
    %782 = tpu.matmul %781, %780, %cst_266 {dimension_numbers = #tpu.dot_dimension_numbers<[1], [0], [0], [1], [0, 0, 1, 1], [], []>} : vector<16x32xbf16>, vector<32x32xbf16>, vector<16x32xf32> -> vector<16x32xf32>
    %c0_267 = arith.constant 0 : index
    %c0_268 = arith.constant 0 : index
    %783 = vector.load %arg30[%c0_267, %c0_268] : memref<1x32xf32, #tpu.memory_space<vmem>>, vector<1x32xf32>
    %784 = vector.broadcast %783 : vector<1x32xf32> to vector<16x32xf32>
    %785 = arith.addf %782, %784 : vector<16x32xf32>
    %cst_269 = arith.constant 5.000000e-01 : f32
    %786 = vector.broadcast %cst_269 : f32 to vector<16x32xf32>
    %787 = arith.mulf %786, %785 : vector<16x32xf32>
    %cst_270 = arith.constant 4.471500e-02 : f32
    %788 = vector.broadcast %cst_270 : f32 to vector<16x32xf32>
    %789 = arith.mulf %788, %785 : vector<16x32xf32>
    %790 = arith.mulf %789, %785 : vector<16x32xf32>
    %791 = arith.mulf %790, %785 : vector<16x32xf32>
    %792 = arith.addf %785, %791 : vector<16x32xf32>
    %cst_271 = arith.constant 0.797884583 : f32
    %793 = vector.broadcast %cst_271 : f32 to vector<16x32xf32>
    %794 = arith.mulf %793, %792 : vector<16x32xf32>
    %795 = math.tanh %794 : vector<16x32xf32>
    %cst_272 = arith.constant 1.000000e+00 : f32
    %796 = vector.broadcast %cst_272 : f32 to vector<16x32xf32>
    %797 = arith.addf %796, %795 : vector<16x32xf32>
    %798 = arith.mulf %787, %797 : vector<16x32xf32>
    %c0_273 = arith.constant 0 : index
    %c0_274 = arith.constant 0 : index
    %799 = vector.load %arg31[%c0_273, %c0_274] : memref<32x32xbf16, #tpu.memory_space<vmem>>, vector<32x32xbf16>
    %800 = arith.truncf %798 : vector<16x32xf32> to vector<16x32xbf16>
    %cst_275 = arith.constant dense<0.000000e+00> : vector<16x32xf32>
    %801 = tpu.matmul %800, %799, %cst_275 {dimension_numbers = #tpu.dot_dimension_numbers<[1], [0], [0], [1], [0, 0, 1, 1], [], []>} : vector<16x32xbf16>, vector<32x32xbf16>, vector<16x32xf32> -> vector<16x32xf32>
    %c0_276 = arith.constant 0 : index
    %c0_277 = arith.constant 0 : index
    %802 = vector.load %arg32[%c0_276, %c0_277] : memref<1x32xf32, #tpu.memory_space<vmem>>, vector<1x32xf32>
    %803 = vector.broadcast %802 : vector<1x32xf32> to vector<16x32xf32>
    %804 = arith.addf %801, %803 : vector<16x32xf32>
    %c0_278 = arith.constant 0 : index
    %c0_279 = arith.constant 0 : index
    %805 = vector.load %arg33[%c0_278, %c0_279] : memref<32x32xbf16, #tpu.memory_space<vmem>>, vector<32x32xbf16>
    %806 = arith.truncf %1 : vector<16x32xf32> to vector<16x32xbf16>
    %cst_280 = arith.constant dense<0.000000e+00> : vector<16x32xf32>
    %807 = tpu.matmul %806, %805, %cst_280 {dimension_numbers = #tpu.dot_dimension_numbers<[1], [0], [0], [1], [0, 0, 1, 1], [], []>} : vector<16x32xbf16>, vector<32x32xbf16>, vector<16x32xf32> -> vector<16x32xf32>
    %c0_281 = arith.constant 0 : index
    %c0_282 = arith.constant 0 : index
    %808 = vector.load %arg34[%c0_281, %c0_282] : memref<32x32xbf16, #tpu.memory_space<vmem>>, vector<32x32xbf16>
    %809 = arith.truncf %804 : vector<16x32xf32> to vector<16x32xbf16>
    %cst_283 = arith.constant dense<0.000000e+00> : vector<16x32xf32>
    %810 = tpu.matmul %809, %808, %cst_283 {dimension_numbers = #tpu.dot_dimension_numbers<[1], [0], [0], [1], [0, 0, 1, 1], [], []>} : vector<16x32xbf16>, vector<32x32xbf16>, vector<16x32xf32> -> vector<16x32xf32>
    %811 = arith.addf %807, %810 : vector<16x32xf32>
    %c0_284 = arith.constant 0 : index
    %c0_285 = arith.constant 0 : index
    %812 = vector.load %arg35[%c0_284, %c0_285] : memref<1x32xf32, #tpu.memory_space<vmem>>, vector<1x32xf32>
    %813 = vector.broadcast %812 : vector<1x32xf32> to vector<16x32xf32>
    %814 = arith.addf %811, %813 : vector<16x32xf32>
    %815 = vector.shape_cast %814 : vector<16x32xf32> to vector<2x8x32xf32>
    %c0_286 = arith.constant 0 : index
    %c0_287 = arith.constant 0 : index
    %c0_288 = arith.constant 0 : index
    %816 = vector.load %arg36[%c0_286, %c0_287, %c0_288] : memref<2x8x32xf32, #tpu.memory_space<vmem>>, vector<2x8x32xf32>
    tpu.vector_store %arg36[%c0_286, %c0_287, %c0_288], %815 {strides = array<i32>} : memref<2x8x32xf32, #tpu.memory_space<vmem>>, vector<2x8x32xf32>,
    return
  }
}

</mosaic_0001>

<bundles_post_ra>
// kernel: tpu_custom_call.1
= control target key start
LH: loop header
LB: loop body
LE: loop exit
PB: predicated region body
PF: predicated region fallthrough
CT: control target
= control target key end

     0   :  { %s5559_s6 = smov 1   ;;  %s5560_s10 = smov 2   ;;  %s6658_s0 = inlined_call_operand.smem [shape: u32[37], index: -1, kind: input, shape index: {}] }
   0x1   :  { %s5646_s5 = sld [smem:[%s6658_s0]]   ;;  %s5561_s14 = smov 3  }
   0x2   :  { %s5651_s9 = sld [smem:[%s6658_s0 + %s5559_s6]]   ;;  %s5562_s18 = smov 4  }
   0x3   :  { %s5656_s13 = sld [smem:[%s6658_s0 + %s5560_s10]]   ;;  %s5563_s22 = smov 5  }
   0x4   :  { %s5661_s17 = sld [smem:[%s6658_s0 + %s5561_s14]]   ;;  %s5564_s26 = smov 6  }
   0x5   :  { %s5666_s21 = sld [smem:[%s6658_s0 + %s5562_s18]]   ;;  %s5565_s30 = smov 7  }
   0x6   :  { %s5671_s25 = sld [smem:[%s6658_s0 + %s5563_s22]]   ;;  %s5566_s4 = smov 8  }
   0x7   :  { %s5676_s29 = sld [smem:[%s6658_s0 + %s5564_s26]]   ;;  %s5567_s10 = smov 9  }
   0x8   :  { %s5681_s3 = sld [smem:[%s6658_s0 + %s5565_s30]]   ;;  %s5568_s15 = smov 10  }
   0x9   :  { %s5686_s8 = sld [smem:[%s6658_s0 + %s5566_s4]]   ;;  %s5569_s20 = smov 11  }
   0xa   :  { %6674 = sst [smem:[#allocation44_spill]] %s5661_s17  ;;  %s5570_s26 = smov 12  }
   0xb   :  { %s5691_s14 = sld [smem:[%s6658_s0 + %s5567_s10]]   ;;  %s5571_s1 = smov 13  }
   0xc   :  { %s5696_s19 = sld [smem:[%s6658_s0 + %s5568_s15]]   ;;  %s5572_s7 = smov 14  }
   0xd   :  { %6675 = sst [smem:[#allocation45_spill]] %s5676_s29  ;;  %s5573_s15 = smov 15  }
   0xe   :  { %s5701_s24 = sld [smem:[%s6658_s0 + %s5569_s20]]   ;;  %s5574_s22 = smov 16  }
   0xf   :  { %6676 = sst [smem:[#allocation46_spill]] %s5686_s8  ;;  %s5575_s28 = smov 17  }
  0x10   :  { %s5706_s30 = sld [smem:[%s6658_s0 + %s5570_s26]]  }
  0x11   :  { %6677 = sst [smem:[#allocation47_spill]] %s5691_s14 }
  0x12   :  { %6678 = sst [smem:[#allocation48_spill]] %s5696_s19 }
  0x13   :  { %s5711_s6 = sld [smem:[%s6658_s0 + %s5571_s1]]  }
  0x14   :  { %6679 = sst [smem:[#allocation49_spill]] %s5701_s24 }
  0x15   :  { %s5716_s12 = sld [smem:[%s6658_s0 + %s5572_s7]]   ;;  %s5576_s7 = smov 18  }
  0x16   :  { %6680 = sst [smem:[#allocation50_spill]] %s5706_s30 }
  0x17   :  { %s5721_s20 = sld [smem:[%s6658_s0 + %s5573_s15]]   ;;  %s5577_s15 = smov 19  }
  0x18   :  { %s5726_s27 = sld [smem:[%s6658_s0 + %s5574_s22]]   ;;  %s5578_s22 = smov 20  }
  0x19   :  { %s5731_s4 = sld [smem:[%s6658_s0 + %s5575_s28]]   ;;  %s5579_s28 = smov 21  }
  0x1a   :  { %s5741_s24 = sld [smem:[%s6658_s0 + %s5577_s15]]   ;;  %s5581_s15 = smov 23  }
  0x1b   :  { %6681 = sst [smem:[#allocation51_spill]] %s5716_s12 }
  0x1c   :  { %s5736_s12 = sld [smem:[%s6658_s0 + %s5576_s7]]   ;;  %s5580_s7 = smov 22  }
  0x1d   :  { %s5751_s14 = sld [smem:[%s6658_s0 + %s5579_s28]]   ;;  %s5583_s28 = smov 25  }
  0x1e   :  { %6682 = sst [smem:[#allocation52_spill]] %s5726_s27 }
  0x1f   :  { %s5746_s27 = sld [smem:[%s6658_s0 + %s5578_s22]]   ;;  %s5582_s22 = smov 24  }
  0x20   :  { %s5761_s30 = sld [smem:[%s6658_s0 + %s5581_s15]]   ;;  %s5585_s15 = smov 27  }
  0x21   :  { %s5766_s19 = sld [smem:[%s6658_s0 + %s5582_s22]]   ;;  %s5586_s22 = smov 28  }
  0x22   :  { %6683 = sst [smem:[#allocation53_spill]] %s5736_s12 }
  0x23   :  { %s5756_s12 = sld [smem:[%s6658_s0 + %s5580_s7]]   ;;  %s5584_s7 = smov 26  }
  0x24   :  { %s5771_s8 = sld [smem:[%s6658_s0 + %s5583_s28]]   ;;  %s5587_s28 = smov 29  }
  0x25   :  { %s5776_s17 = sld [smem:[%s6658_s0 + %s5584_s7]]   ;;  %s5588_s7 = smov 30  }
  0x26   :  { %s5781_s29 = sld [smem:[%s6658_s0 + %s5585_s15]]   ;;  %s5589_s15 = smov 31  }
  0x27   :  { %6685 = sst [smem:[#allocation55_spill]] %s5766_s19 }
  0x28   :  { %s5786_s19 = sld [smem:[%s6658_s0 + %s5586_s22]]   ;;  %s5590_s22 = smov 32  }
  0x29   :  { %6684 = sst [smem:[#allocation54_spill]] %s5756_s12 }
  0x2a   :  { %6686 = sst [smem:[#allocation56_spill]] %s5771_s8 }
  0x2b   :  { %6687 = sst [smem:[#allocation57_spill]] %s5776_s17 }
  0x2c   :  { %s5791_s8 = sld [smem:[%s6658_s0 + %s5587_s28]]   ;;  %s5591_s28 = smov 33  }
  0x2d   :  { %s5796_s17 = sld [smem:[%s6658_s0 + %s5588_s7]]   ;;  %s5592_s7 = smov 34  }
  0x2e   :  { %6688 = sst [smem:[#allocation58_spill]] %s5786_s19 }
  0x2f   :  { %s5801_s12 = sld [smem:[%s6658_s0 + %s5589_s15]]   ;;  %s5593_s15 = smov 35  }
  0x30   :  { %s5806_s19 = sld [smem:[%s6658_s0 + %s5590_s22]]   ;;  %s5594_s22 = smov 36  }
  0x32   :  { %6689 = sst [smem:[#allocation59_spill]] %s5791_s8 }
  0x33   :  { %6690 = sst [smem:[#allocation60_spill]] %s5796_s17 }
  0x34   :  { %s5811_s8 = sld [smem:[%s6658_s0 + %s5591_s28]]  }
  0x35   :  { %6691 = sst [smem:[#allocation61_spill]] %s5801_s12 }
  0x36   :  { %6692 = sst [smem:[#allocation62_spill]] %s5806_s19 }
  0x37   :  { %s5816_s17 = sld [smem:[%s6658_s0 + %s5592_s7]]  }
  0x38   :  { %s5821_s12 = sld [smem:[%s6658_s0 + %s5593_s15]]  }
  0x39   :  { %s5826_s19 = sld [smem:[%s6658_s0 + %s5594_s22]]  }
  0x3a   :  { %78 = vsyncpa [#allocation3], 0 }
  0x3b   :  { %79 = vsyncpa [#allocation6], 0 }
  0x3c   :  { %80 = vsyncpa [#allocation9], 0 }
  0x3d   :  { %81 = vsyncpa [#allocation12], 0 }
  0x3e   :  { %82 = vsyncpa [#allocation15], 0 }
  0x3f   :  { %83 = vsyncpa [#allocation18], 0 }
  0x40   :  { %84 = vsyncpa [#allocation21], 0 }
  0x41   :  { %85 = vsyncpa [#allocation24], 0 }
  0x42   :  { %86 = vsyncpa [#allocation27], 0 }
  0x43   :  { %87 = vsyncpa [#allocation30], 0  ;;  %s106_s28 = sshll.u32 %s5651_s9, 4  ;;  %s107_s28 = int_to_ptr.hbm [resolvable:$true] %s106_s28 }
  0x44   :  { %88 = vsyncpa [#allocation4], 0  ;;  %s5595_s1 = smov [#allocation5]   ;;  %s132_s2 = sshll.u32 %s5666_s21, 4  ;;  %s133_s2 = int_to_ptr.hbm [resolvable:$true] %s132_s2 }
  0x45   :  { %s108_s0 = sshll.u32 %s5595_s1, 4  ;;  %s5057_s7 = sshra.s32 %s107_s28, 4  ;;  %s109_s0 = int_to_ptr.vmem [resolvable:$true] %s108_s0  ;;  %s5058_s7 = int_to_ptr.hbm [resolvable:$true] %s5057_s7 }
  0x46   :  { %s5059_s10 = scalar_lea.hbm %s5058_s7, 16  ;;  %s5061_s11 = scalar_lea.hbm %s5651_s9, 16 }
  0x47   :  { %p5060_p0 = scmp.ne.s32.totalorder %s5058_s7, %s5059_s10  ;;  %p5062_p1 = scmp.lt.s32.totalorder %s5058_s7, %s5651_s9 }
  0x48   :  { %p5063_p2 = scmp.lt.s32.totalorder %s5061_s11, %s5059_s10 }
  0x4a   :  { %p5064_p3 = por %p5063_p2, %p5062_p1 }
  0x4c   :  { %p5065_p4 = pnand %p5064_p3, %p5060_p0 }
  0x4e   :  { %5068 = shalt.err (!%p5065_p4)
}
  0x4f   :  { %s5596_s15 = smov 64   ;;  %s5597_s16 = smov 4  }
  0x50   :  { %114 = dma.hbm_to_vmem [thread:$0]  %s107_s28, 256, %s109_s0, [#allocation6], %s5596_s15, %s5596_s15, %s5597_s16  }
  0x51   :  { %s5598_s18 = smov [#allocation8]   ;;  %s159_s23 = sshll.u32 %s5681_s3, 4  ;;  %s160_s23 = int_to_ptr.hbm [resolvable:$true] %s159_s23 }
  0x52   :  { %s134_s22 = sshll.u32 %s5598_s18, 4  ;;  %s5081_s9 = sshra.s32 %s133_s2, 4  ;;  %s135_s22 = int_to_ptr.vmem [resolvable:$true] %s134_s22  ;;  %s5082_s9 = int_to_ptr.hbm [resolvable:$true] %s5081_s9 }
  0x53   :  { %s5083_s26 = scalar_lea.hbm %s5082_s9, 16  ;;  %s5085_s1 = scalar_lea.hbm %s5666_s21, 16 }
  0x54   :  { %p5084_p5 = scmp.ne.s32.totalorder %s5082_s9, %s5083_s26  ;;  %p5086_p6 = scmp.lt.s32.totalorder %s5082_s9, %s5666_s21 }
  0x55   :  { %p5087_p7 = scmp.lt.s32.totalorder %s5085_s1, %s5083_s26 }
  0x57   :  { %p5088_p8 = por %p5087_p7, %p5086_p6 }
  0x59   :  { %p5089_p9 = pnand %p5088_p8, %p5084_p5 }
  0x5b   :  { %5092 = shalt.err (!%p5089_p9)
}
  0x5c   :  { %140 = dma.hbm_to_vmem [thread:$0]  %s133_s2, 256, %s135_s22, [#allocation9], %s5596_s15, %s5596_s15, %s5597_s16  }
  0x5d   :  { %s5599_s28 = smov [#allocation11]   ;;  %s194_s7 = sshll.u32 %s5721_s20, 4  ;;  %s195_s7 = int_to_ptr.hbm [resolvable:$true] %s194_s7 }
  0x5e   :  { %s161_s0 = sshll.u32 %s5599_s28, 4  ;;  %s5105_s10 = sshra.s32 %s160_s23, 4  ;;  %s162_s0 = int_to_ptr.vmem [resolvable:$true] %s161_s0  ;;  %s5106_s10 = int_to_ptr.hbm [resolvable:$true] %s5105_s10 }
  0x5f   :  { %s5107_s11 = scalar_lea.hbm %s5106_s10, 1  ;;  %s5109_s21 = scalar_lea.hbm %s5681_s3, 1 }
  0x60   :  { %p5108_p10 = scmp.ne.s32.totalorder %s5106_s10, %s5107_s11  ;;  %p5110_p11 = scmp.lt.s32.totalorder %s5106_s10, %s5681_s3 }
  0x61   :  { %p5111_p12 = scmp.lt.s32.totalorder %s5109_s21, %s5107_s11 }
  0x63   :  { %p5112_p13 = por %p5111_p12, %p5110_p11 }
  0x65   :  { %p5113_p0 = pnand %p5112_p13, %p5108_p10 }
  0x67   :  { %5116 = shalt.err (!%p5113_p0)
}
  0x68   :  { %164 = dma.hbm_to_vmem [thread:$0]  %s160_s23, 16, %s162_s0, [#allocation12]  }
  0x69   :  { %s5600_s2 = smov [#allocation14]   ;;  %s224_s22 = sshll.u32 %s5741_s24, 4  ;;  %s5845_s22 = int_to_ptr.hbm [resolvable:$true] %s224_s22 }
  0x6a   :  { %s196_s18 = sshll.u32 %s5600_s2, 4  ;;  %s5129_s9 = sshra.s32 %s195_s7, 4  ;;  %s197_s18 = int_to_ptr.vmem [resolvable:$true] %s196_s18  ;;  %s5130_s9 = int_to_ptr.hbm [resolvable:$true] %s5129_s9 }
  0x6b   :  { %s5131_s26 = scalar_lea.hbm %s5130_s9, 2  ;;  %s5133_s3 = scalar_lea.hbm %s5721_s20, 2 }
  0x6c   :  { %p5132_p1 = scmp.ne.s32.totalorder %s5130_s9, %s5131_s26  ;;  %p5134_p2 = scmp.lt.s32.totalorder %s5130_s9, %s5721_s20 }
  0x6d   :  { %p5135_p3 = scmp.lt.s32.totalorder %s5133_s3, %s5131_s26 }
  0x6f   :  { %p5136_p4 = por %p5135_p3, %p5134_p2 }
  0x71   :  { %p5137_p5 = pnand %p5136_p4, %p5132_p1 }
  0x73   :  { %5140 = shalt.err (!%p5137_p5)
}
  0x74   :  { %s5601_s23 = smov 16   ;;  %s5602_s1 = smov 1  }
  0x75   :  { %202 = dma.hbm_to_vmem [thread:$0]  %s195_s7, 32, %s197_s18, [#allocation15], %s5601_s23, %s5601_s23, %s5602_s1  }
  0x76   :  { %s250_s28 = sshll.u32 %s5751_s14, 4  ;;  %s5603_s0 = smov [#allocation17]   ;;  %s5853_s28 = int_to_ptr.hbm [resolvable:$true] %s250_s28 }
  0x77   :  { %s226_s10 = sshll.u32 %s5603_s0, 4  ;;  %s5153_s20 = sshra.s32 %s5845_s22, 4  ;;  %s227_s10 = int_to_ptr.vmem [resolvable:$true] %s226_s10  ;;  %s5154_s20 = int_to_ptr.hbm [resolvable:$true] %s5153_s20 }
  0x78   :  { %s5155_s11 = scalar_lea.hbm %s5154_s20, 2  ;;  %s5157_s21 = scalar_lea.hbm %s5741_s24, 2 }
  0x79   :  { %p5156_p6 = scmp.ne.s32.totalorder %s5154_s20, %s5155_s11  ;;  %p5158_p7 = scmp.lt.s32.totalorder %s5154_s20, %s5741_s24 }
  0x7a   :  { %p5159_p8 = scmp.lt.s32.totalorder %s5157_s21, %s5155_s11 }
  0x7c   :  { %p5160_p9 = por %p5159_p8, %p5158_p7 }
  0x7e   :  { %p5161_p10 = pnand %p5160_p9, %p5156_p6 }
  0x80   :  { %5164 = shalt.err (!%p5161_p10)
}
  0x81   :  { %232 = dma.hbm_to_vmem [thread:$0]  %s5845_s22, 32, %s227_s10, [#allocation18], %s5601_s23, %s5601_s23, %s5602_s1  }
  0x82   :  { %s5604_s7 = smov [#allocation20]   ;;  %s276_s18 = sshll.u32 %s5761_s30, 4  ;;  %s5863_s18 = int_to_ptr.hbm [resolvable:$true] %s276_s18 }
  0x83   :  { %s252_s2 = sshll.u32 %s5604_s7, 4  ;;  %s5177_s24 = sshra.s32 %s5853_s28, 4  ;;  %s253_s2 = int_to_ptr.vmem [resolvable:$true] %s252_s2  ;;  %s5178_s24 = int_to_ptr.hbm [resolvable:$true] %s5177_s24 }
  0x84   :  { %s5179_s9 = scalar_lea.hbm %s5178_s24, 2  ;;  %s5181_s26 = scalar_lea.hbm %s5751_s14, 2 }
  0x85   :  { %p5180_p11 = scmp.ne.s32.totalorder %s5178_s24, %s5179_s9  ;;  %p5182_p12 = scmp.lt.s32.totalorder %s5178_s24, %s5751_s14 }
  0x86   :  { %p5183_p13 = scmp.lt.s32.totalorder %s5181_s26, %s5179_s9 }
  0x88   :  { %p5184_p0 = por %p5183_p13, %p5182_p12 }
  0x8a   :  { %p5185_p1 = pnand %p5184_p0, %p5180_p11 }
  0x8c   :  { %5188 = shalt.err (!%p5185_p1)
}
  0x8d   :  { %258 = dma.hbm_to_vmem [thread:$0]  %s5853_s28, 32, %s253_s2, [#allocation21], %s5601_s23, %s5601_s23, %s5602_s1  }
  0x8e   :  { %s5605_s22 = smov [#allocation23]   ;;  %s306_s0 = sshll.u32 %s5781_s29, 4  ;;  %s307_s0 = int_to_ptr.hbm [resolvable:$true] %s306_s0 }
  0x8f   :  { %s278_s3 = sshll.u32 %s5605_s22, 4  ;;  %s5201_s10 = sshra.s32 %s5863_s18, 4  ;;  %s279_s3 = int_to_ptr.vmem [resolvable:$true] %s278_s3  ;;  %s5202_s10 = int_to_ptr.hbm [resolvable:$true] %s5201_s10 }
  0x90   :  { %s5203_s14 = scalar_lea.hbm %s5202_s10, 2  ;;  %s5205_s20 = scalar_lea.hbm %s5761_s30, 2 }
  0x91   :  { %p5204_p2 = scmp.ne.s32.totalorder %s5202_s10, %s5203_s14  ;;  %p5206_p3 = scmp.lt.s32.totalorder %s5202_s10, %s5761_s30 }
  0x92   :  { %p5207_p4 = scmp.lt.s32.totalorder %s5205_s20, %s5203_s14 }
  0x94   :  { %p5208_p5 = por %p5207_p4, %p5206_p3 }
  0x96   :  { %p5209_p6 = pnand %p5208_p5, %p5204_p2 }
  0x98   :  { %5212 = shalt.err (!%p5209_p6)
}
  0x99   :  { %284 = dma.hbm_to_vmem [thread:$0]  %s5863_s18, 32, %s279_s3, [#allocation24], %s5601_s23, %s5601_s23, %s5602_s1  }
  0x9a   :  { %s5606_s28 = smov [#allocation26]   ;;  %s340_s21 = sshll.u32 %s5811_s8, 4  ;;  %s5881_s21 = int_to_ptr.hbm [resolvable:$true] %s340_s21 }
  0x9b   :  { %s308_s11 = sshll.u32 %s5606_s28, 4  ;;  %s5225_s30 = sshra.s32 %s307_s0, 4  ;;  %s309_s11 = int_to_ptr.vmem [resolvable:$true] %s308_s11  ;;  %s5226_s30 = int_to_ptr.hbm [resolvable:$true] %s5225_s30 }
  0x9c   :  { %s5227_s7 = scalar_lea.hbm %s5226_s30, 32  ;;  %s5229_s2 = scalar_lea.hbm %s5781_s29, 32 }
  0x9d   :  { %p5228_p7 = scmp.ne.s32.totalorder %s5226_s30, %s5227_s7  ;;  %p5230_p8 = scmp.lt.s32.totalorder %s5226_s30, %s5781_s29 }
  0x9e   :  { %p5231_p9 = scmp.lt.s32.totalorder %s5229_s2, %s5227_s7 }
  0xa0   :  { %p5232_p10 = por %p5231_p9, %p5230_p8 }
  0xa2   :  { %p5233_p11 = pnand %p5232_p10, %p5228_p7 }
  0xa4   :  { %5236 = shalt.err (!%p5233_p11)
}
  0xa5   :  { %s5607_s24 = smov 128   ;;  %s5608_s18 = smov 8  }
  0xa6   :  { %314 = dma.hbm_to_vmem [thread:$0]  %s307_s0, 512, %s309_s11, [#allocation27], %s5607_s24, %s5607_s24, %s5608_s18  }
  0xa7   :  { %s93_s9 = sshll.u32 %s5646_s5, 4  ;;  %s5609_s26 = smov [#allocation29]   ;;  %s5889_s9 = int_to_ptr.hbm [resolvable:$true] %s93_s9 }
  0xa8   :  { %s342_s22 = sshll.u32 %s5609_s26, 4  ;;  %s5249_s29 = sshra.s32 %s5881_s21, 4  ;;  %s343_s22 = int_to_ptr.vmem [resolvable:$true] %s342_s22  ;;  %s5250_s29 = int_to_ptr.hbm [resolvable:$true] %s5249_s29 }
  0xa9   :  { %s5251_s3 = scalar_lea.hbm %s5250_s29, 16  ;;  %s5253_s10 = scalar_lea.hbm %s5811_s8, 16 }
  0xaa   :  { %p5252_p12 = scmp.ne.s32.totalorder %s5250_s29, %s5251_s3  ;;  %p5254_p13 = scmp.lt.s32.totalorder %s5250_s29, %s5811_s8 }
  0xab   :  { %p5255_p0 = scmp.lt.s32.totalorder %s5253_s10, %s5251_s3 }
  0xad   :  { %p5256_p1 = por %p5255_p0, %p5254_p13 }
  0xaf   :  { %p5257_p2 = pnand %p5256_p1, %p5252_p12 }
  0xb1   :  { %5260 = shalt.err (!%p5257_p2)
}
  0xb2   :  { %348 = dma.hbm_to_vmem [thread:$0]  %s5881_s21, 256, %s343_s22, [#allocation30], %s5596_s15, %s5596_s15, %s5597_s16  }
  0xb3   :  { %s5610_s0 = smov [#allocation2]   ;;  %s120_s20 = sshll.u32 %s5656_s13, 4  ;;  %s121_s20 = int_to_ptr.hbm [resolvable:$true] %s120_s20 }
  0xb4   :  { %s95_s14 = sshll.u32 %s5610_s0, 4  ;;  %s5273_s28 = sshra.s32 %s5889_s9, 4  ;;  %s96_s14 = int_to_ptr.vmem [resolvable:$true] %s95_s14  ;;  %s5274_s28 = int_to_ptr.hbm [resolvable:$true] %s5273_s28 }
  0xb5   :  { %s5275_s8 = scalar_lea.hbm %s5274_s28, 16  ;;  %s5277_s11 = scalar_lea.hbm %s5646_s5, 16 }
  0xb6   :  { %p5276_p3 = scmp.ne.s32.totalorder %s5274_s28, %s5275_s8  ;;  %p5278_p4 = scmp.lt.s32.totalorder %s5274_s28, %s5646_s5 }
  0xb7   :  { %p5279_p5 = scmp.lt.s32.totalorder %s5277_s11, %s5275_s8 }
  0xb9   :  { %p5280_p6 = por %p5279_p5, %p5278_p4 }
  0xbb   :  { %p5281_p7 = pnand %p5280_p6, %p5276_p3 }
  0xbd   :  { %5284 = shalt.err (!%p5281_p7)
}
  0xbe   :  { %101 = dma.hbm_to_vmem [thread:$0]  %s5889_s9, 256, %s96_s14, [#allocation3], %s5607_s24, %s5607_s24, %s5608_s18  }
  0xbf   :  { %s146_s21 = sshll.u32 %s5671_s25, 4  ;;  %s5611_s30 = smov [#allocation7]   ;;  %s147_s21 = int_to_ptr.hbm [resolvable:$true] %s146_s21 }
  0xc0   :  { %s122_s7 = sshll.u32 %s5611_s30, 4  ;;  %s5297_s2 = sshra.s32 %s121_s20, 4  ;;  %s123_s7 = int_to_ptr.vmem [resolvable:$true] %s122_s7  ;;  %s5298_s2 = int_to_ptr.hbm [resolvable:$true] %s5297_s2 }
  0xc1   :  { %s5299_s5 = scalar_lea.hbm %s5298_s2, 1  ;;  %s5301_s26 = scalar_lea.hbm %s5656_s13, 1 }
  0xc2   :  { %p5300_p8 = scmp.ne.s32.totalorder %s5298_s2, %s5299_s5  ;;  %p5302_p9 = scmp.lt.s32.totalorder %s5298_s2, %s5656_s13 }
  0xc3   :  { %p5303_p10 = scmp.lt.s32.totalorder %s5301_s26, %s5299_s5 }
  0xc5   :  { %p5304_p11 = por %p5303_p10, %p5302_p9 }
  0xc7   :  { %p5305_p12 = pnand %p5304_p11, %p5300_p8 }
  0xc9   :  { %5308 = shalt.err (!%p5305_p12)
}
  0xca   :  { %125 = dma.hbm_to_vmem [thread:$0]  %s121_s20, 16, %s123_s7, [#allocation6]  }
  0xcb   :  { %s5612_s9 = smov [#allocation10]   ;;  %s179_s29 = sshll.u32 %s5711_s6, 4  ;;  %s5910_s29 = int_to_ptr.hbm [resolvable:$true] %s179_s29 }
  0xcc   :  { %s148_s22 = sshll.u32 %s5612_s9, 4  ;;  %s5321_s3 = sshra.s32 %s147_s21, 4  ;;  %s149_s22 = int_to_ptr.vmem [resolvable:$true] %s148_s22  ;;  %s5322_s3 = int_to_ptr.hbm [resolvable:$true] %s5321_s3 }
  0xcd   :  { %s5323_s10 = scalar_lea.hbm %s5322_s3, 1  ;;  %s5325_s0 = scalar_lea.hbm %s5671_s25, 1 }
  0xce   :  { %p5324_p13 = scmp.ne.s32.totalorder %s5322_s3, %s5323_s10  ;;  %p5326_p0 = scmp.lt.s32.totalorder %s5322_s3, %s5671_s25 }
  0xcf   :  { %p5327_p1 = scmp.lt.s32.totalorder %s5325_s0, %s5323_s10 }
  0xd1   :  { %p5328_p2 = por %p5327_p1, %p5326_p0 }
  0xd3   :  { %p5329_p3 = pnand %p5328_p2, %p5324_p13 }
  0xd5   :  { %5332 = shalt.err (!%p5329_p3)
}
  0xd6   :  { %151 = dma.hbm_to_vmem [thread:$0]  %s147_s21, 16, %s149_s22, [#allocation9]  }
  0xd7   :  { %s209_s13 = sshll.u32 %s5731_s4, 4  ;;  %s5613_s14 = smov [#allocation13]   ;;  %s5915_s13 = int_to_ptr.hbm [resolvable:$true] %s209_s13 }
  0xd8   :  { %s181_s20 = sshll.u32 %s5613_s14, 4  ;;  %s5345_s28 = sshra.s32 %s5910_s29, 4  ;;  %s182_s20 = int_to_ptr.vmem [resolvable:$true] %s181_s20  ;;  %s5346_s28 = int_to_ptr.hbm [resolvable:$true] %s5345_s28 }
  0xd9   :  { %s5347_s8 = scalar_lea.hbm %s5346_s28, 2  ;;  %s5349_s25 = scalar_lea.hbm %s5711_s6, 2 }
  0xda   :  { %p5348_p4 = scmp.ne.s32.totalorder %s5346_s28, %s5347_s8  ;;  %p5350_p5 = scmp.lt.s32.totalorder %s5346_s28, %s5711_s6 }
  0xdb   :  { %p5351_p6 = scmp.lt.s32.totalorder %s5349_s25, %s5347_s8 }
  0xdd   :  { %p5352_p7 = por %p5351_p6, %p5350_p5 }
  0xdf   :  { %p5353_p8 = pnand %p5352_p7, %p5348_p4 }
  0xe1   :  { %5356 = shalt.err (!%p5353_p8)
}
  0xe2   :  { %187 = dma.hbm_to_vmem [thread:$0]  %s5910_s29, 32, %s182_s20, [#allocation12], %s5601_s23, %s5601_s23, %s5602_s1  }
  0xe3   :  { %s5614_s11 = smov [#allocation16]   ;;  %s237_s30 = sshll.u32 %s5746_s27, 4  ;;  %s5925_s30 = int_to_ptr.hbm [resolvable:$true] %s237_s30 }
  0xe4   :  { %s211_s21 = sshll.u32 %s5614_s11, 4  ;;  %s5369_s6 = sshra.s32 %s5915_s13, 4  ;;  %s212_s21 = int_to_ptr.vmem [resolvable:$true] %s211_s21  ;;  %s5370_s6 = int_to_ptr.hbm [resolvable:$true] %s5369_s6 }
  0xe5   :  { %s5371_s7 = scalar_lea.hbm %s5370_s6, 2  ;;  %s5373_s2 = scalar_lea.hbm %s5731_s4, 2 }
  0xe6   :  { %p5372_p9 = scmp.ne.s32.totalorder %s5370_s6, %s5371_s7  ;;  %p5374_p10 = scmp.lt.s32.totalorder %s5370_s6, %s5731_s4 }
  0xe7   :  { %p5375_p11 = scmp.lt.s32.totalorder %s5373_s2, %s5371_s7 }
  0xe9   :  { %p5376_p12 = por %p5375_p11, %p5374_p10 }
  0xeb   :  { %p5377_p13 = pnand %p5376_p12, %p5372_p9 }
  0xed   :  { %5380 = shalt.err (!%p5377_p13)
}
  0xee   :  { %s6693_s5 = sld [smem:[#allocation54_spill]]  ;;  %s5615_s9 = smov [#allocation19]  }
  0xef   :  { %217 = dma.hbm_to_vmem [thread:$0]  %s5915_s13, 32, %s212_s21, [#allocation15], %s5601_s23, %s5601_s23, %s5602_s1  }
  0xf0   :  { %s239_s22 = sshll.u32 %s5615_s9, 4  ;;  %s5393_s4 = sshra.s32 %s5925_s30, 4  ;;  %s240_s22 = int_to_ptr.vmem [resolvable:$true] %s239_s22  ;;  %s5394_s4 = int_to_ptr.hbm [resolvable:$true] %s5393_s4 }
  0xf1   :  { %s5395_s29 = scalar_lea.hbm %s5394_s4, 2  ;;  %s5397_s3 = scalar_lea.hbm %s5746_s27, 2 }
  0xf2   :  { %p5396_p0 = scmp.ne.s32.totalorder %s5394_s4, %s5395_s29  ;;  %p5398_p1 = scmp.lt.s32.totalorder %s5394_s4, %s5746_s27 }
  0xf3   :  { %p5399_p2 = scmp.lt.s32.totalorder %s5397_s3, %s5395_s29 }
  0xf4   :  { %s263_s26 = sshll.u32 %s6693_s5, 4  ;;  %s5935_s26 = int_to_ptr.hbm [resolvable:$true] %s263_s26 }
  0xf5   :  { %p5400_p3 = por %p5399_p2, %p5398_p1 }
  0xf7   :  { %p5401_p4 = pnand %p5400_p3, %p5396_p0 }
  0xf9   :  { %5404 = shalt.err (!%p5401_p4)
}
  0xfa   :  { %s6694_s10 = sld [smem:[#allocation57_spill]]  ;;  %s5616_s0 = smov [#allocation22]  }
  0xfb   :  { %245 = dma.hbm_to_vmem [thread:$0]  %s5925_s30, 32, %s240_s22, [#allocation18], %s5601_s23, %s5601_s23, %s5602_s1  }
  0xfc   :  { %s265_s13 = sshll.u32 %s5616_s0, 4  ;;  %s5417_s27 = sshra.s32 %s5935_s26, 4  ;;  %s266_s13 = int_to_ptr.vmem [resolvable:$true] %s265_s13  ;;  %s5418_s27 = int_to_ptr.hbm [resolvable:$true] %s5417_s27 }
  0xfd   :  { %s5419_s20 = scalar_lea.hbm %s5418_s27, 2  ;;  %s5421_s28 = scalar_lea.hbm %s6693_s5, 2 }
  0xfe   :  { %p5420_p5 = scmp.ne.s32.totalorder %s5418_s27, %s5419_s20  ;;  %p5422_p6 = scmp.lt.s32.totalorder %s5418_s27, %s6693_s5 }
  0xff   :  { %p5423_p7 = scmp.lt.s32.totalorder %s5421_s28, %s5419_s20 }
 0x100   :  { %s293_s14 = sshll.u32 %s6694_s10, 4  ;;  %s5945_s14 = int_to_ptr.hbm [resolvable:$true] %s293_s14 }
 0x101   :  { %p5424_p8 = por %p5423_p7, %p5422_p6 }
 0x103   :  { %p5425_p9 = pnand %p5424_p8, %p5420_p5 }
 0x105   :  { %5428 = shalt.err (!%p5425_p9)
}
 0x106   :  { %s6695_s8 = sld [smem:[#allocation61_spill]]  ;;  %s5617_s11 = smov [#allocation25]  }
 0x107   :  { %271 = dma.hbm_to_vmem [thread:$0]  %s5935_s26, 32, %s266_s13, [#allocation21], %s5601_s23, %s5601_s23, %s5602_s1  }
 0x108   :  { %s295_s21 = sshll.u32 %s5617_s11, 4  ;;  %s5441_s30 = sshra.s32 %s5945_s14, 4  ;;  %s296_s21 = int_to_ptr.vmem [resolvable:$true] %s295_s21  ;;  %s5442_s30 = int_to_ptr.hbm [resolvable:$true] %s5441_s30 }
 0x109   :  { %s5443_s6 = scalar_lea.hbm %s5442_s30, 32  ;;  %s5445_s7 = scalar_lea.hbm %s6694_s10, 32 }
 0x10a   :  { %p5444_p10 = scmp.ne.s32.totalorder %s5442_s30, %s5443_s6  ;;  %p5446_p11 = scmp.lt.s32.totalorder %s5442_s30, %s6694_s10 }
 0x10b   :  { %p5447_p12 = scmp.lt.s32.totalorder %s5445_s7, %s5443_s6 }
 0x10c   :  { %s325_s25 = sshll.u32 %s6695_s8, 4  ;;  %s5955_s25 = int_to_ptr.hbm [resolvable:$true] %s325_s25 }
 0x10d   :  { %p5448_p13 = por %p5447_p12, %p5446_p11 }
 0x10f   :  { %p5449_p0 = pnand %p5448_p13, %p5444_p10 }
 0x111   :  { %5452 = shalt.err (!%p5449_p0)
}
 0x112   :  { %301 = dma.hbm_to_vmem [thread:$0]  %s5945_s14, 512, %s296_s21, [#allocation24], %s5607_s24, %s5607_s24, %s5608_s18  }
 0x113   :  { %s5618_s23 = smov [#allocation28]   ;;  %s353_s2 = sshll.u32 %s5816_s17, 4  ;;  %s354_s2 = int_to_ptr.hbm [resolvable:$true] %s353_s2 }
 0x114   :  { %s327_s1 = sshll.u32 %s5618_s23, 4  ;;  %s5465_s5 = sshra.s32 %s5955_s25, 4  ;;  %s328_s1 = int_to_ptr.vmem [resolvable:$true] %s327_s1  ;;  %s5466_s5 = int_to_ptr.hbm [resolvable:$true] %s5465_s5 }
 0x115   :  { %s5467_s26 = scalar_lea.hbm %s5466_s5, 16  ;;  %s5469_s9 = scalar_lea.hbm %s6695_s8, 16 }
 0x116   :  { %p5468_p1 = scmp.ne.s32.totalorder %s5466_s5, %s5467_s26  ;;  %p5470_p2 = scmp.lt.s32.totalorder %s5466_s5, %s6695_s8 }
 0x117   :  { %p5471_p3 = scmp.lt.s32.totalorder %s5469_s9, %s5467_s26 }
 0x119   :  { %p5472_p4 = por %p5471_p3, %p5470_p2 }
 0x11b   :  { %p5473_p5 = pnand %p5472_p4, %p5468_p1 }
 0x11d   :  { %5476 = shalt.err (!%p5473_p5)
}
 0x11e   :  { %333 = dma.hbm_to_vmem [thread:$0]  %s5955_s25, 256, %s328_s1, [#allocation27], %s5596_s15, %s5596_s15, %s5597_s16  }
 0x11f   :  { %s5619_s22 = smov [#allocation31]   ;;  %s5489_s29 = sshra.s32 %s354_s2, 4  ;;  %s5490_s29 = int_to_ptr.hbm [resolvable:$true] %s5489_s29 }
 0x120   :  { %s355_s4 = sshll.u32 %s5619_s22, 4  ;;  %s5491_s3 = scalar_lea.hbm %s5490_s29, 16  ;;  %s356_s4 = int_to_ptr.vmem [resolvable:$true] %s355_s4 }
 0x121   :  { %p5492_p6 = scmp.ne.s32.totalorder %s5490_s29, %s5491_s3  ;;  %s5493_s10 = scalar_lea.hbm %s5816_s17, 16 }
 0x122   :  { %p5494_p7 = scmp.lt.s32.totalorder %s5490_s29, %s5816_s17  ;;  %p5495_p8 = scmp.lt.s32.totalorder %s5493_s10, %s5491_s3 }
 0x124   :  { %p5496_p9 = por %p5495_p8, %p5494_p7 }
 0x126   :  { %p5497_p10 = pnand %p5496_p9, %p5492_p6 }
 0x128   :  { %5500 = shalt.err (!%p5497_p10)
}
 0x129   :  { %361 = dma.hbm_to_vmem [thread:$0]  %s354_s2, 256, %s356_s4, [#allocation30], %s5596_s15, %s5596_s15, %s5597_s16  }
 0x12a   :  { %5537 = dma.done.wait [#allocation3], 256  }
 0x12b   :  { %5538 = vsyncadd [#allocation3], 4294967040 }
 0x12c   :  { %5539 = dma.done.wait [#allocation6], 272  }
 0x12d   :  { %5540 = vsyncadd [#allocation6], 4294967024 }
 0x12e   :  { %5541 = dma.done.wait [#allocation9], 272  }
 0x12f   :  { %5542 = vsyncadd [#allocation9], 4294967024 }
 0x130   :  { %5543 = dma.done.wait [#allocation12], 48  }
 0x131   :  { %5544 = vsyncadd [#allocation12], 4294967248 }
 0x132   :  { %5545 = dma.done.wait [#allocation15], 64  }
 0x133   :  { %5546 = vsyncadd [#allocation15], 4294967232 }
 0x134   :  { %5547 = dma.done.wait [#allocation18], 64  }
 0x135   :  { %5548 = vsyncadd [#allocation18], 4294967232 }
 0x136   :  { %5549 = dma.done.wait [#allocation21], 64  }
 0x137   :  { %5550 = vsyncadd [#allocation21], 4294967232 }
 0x138   :  { %5551 = dma.done.wait [#allocation24], 544  }
 0x139   :  { %5552 = vsyncadd [#allocation24], 4294966752 }
 0x13a   :  { %5553 = dma.done.wait [#allocation27], 768  }
 0x13b   :  { %5554 = vsyncadd [#allocation27], 4294966528 }
 0x13c   :  { %5555 = dma.done.wait [#allocation30], 512  }
 0x13d   :  { %5556 = vsyncadd [#allocation30], 4294966784  ;;  %s6696_s17 = sld [smem:[#allocation45_spill]]  ;;  %v4680_v0 = vld [vmem:[#allocation5 + $0x8] sm:$0xff]  ;;  %v4686_v1 = vld [vmem:[#allocation8 + $0x8] sm:$0xff]  ;;  %vm464_vm0 = vcmask 261120  }
 0x13e   :  { %v4679_v2 = vld [vmem:[#allocation5] sm:$0xff]  ;;  %v4685_v3 = vld [vmem:[#allocation8] sm:$0xff]  ;;  %474 = vmatpush.bf16.msra.mxu0 %v4680_v0  ;;  %581 = vmatpush.bf16.msra.mxu2 %v4686_v1  ;;  %v4836_v9 = vld [vmem:[#allocation7] ss:$0 sm:$0xff]  ;;  %vm482_vm1 = vcmask 523264   ;;  %s6697_s16 = sld [smem:[#allocation44_spill]] }
 0x13f   :  { %v5977_v4 = vld [vmem:[#allocation2] sm:$0xff]  ;;  %v5979_v5 = vld [vmem:[#allocation2 + $0x8] sm:$0xff]  ;;  %v4837_v13 = vld [vmem:[#allocation10] ss:$0 sm:$0xff]  ;;  %vm645_vm2 = vcmask 23552   ;;  %s6698_s0 = sld [smem:[#allocation46_spill]] }
 0x140   :  { %v5983_v6 = vpack.c.bf16 %v5979_v5, %v5977_v4  ;;  %v4838_v50 = vld [vmem:[#allocation11] ss:$0 sm:$0xff]  ;;  %s6699_s13 = sld [smem:[#allocation48_spill]]  ;;  %vm810_vm3 = vcmask 31744   ;;  %vm879_vm4 = vcmask 1043456   ;;  %s5621_s28 = smov 124  }
 0x141   :  { %s6700_s14 = sld [smem:[#allocation50_spill]]  ;;  %vm849_vm5 = vcmask 64512   ;;  %s5622_s8 = smov 120   ;;  %vm1053_vm6 = vcmask 1041408  }
 0x142   :  { %475 = vmatpush.bf16.msra.mxu0 %v4679_v2  ;;  %582 = vmatpush.bf16.msra.mxu2 %v4685_v3  ;;  %s6701_s27 = sld [smem:[#allocation47_spill]]  ;;  %s5623_s25 = smov 116  }
 0x143   :  { %v4688_v7 = vld [vmem:[%s6696_s17 + $0x8] sm:$0xff]  ;;  %v4687_v8 = vld [vmem:[%s6696_s17] sm:$0xff]  ;;  %s6702_s20 = sld [smem:[#allocation49_spill]]  ;;  %s5624_s21 = smov 112  }
 0x144   :  { %637 = vmatpush.bf16.msra.mxu3 %v4688_v7  ;;  %v4684_v57 = vld [vmem:[%s6697_s16 + $0x18] sm:$0xff]  ;;  %v4683_v58 = vld [vmem:[%s6697_s16 + $0x10] sm:$0xff]  ;;  %v4682_v59 = vld [vmem:[%s6697_s16 + $0x8] sm:$0xff]  ;;  %s6703_s11 = sld [smem:[#allocation51_spill]]  ;;  %s5625_s30 = smov 108  }
 0x145   :  { %4304 = vmatmul.msk.bf16.vlgmr.msra.gmra.mxu0 %vm464_vm0, %v5983_v6  ;;  %4330 = vmatmul.msk.bf16.vlgmr.msra.gmra.mxu2 %vm464_vm0, %v5983_v6  ;;  %v4681_v60 = vld [vmem:[%s6697_s16] sm:$0xff]  ;;  %s5626_s6 = smov 104   ;;  %s5627_s7 = smov 100  }
 0x146   :  { %545 = vmatpush.bf16.msra.mxu1 %v4684_v57  ;;  %s6704_s23 = sld [smem:[#allocation52_spill]]  ;;  %s5635_s9 = smov 96  }
 0x147   :  { %s6705_s1 = sld [smem:[#allocation53_spill]]  ;;  %s5636_s22 = smov 32  }
 0x148   :  { %638 = vmatpush.bf16.msra.mxu3 %v4687_v8  ;;  %s6706_s2 = sld [smem:[#allocation55_spill]]  ;;  %s5637_s3 = smov [#allocation32]  }
 0x149   :  { %s6707_s5 = sld [smem:[#allocation56_spill]]  ;;  %s4236_s10 = sshll.u32 %s5637_s3, 4  ;;  %s4237_s10 = int_to_ptr.vmem [resolvable:$true] %s4236_s10 }
 0x14a   :  { %546 = vmatpush.bf16.msra.mxu1 %v4683_v58  ;;  %s6708_s26 = sld [smem:[#allocation58_spill]]  ;;  %s4238_s17 = sshll.u32 %s5826_s19, 4  ;;  %s4239_s17 = int_to_ptr.hbm [resolvable:$true] %s4238_s17 }
 0x14b   :  { %s6709_s4 = sld [smem:[#allocation59_spill]]  ;;  %s5525_s16 = sshra.s32 %s4239_s17, 4  ;;  %s5526_s16 = int_to_ptr.hbm [resolvable:$true] %s5525_s16 }
 0x14c   :  { %s6711_s29 = sld [smem:[#allocation62_spill]]  ;;  %p5530_p12 = scmp.lt.s32.totalorder %s5526_s16, %s5826_s19 }
 0x14e   :  { %547 = vmatpush.bf16.msra.mxu1 %v4682_v59 }
 0x152   :  { %548 = vmatpush.bf16.msra.mxu1 %v4681_v60 }
 0x1c2   :  { %v477_v10 = vpop.f32.mrf.mxu0 }
 0x1c3   :  { %v478_v11 = vadd.f32 %v4836_v9, %v477_v10 }
 0x1c5   :  { %v483_v12 = vsel %vm482_vm1, %v478_v11, -inf }
 0x1c6   :  { %484 = vmax.xlane.f32.xlu0 %v483_v12 }
 0x1c8   :  { %v584_v14 = vpop.f32.mrf.mxu2 }
 0x1c9   :  { %v585_v15 = vadd.f32 %v4837_v13, %v584_v14 }
 0x1ca   :  { %v479_v16 = vpop.f32.mrf.mxu0 }
 0x1cb   :  { %v591_v17 = vmul.f32 0.044715, %v585_v15  ;;  %v480_v18 = vadd.f32 %v4836_v9, %v479_v16  ;;  %v589_v34 = vmul.f32 0.5, %v585_v15 }
 0x1cd   :  { %v593_v19 = vmul.f32 %v591_v17, %v585_v15  ;;  %v486_v20 = vsel %vm482_vm1, %v480_v18, -inf  ;;  %v5620_v17 = vmov 0  }
 0x1ce   :  { %487 = vmax.xlane.f32.xlu0 %v486_v20  ;;  %4818 = vset.pattern.permute.xlu2 %v5620_v17 }
 0x1cf   :  { %v595_v21 = vmul.f32 %v593_v19, %v585_v15  ;;  %4820 = vset.pattern.permute.xlu1 %v5620_v17  ;;  %4819 = vset.pattern.permute.xlu0 %v5620_v17 }
 0x1d0   :  { %v586_v22 = vpop.f32.mrf.mxu2 }
 0x1d1   :  { %v587_v23 = vadd.f32 %v4837_v13, %v586_v22  ;;  %v597_v24 = vadd.f32 %v595_v21, %v585_v15 }
 0x1d3   :  { %v592_v25 = vmul.f32 0.044715, %v587_v23  ;;  %v599_v27 = vmul.f32 0.7978846, %v597_v24  ;;  %v590_v35 = vmul.f32 0.5, %v587_v23 }
 0x1d5   :  { %v594_v26 = vmul.f32 %v592_v25, %v587_v23  ;;  %4863 = vtanh.f32 %v599_v27  ;;  %v4692_v27 = vld [vmem:[%s6699_s13 + $0x8] sm:$0xff] }
 0x1d6   :  { %760 = vmatpush.bf16.msrb.mxu2 %v4692_v27 }
 0x1d7   :  { %v596_v28 = vmul.f32 %v594_v26, %v587_v23  ;;  %v4690_v26 = vld [vmem:[%s6698_s0 + $0x8] sm:$0xff] }
 0x1d8   :  { %726 = vmatpush.bf16.msrb.mxu0 %v4690_v26 }
 0x1d9   :  { %v598_v29 = vadd.f32 %v596_v28, %v587_v23  ;;  %v4694_v28 = vld [vmem:[%s6700_s14 + $0x8] sm:$0xff] }
 0x1da   :  { %794 = vmatpush.bf16.msrb.mxu3 %v4694_v28 }
 0x1db   :  { %v600_v30 = vmul.f32 0.7978846, %v598_v29  ;;  %v4864_v31 = vpop.eup %4863  ;;  %v4689_v29 = vld [vmem:[%s6698_s0] sm:$0xff] }
 0x1dc   :  { %v603_v32 = vadd.f32 1.0, %v4864_v31  ;;  %v4693_v31 = vld [vmem:[%s6700_s14] sm:$0xff]  ;;  %727 = vmatpush.bf16.msrb.mxu0 %v4689_v29 }
 0x1dd   :  { %4865 = vtanh.f32 %v600_v30  ;;  %v4691_v30 = vld [vmem:[%s6699_s13] sm:$0xff] }
 0x1de   :  { %v605_v37 = vmul.f32 %v603_v32, %v589_v34  ;;  %761 = vmatpush.bf16.msrb.mxu2 %v4691_v30  ;;  %795 = vmatpush.bf16.msrb.mxu3 %v4693_v31 }
 0x1e3   :  { %v4866_v33 = vpop.eup %4865 }
 0x1e4   :  { %v604_v36 = vadd.f32 1.0, %v4866_v33 }
 0x1e6   :  { %v606_v38 = vmul.f32 %v604_v36, %v590_v35 }
 0x1e8   :  { %v611_v39 = vpack.c.bf16 %v606_v38, %v605_v37 }
 0x1ea   :  { %4339 = vmatmul.msk.bf16.vlgmr.msra.gmra.mxu3 %vm464_vm0, %v611_v39 }
 0x239   :  { %v485_v40 = vpop.xlane.xlu0 %484 }
 0x23a   :  { %v489_v41 = vsub.f32 %v478_v11, %v485_v40 }
 0x23c   :  { %v491_v42 = vmul.f32 1.442695, %v489_v41 }
 0x23e   :  { %4867 = vpow2.f32 %v491_v42 }
 0x241   :  { %v488_v43 = vpop.xlane.xlu0 %487 }
 0x242   :  { %v490_v44 = vsub.f32 %v480_v18, %v488_v43 }
 0x244   :  { %v4868_v45 = vpop.eup %4867  ;;  %v493_v46 = vmul.f32 1.442695, %v490_v44 }
 0x245   :  { %v495_v47 = vsel %vm482_vm1, %v4868_v45, 0.0 }
 0x246   :  { %4869 = vpow2.f32 %v493_v46  ;;  %496 = vadd.xlane.f32.xlu1 %v495_v47 }
 0x24c   :  { %v4870_v48 = vpop.eup %4869 }
 0x24d   :  { %v498_v49 = vsel %vm482_vm1, %v4870_v48, 0.0 }
 0x24e   :  { %499 = vadd.xlane.f32.xlu1 %v498_v49 }
 0x26d   :  { %v640_v51 = vpop.f32.mrf.mxu3 }
 0x26e   :  { %v641_v52 = vadd.f32 %v4838_v50, %v640_v51 }
 0x270   :  { %v646_v53 = vsel %vm645_vm2, %v641_v52, -inf }
 0x271   :  { %647 = vmax.xlane.f32.xlu2 %v646_v53 }
 0x275   :  { %v642_v54 = vpop.f32.mrf.mxu3 }
 0x276   :  { %v643_v55 = vadd.f32 %v4838_v50, %v642_v54 }
 0x278   :  { %v649_v56 = vsel %vm645_vm2, %v643_v55, -inf }
 0x279   :  { %650 = vmax.xlane.f32.xlu2 %v649_v56 }
 0x2b9   :  { %v497_v61 = vpop.xlane.xlu1 %496 }
 0x2ba   :  { %4871 = vrcp.f32 %v497_v61 }
 0x2c0   :  { %v4872_v63 = vpop.eup %4871 }
 0x2c1   :  { %v500_v62 = vpop.xlane.xlu1 %499  ;;  %v503_v1 = vmul.f32 %v4872_v63, %v4868_v45 }
 0x2c2   :  { %4873 = vrcp.f32 %v500_v62 }
 0x2c8   :  { %v4874_v0 = vpop.eup %4873 }
 0x2c9   :  { %v504_v2 = vmul.f32 %v4874_v0, %v4870_v48  ;;  %v4840_v48 = vld [vmem:[%s6702_s20] ss:$0 sm:$0xff] }
 0x2cb   :  { %v513_v3 = vpack.c.bf16 %v504_v2, %v503_v1 }
 0x2cd   :  { %4321 = vmatmul.msk.bf16.vlgmr.msra.gmra.mxu1 %vm482_vm1, %v513_v3 }
 0x2e4   :  { %v648_v7 = vpop.xlane.xlu2 %647 }
 0x2e5   :  { %v652_v8 = vsub.f32 %v641_v52, %v648_v7 }
 0x2e7   :  { %v654_v9 = vmul.f32 1.442695, %v652_v8 }
 0x2e9   :  { %4875 = vpow2.f32 %v654_v9 }
 0x2ec   :  { %v651_v10 = vpop.xlane.xlu2 %650 }
 0x2ed   :  { %v653_v11 = vsub.f32 %v643_v55, %v651_v10 }
 0x2ef   :  { %v4876_v12 = vpop.eup %4875  ;;  %v656_v13 = vmul.f32 1.442695, %v653_v11 }
 0x2f0   :  { %v658_v14 = vsel %vm645_vm2, %v4876_v12, 0.0 }
 0x2f1   :  { %4877 = vpow2.f32 %v656_v13  ;;  %659 = vadd.xlane.f32.xlu0 %v658_v14 }
 0x2f7   :  { %v4878_v15 = vpop.eup %4877 }
 0x2f8   :  { %v661_v16 = vsel %vm645_vm2, %v4878_v15, 0.0 }
 0x2f9   :  { %662 = vadd.xlane.f32.xlu1 %v661_v16 }
 0x34a   :  { %v550_v32 = vpop.f32.mrf.mxu1 }
 0x352   :  { %v552_v37 = vpop.f32.mrf.mxu1 }
 0x364   :  { %v660_v18 = vpop.xlane.xlu0 %659 }
 0x365   :  { %4879 = vrcp.f32 %v660_v18 }
 0x36b   :  { %v4880_v19 = vpop.eup %4879 }
 0x36c   :  { %v663_v20 = vpop.xlane.xlu1 %662  ;;  %v666_v21 = vmul.f32 %v4880_v19, %v4876_v12 }
 0x36d   :  { %4881 = vrcp.f32 %v663_v20 }
 0x36e   :  { %670 = vperm.xlu2 %4818, %v666_v21   ;;  %v680_v22 = vsub.f32 1.0, %v666_v21 }
 0x370   :  { %684 = vperm.xlu1 %4820, %v680_v22  }
 0x373   :  { %v4882_v23 = vpop.eup %4881 }
 0x374   :  { %v667_v24 = vmul.f32 %v4882_v23, %v4878_v15 }
 0x376   :  { %675 = vperm.xlu0 %4819, %v667_v24   ;;  %v681_v25 = vsub.f32 1.0, %v667_v24 }
 0x378   :  { %689 = vperm.xlu2 %4818, %v681_v25  }
 0x3c8   :  { %v671_v33 = vpop.permute.xlu2 %670 }
 0x3c9   :  { %v678_v39 = vmul.f32 %v671_v33, %v550_v32 }
 0x3d2   :  { %v690_v35 = vpop.permute.xlu2 %689 }
 0x3d3   :  { %v693_v40 = vmul.f32 %v690_v35, %v5979_v5  ;;  %v4841_v5 = vld [vmem:[#allocation13] ss:$0 sm:$0xff] }
 0x3e2   :  { %v685_v34 = vpop.permute.xlu1 %684 }
 0x3e3   :  { %v692_v36 = vmul.f32 %v685_v34, %v5977_v4  ;;  %v4839_v4 = vld [vmem:[%s6701_s27] ss:$0 sm:$0xff] }
 0x3e5   :  { %v6016_v42 = vadd.f32 %v692_v36, %v678_v39 }
 0x3e8   :  { %v676_v38 = vpop.permute.xlu0 %675 }
 0x3e9   :  { %v679_v41 = vmul.f32 %v676_v38, %v552_v37 }
 0x3eb   :  { %v6018_v43 = vadd.f32 %v693_v40, %v679_v41 }
 0x3ed   :  { %v700_v44 = vpack.c.bf16 %v6018_v43, %v6016_v42 }
 0x3ef   :  { %4348 = vmatmul.msk.bf16.vlgmr.msrb.gmra.mxu0 %vm464_vm0, %v700_v44  ;;  %4357 = vmatmul.msk.bf16.vlgmr.msrb.gmra.mxu2 %vm464_vm0, %v700_v44 }
 0x3f0   :  { %4366 = vmatmul.msk.bf16.vlgmr.msrb.gmra.mxu3 %vm464_vm0, %v700_v44 }
 0x46c   :  { %v729_v45 = vpop.f32.mrf.mxu0 }
 0x46d   :  { %v730_v46 = vadd.f32 %v4839_v4, %v729_v45 }
 0x46f   :  { %v806_v47 = vpack.c.bf16 %v730_v46, %v730_v46 }
 0x471   :  { %v918_v49 = vunpack.c.l.b16 %v806_v47 }
 0x472   :  { %v763_v50 = vpop.f32.mrf.mxu2 }
 0x473   :  { %v6027_v51 = vpack.c.b16 %v918_v49, %v918_v49  ;;  %v764_v52 = vadd.f32 %v4840_v48, %v763_v50  ;;  %v797_v53 = vpop.f32.mrf.mxu3 }
 0x474   :  { %v798_v54 = vadd.f32 %v4841_v5, %v797_v53  ;;  %v731_v55 = vpop.f32.mrf.mxu0 }
 0x475   :  { %v808_v56 = vpack.c.bf16 %v764_v52, %v764_v52  ;;  %v732_v57 = vadd.f32 %v4839_v4, %v731_v55  ;;  %920 = vrot.lane.b32.xlu1 %v6027_v51, %s5621_s28 }
 0x476   :  { %v874_v58 = vpack.c.bf16 %v798_v54, %v798_v54 }
 0x477   :  { %v923_v59 = vunpack.c.l.b16 %v808_v56  ;;  %v807_v60 = vpack.c.bf16 %v732_v57, %v732_v57  ;;  %v815_v61 = vsel %vm810_vm3, %v808_v56, 0 }
 0x478   :  { %v881_v62 = vsel %vm879_vm4, %v874_v58, 0  ;;  %824 = vmatpush.bf16.xpose.msrb.mxu1 %v815_v61  ;;  %v1000_v26 = vunpack.c.l.b16 %v874_v58 }
 0x479   :  { %v6033_v63 = vpack.c.b16 %v923_v59, %v923_v59  ;;  %v947_v0 = vunpack.c.l.b16 %v807_v60  ;;  %890 = vmatpush.bf16.msra.mxu2 %v881_v62 }
 0x47a   :  { %v765_v1 = vpop.f32.mrf.mxu2  ;;  %v6054_v28 = vpack.c.b16 %v1000_v26, %v1000_v26 }
 0x47b   :  { %v6035_v2 = vpack.c.b16 %v947_v0, %v947_v0  ;;  %v766_v3 = vadd.f32 %v4840_v48, %v765_v1  ;;  %v799_v7 = vpop.f32.mrf.mxu3  ;;  %925 = vrot.lane.b32.xlu2 %v6033_v63, %s5621_s28 }
 0x47c   :  { %v800_v8 = vadd.f32 %v4841_v5, %v799_v7 }
 0x47d   :  { %v809_v9 = vpack.c.bf16 %v766_v3, %v766_v3  ;;  %949 = vrot.lane.b32.xlu1 %v6035_v2, %s5621_s28  ;;  %v802_v3 = vld [vmem:[%s6703_s11] sm:$0xff] }
 0x47e   :  { %v875_v10 = vpack.c.bf16 %v800_v8, %v800_v8  ;;  %v916_v7 = vpack.c.bf16 %v802_v3, %v802_v3 }
 0x47f   :  { %v952_v11 = vunpack.c.l.b16 %v809_v9  ;;  %4367 = vmatmul.msk.bf16.vlgmr.msrb.gmra.mxu1 %vm810_vm3, %v806_v47  ;;  %v834_v12 = vsel %vm810_vm3, %v809_v9, 0 }
 0x480   :  { %843 = vmatpush.bf16.xpose.msra.mxu0 %v834_v12  ;;  %v900_v13 = vsel %vm879_vm4, %v875_v10, 0  ;;  %v1024_v4 = vunpack.c.l.b16 %v875_v10  ;;  %v1049_v8 = vrot.slane %v916_v7, 2 }
 0x481   :  { %v6044_v14 = vpack.c.b16 %v952_v11, %v952_v11  ;;  %909 = vmatpush.bf16.msra.mxu3 %v900_v13 }
 0x482   :  { %v6065_v45 = vpack.c.b16 %v1024_v4, %v1024_v4  ;;  %v1055_v9 = vsel %vm1053_vm6, %v1049_v8, 0 }
 0x483   :  { %954 = vrot.lane.b32.xlu2 %v6044_v14, %s5621_s28 }
 0x487   :  { %4368 = vmatmul.msk.bf16.vlgmr.msra.gmra.mxu0 %vm810_vm3, %v807_v60 }
 0x4d5   :  { %v926_v15 = vpop.permute.xlu2 %925 }
 0x4d6   :  { %v931_v16 = vsel %vm810_vm3, %v926_v15, 0 }
 0x4d7   :  { %940 = vmatpush.bf16.xpose.msra.mxu1 %v931_v16 }
 0x4dd   :  { %v955_v18 = vpop.permute.xlu2 %954 }
 0x4de   :  { %v960_v19 = vsel %vm810_vm3, %v955_v18, 0 }
 0x4df   :  { %969 = vmatpush.bf16.xpose.msrb.mxu0 %v960_v19  ;;  %1064 = vmatpush.bf16.msrb.mxu1 %v1055_v9 }
 0x4e7   :  { %v921_v20 = vpop.permute.xlu1 %920 }
 0x4e8   :  { %4371 = vmatmul.msk.bf16.vlgmr.msra.gmra.mxu1 %vm810_vm3, %v921_v20 }
 0x4ef   :  { %v950_v21 = vpop.permute.xlu1 %949 }
 0x4f0   :  { %4372 = vmatmul.msk.bf16.vlgmr.msrb.gmra.mxu0 %vm810_vm3, %v950_v21 }
 0x4fc   :  { %v826_v22 = vpop.f32.mrf.mxu1 }
 0x4fd   :  { %v850_v23 = vsel %vm849_vm5, %v826_v22, -inf }
 0x4fe   :  { %851 = vmax.xlane.f32.xlu0 %v850_v23 }
 0x504   :  { %v828_v24 = vpop.f32.mrf.mxu1  ;;  %v845_v25 = vpop.f32.mrf.mxu0 }
 0x505   :  { %v853_v29 = vsel %vm849_vm5, %v845_v25, -inf }
 0x50c   :  { %v847_v27 = vpop.f32.mrf.mxu0 }
 0x512   :  { %1002 = vrot.lane.b32.xlu0 %v6054_v28, %s5621_s28 }
 0x53c   :  { %854 = vmax.xlane.f32.xlu0 %v853_v29 }
 0x565   :  { %v942_v30 = vpop.f32.mrf.mxu1 }
 0x566   :  { %v975_v31 = vsel %vm849_vm5, %v942_v30, -inf }
 0x567   :  { %976 = vmax.xlane.f32.xlu2 %v975_v31 }
 0x56d   :  { %v944_v32 = vpop.f32.mrf.mxu1  ;;  %v971_v33 = vpop.f32.mrf.mxu0 }
 0x56e   :  { %v978_v44 = vsel %vm849_vm5, %v971_v33, -inf }
 0x571   :  { %v852_v34 = vpop.xlane.xlu0 %851 }
 0x572   :  { %v856_v35 = vsub.f32 %v826_v22, %v852_v34 }
 0x574   :  { %v858_v36 = vmul.f32 1.442695, %v856_v35 }
 0x575   :  { %v973_v37 = vpop.f32.mrf.mxu0 }
 0x576   :  { %4883 = vpow2.f32 %v858_v36 }
 0x57c   :  { %v4884_v38 = vpop.eup %4883 }
 0x57d   :  { %v862_v39 = vsel %vm849_vm5, %v4884_v38, 0.0 }
 0x57e   :  { %863 = vadd.xlane.f32.xlu1 %v862_v39 }
 0x584   :  { %v1003_v40 = vpop.permute.xlu0 %1002 }
 0x585   :  { %v1008_v41 = vsel %vm879_vm4, %v1003_v40, 0 }
 0x586   :  { %1017 = vmatpush.bf16.msrb.mxu2 %v1008_v41 }
 0x597   :  { %1093 = vrot.lane.b32.xlu1 %v6033_v63, %s5622_s8 }
 0x5af   :  { %v855_v57 = vpop.xlane.xlu0 %854 }
 0x5b0   :  { %v857_v58 = vsub.f32 %v845_v25, %v855_v57 }
 0x5b2   :  { %v860_v59 = vmul.f32 1.442695, %v857_v58 }
 0x5c1   :  { %979 = vmax.xlane.f32.xlu1 %v978_v44 }
 0x5da   :  { %1026 = vrot.lane.b32.xlu1 %v6065_v45, %s5621_s28  ;;  %v977_v46 = vpop.xlane.xlu2 %976 }
 0x5db   :  { %v981_v47 = vsub.f32 %v942_v30, %v977_v46 }
 0x5dd   :  { %v983_v48 = vmul.f32 1.442695, %v981_v47  ;;  %v1075_v47 = vsel %vm1053_vm6, %v916_v7, 0 }
 0x5de   :  { %1084 = vmatpush.bf16.msra.mxu0 %v1075_v47 }
 0x5df   :  { %4885 = vpow2.f32 %v983_v48 }
 0x5e2   :  { %1227 = vrot.lane.b32.xlu1 %v6027_v51, %s5623_s25 }
 0x5e5   :  { %v4886_v5 = vpop.eup %4885 }
 0x5e6   :  { %v987_v49 = vsel %vm849_vm5, %v4886_v5, 0.0 }
 0x5e7   :  { %988 = vadd.xlane.f32.xlu2 %v987_v49 }
 0x5ea   :  { %1161 = vrot.lane.b32.xlu1 %v6054_v28, %s5622_s8 }
 0x5f1   :  { %v864_v50 = vpop.xlane.xlu1 %863 }
 0x5f2   :  { %4887 = vrcp.f32 %v864_v50  ;;  %1252 = vrot.lane.b32.xlu1 %v6044_v14, %s5623_s25 }
 0x5f3   :  { %4889 = vpow2.f32 %v860_v59 }
 0x5f8   :  { %v4888_v52 = vpop.eup %4887 }
 0x5f9   :  { %v870_v53 = vmul.f32 %v4888_v52, %v4884_v38  ;;  %v4890_v60 = vpop.eup %4889 }
 0x5fa   :  { %1250 = vrot.lane.b32.xlu1 %v6035_v2, %s5623_s25  ;;  %v865_v61 = vsel %vm849_vm5, %v4890_v60, 0.0 }
 0x5fb   :  { %v872_v54 = vpack.c.bf16 %v870_v53, %v870_v53 }
 0x5fd   :  { %4369 = vmatmul.msk.bf16.vlgmr.msra.gmra.mxu2 %vm849_vm5, %v872_v54 }
 0x5ff   :  { %1091 = vrot.lane.b32.xlu2 %v6027_v51, %s5622_s8 }
 0x609   :  { %v1094_v55 = vpop.permute.xlu1 %1093 }
 0x60a   :  { %v1099_v56 = vsel %vm810_vm3, %v1094_v55, 0 }
 0x60b   :  { %1108 = vmatpush.bf16.xpose.msra.mxu2 %v1099_v56 }
 0x628   :  { %866 = vadd.xlane.f32.xlu2 %v865_v61 }
 0x634   :  { %v980_v62 = vpop.xlane.xlu1 %979 }
 0x635   :  { %v982_v0 = vsub.f32 %v971_v33, %v980_v62 }
 0x637   :  { %v985_v1 = vmul.f32 1.442695, %v982_v0 }
 0x639   :  { %4891 = vpow2.f32 %v985_v1 }
 0x63f   :  { %v4892_v10 = vpop.eup %4891 }
 0x640   :  { %1114 = vrot.lane.b32.xlu2 %v6035_v2, %s5622_s8  ;;  %v990_v11 = vsel %vm849_vm5, %v4892_v10, 0.0 }
 0x641   :  { %991 = vadd.xlane.f32.xlu0 %v990_v11 }
 0x64c   :  { %v1027_v12 = vpop.permute.xlu1 %1026 }
 0x64d   :  { %v1032_v13 = vsel %vm879_vm4, %v1027_v12, 0 }
 0x64e   :  { %1041 = vmatpush.bf16.msrb.mxu3 %v1032_v13 }
 0x654   :  { %v1228_v15 = vpop.permute.xlu1 %1227 }
 0x655   :  { %1116 = vrot.lane.b32.xlu0 %v6044_v14, %s5622_s8 }
 0x65a   :  { %v989_v16 = vpop.xlane.xlu2 %988 }
 0x65b   :  { %4893 = vrcp.f32 %v989_v16 }
 0x65c   :  { %v1162_v18 = vpop.permute.xlu1 %1161 }
 0x65d   :  { %v1167_v19 = vsel %vm879_vm4, %v1162_v18, 0  ;;  %1229 = vrot.lane.b32.xlu0 %v6033_v63, %s5623_s25 }
 0x65e   :  { %1176 = vmatpush.bf16.msra.mxu1 %v1167_v19 }
 0x661   :  { %v4894_v20 = vpop.eup %4893 }
 0x662   :  { %v995_v21 = vmul.f32 %v4894_v20, %v4886_v5  ;;  %v1092_v23 = vpop.permute.xlu2 %1091 }
 0x664   :  { %v997_v22 = vpack.c.bf16 %v995_v21, %v995_v21  ;;  %v1253_v50 = vpop.permute.xlu1 %1252 }
 0x665   :  { %v1258_v54 = vsel %vm810_vm3, %v1253_v50, 0 }
 0x666   :  { %4373 = vmatmul.msk.bf16.vlgmr.msrb.gmra.mxu2 %vm849_vm5, %v997_v22 }
 0x66c   :  { %v1251_v8 = vpop.permute.xlu1 %1250 }
 0x676   :  { %4377 = vmatmul.msk.bf16.vlgmr.msra.gmra.mxu2 %vm810_vm3, %v1092_v23 }
 0x680   :  { %v892_v24 = vpop.f32.mrf.mxu2 }
 0x688   :  { %v894_v25 = vpop.f32.mrf.mxu2 }
 0x69b   :  { %v867_v26 = vpop.xlane.xlu2 %866 }
 0x69c   :  { %4895 = vrcp.f32 %v867_v26 }
 0x6a2   :  { %v4896_v27 = vpop.eup %4895 }
 0x6a3   :  { %v871_v29 = vmul.f32 %v4896_v27, %v4890_v60  ;;  %v1115_v37 = vpop.permute.xlu2 %1114 }
 0x6a5   :  { %v873_v30 = vpack.c.bf16 %v871_v29, %v871_v29 }
 0x6a7   :  { %4370 = vmatmul.msk.bf16.vlgmr.msra.gmra.mxu3 %vm849_vm5, %v873_v30 }
 0x6b4   :  { %v992_v31 = vpop.xlane.xlu0 %991 }
 0x6b5   :  { %4897 = vrcp.f32 %v992_v31 }
 0x6bb   :  { %v4898_v32 = vpop.eup %4897 }
 0x6bc   :  { %v996_v33 = vmul.f32 %v4898_v32, %v4892_v10 }
 0x6be   :  { %v998_v34 = vpack.c.bf16 %v996_v33, %v996_v33 }
 0x6c0   :  { %4374 = vmatmul.msk.bf16.vlgmr.msrb.gmra.mxu3 %vm849_vm5, %v998_v34 }
 0x6c7   :  { %v1117_v35 = vpop.permute.xlu0 %1116 }
 0x6c8   :  { %v1122_v36 = vsel %vm810_vm3, %v1117_v35, 0 }
 0x6c9   :  { %1131 = vmatpush.bf16.xpose.msra.mxu3 %v1122_v36 }
 0x6cf   :  { %v1230_v38 = vpop.permute.xlu0 %1229 }
 0x6d0   :  { %v1235_v39 = vsel %vm810_vm3, %v1230_v38, 0  ;;  %4378 = vmatmul.msk.bf16.vlgmr.msra.gmra.mxu3 %vm810_vm3, %v1115_v37 }
 0x6d1   :  { %1244 = vmatpush.bf16.xpose.msrb.mxu3 %v1235_v39 }
 0x6e0   :  { %4382 = vmatmul.msk.bf16.vlgmr.msrb.gmra.mxu3 %vm810_vm3, %v1228_v15 }
 0x6e9   :  { %v1019_v40 = vpop.f32.mrf.mxu2 }
 0x6f1   :  { %v1021_v41 = vpop.f32.mrf.mxu2 }
 0x6f9   :  { %v1110_v44 = vpop.f32.mrf.mxu2 }
 0x6fa   :  { %v1137_v4 = vsel %vm849_vm5, %v1110_v44, -inf }
 0x6fb   :  { %1138 = vmax.xlane.f32.xlu2 %v1137_v4 }
 0x701   :  { %v1112_v46 = vpop.f32.mrf.mxu2 }
 0x713   :  { %1366 = vrot.lane.b32.xlu2 %v6033_v63, %s5624_s21 }
 0x72a   :  { %v911_v48 = vpop.f32.mrf.mxu3 }
 0x72b   :  { %v915_v5 = vpack.c.bf16 %v911_v48, %v892_v24 }
 0x72d   :  { %4376 = vmatmul.msk.bf16.vlgmr.msra.gmra.mxu0 %vm810_vm3, %v915_v5 }
 0x732   :  { %v913_v49 = vpop.f32.mrf.mxu3 }
 0x743   :  { %v1043_v52 = vpop.f32.mrf.mxu3 }
 0x744   :  { %v1047_v53 = vpack.c.bf16 %v1043_v52, %v1019_v40 }
 0x746   :  { %4375 = vmatmul.msk.bf16.vlgmr.msrb.gmra.mxu1 %vm810_vm3, %v1047_v53 }
 0x747   :  { %1267 = vmatpush.bf16.xpose.msrb.mxu1 %v1258_v54 }
 0x74b   :  { %v1045_v55 = vpop.f32.mrf.mxu3 }
 0x74c   :  { %v803_v55 = vld [vmem:[%s6703_s11 + $0x8] sm:$0xff] }
 0x753   :  { %v1133_v56 = vpop.f32.mrf.mxu3 }
 0x754   :  { %v1140_v57 = vsel %vm849_vm5, %v1133_v56, -inf }
 0x755   :  { %1141 = vmax.xlane.f32.xlu1 %v1140_v57 }
 0x75b   :  { %v1135_v58 = vpop.f32.mrf.mxu3 }
 0x763   :  { %v1246_v59 = vpop.f32.mrf.mxu3 }
 0x764   :  { %v1273_v7 = vsel %vm849_vm5, %v1246_v59, -inf }
 0x76b   :  { %v1248_v60 = vpop.f32.mrf.mxu3 }
 0x76e   :  { %1182 = vrot.lane.b32.xlu1 %v6065_v45, %s5622_s8  ;;  %v1139_v61 = vpop.xlane.xlu2 %1138 }
 0x76f   :  { %v1143_v62 = vsub.f32 %v1110_v44, %v1139_v61 }
 0x771   :  { %v1145_v0 = vmul.f32 1.442695, %v1143_v62 }
 0x773   :  { %4899 = vpow2.f32 %v1145_v0 }
 0x776   :  { %v1367_v24 = vpop.permute.xlu2 %1366 }
 0x777   :  { %v1372_v26 = vsel %vm810_vm3, %v1367_v24, 0 }
 0x779   :  { %v4900_v1 = vpop.eup %4899 }
 0x77a   :  { %v1149_v3 = vsel %vm849_vm5, %v4900_v1, 0.0 }
 0x77b   :  { %1150 = vadd.xlane.f32.xlu0 %v1149_v3 }
 0x78f   :  { %1364 = vrot.lane.b32.xlu0 %v6027_v51, %s5624_s21 }
 0x7aa   :  { %v1086_v9 = vpop.f32.mrf.mxu0 }
 0x7b2   :  { %v6158_v0 = vpop.f32.mrf.mxu0 }
 0x7b9   :  { %1274 = vmax.xlane.f32.xlu0 %v1273_v7 }
 0x7c3   :  { %v1066_v10 = vpop.f32.mrf.mxu1 }
 0x7c4   :  { %v6116_v11 = vadd.f32 %v1086_v9, %v1066_v10 }
 0x7c8   :  { %v1142_v12 = vpop.xlane.xlu1 %1141 }
 0x7c9   :  { %v1144_v13 = vsub.f32 %v1133_v56, %v1142_v12  ;;  %v6147_v56 = vpack.c.bf16 %v803_v55, %v803_v55 }
 0x7cb   :  { %v1147_v15 = vmul.f32 1.442695, %v1144_v13  ;;  %v6138_v44 = vpop.f32.mrf.mxu1  ;;  %v1209_v57 = vsel %vm1053_vm6, %v6147_v56, 0 }
 0x7cc   :  { %1218 = vmatpush.bf16.msrb.mxu2 %v1209_v57 }
 0x7cd   :  { %4901 = vpow2.f32 %v1147_v15  ;;  %1297 = vrot.lane.b32.xlu0 %v6054_v28, %s5623_s25 }
 0x7d3   :  { %v4902_v16 = vpop.eup %4901 }
 0x7d4   :  { %v1152_v18 = vsel %vm849_vm5, %v4902_v16, 0.0 }
 0x7d5   :  { %1153 = vadd.xlane.f32.xlu2 %v1152_v18  ;;  %1387 = vrot.lane.b32.xlu0 %v6035_v2, %s5624_s21 }
 0x7dd   :  { %1502 = vrot.lane.b32.xlu0 %v6033_v63, %s5625_s30 }
 0x7e0   :  { %v1183_v19 = vpop.permute.xlu1 %1182 }
 0x7e1   :  { %v1188_v20 = vsel %vm879_vm4, %v1183_v19, 0 }
 0x7e2   :  { %1197 = vmatpush.bf16.msrb.mxu0 %v1188_v20 }
 0x7ed   :  { %1389 = vrot.lane.b32.xlu2 %v6044_v14, %s5624_s21 }
 0x7ee   :  { %v1151_v21 = vpop.xlane.xlu0 %1150 }
 0x7ef   :  { %4903 = vrcp.f32 %v1151_v21 }
 0x7f5   :  { %v4904_v22 = vpop.eup %4903 }
 0x7f6   :  { %v1157_v23 = vmul.f32 %v4904_v22, %v4900_v1 }
 0x7f8   :  { %v1159_v25 = vpack.c.bf16 %v1157_v23, %v1157_v23 }
 0x7fa   :  { %4379 = vmatmul.msk.bf16.vlgmr.msra.gmra.mxu1 %vm849_vm5, %v1159_v25 }
 0x7fb   :  { %1381 = vmatpush.bf16.xpose.msra.mxu1 %v1372_v26 }
 0x801   :  { %v1365_v27 = vpop.permute.xlu0 %1364 }
 0x80a   :  { %4383 = vmatmul.msk.bf16.vlgmr.msrb.gmra.mxu1 %vm810_vm3, %v1251_v8 }
 0x81a   :  { %4387 = vmatmul.msk.bf16.vlgmr.msra.gmra.mxu1 %vm810_vm3, %v1365_v27 }
 0x82c   :  { %v1275_v29 = vpop.xlane.xlu0 %1274 }
 0x82d   :  { %v1279_v30 = vsub.f32 %v1246_v59, %v1275_v29 }
 0x82f   :  { %v1281_v31 = vmul.f32 1.442695, %v1279_v30 }
 0x831   :  { %4905 = vpow2.f32 %v1281_v31 }
 0x837   :  { %v4906_v32 = vpop.eup %4905 }
 0x838   :  { %v1285_v33 = vsel %vm849_vm5, %v4906_v32, 0.0 }
 0x839   :  { %1286 = vadd.xlane.f32.xlu1 %v1285_v33 }
 0x83f   :  { %v1298_v34 = vpop.permute.xlu0 %1297 }
 0x840   :  { %v1303_v35 = vsel %vm879_vm4, %v1298_v34, 0 }
 0x841   :  { %1312 = vmatpush.bf16.msra.mxu0 %v1303_v35 }
 0x847   :  { %v1388_v53 = vpop.permute.xlu0 %1387 }
 0x848   :  { %v1154_v36 = vpop.xlane.xlu2 %1153 }
 0x849   :  { %4907 = vrcp.f32 %v1154_v36 }
 0x84f   :  { %v4908_v37 = vpop.eup %4907  ;;  %v1503_v60 = vpop.permute.xlu0 %1502 }
 0x850   :  { %v1158_v38 = vmul.f32 %v4908_v37, %v4902_v16  ;;  %v1390_v39 = vpop.permute.xlu2 %1389  ;;  %v1508_v62 = vsel %vm810_vm3, %v1503_v60, 0 }
 0x851   :  { %v1395_v41 = vsel %vm810_vm3, %v1390_v39, 0 }
 0x852   :  { %v1160_v40 = vpack.c.bf16 %v1158_v38, %v1158_v38  ;;  %1500 = vrot.lane.b32.xlu1 %v6027_v51, %s5625_s30 }
 0x854   :  { %4380 = vmatmul.msk.bf16.vlgmr.msrb.gmra.mxu0 %vm849_vm5, %v1160_v40  ;;  %v1341_v40 = vrot.slane %v6147_v56, 2 }
 0x855   :  { %1404 = vmatpush.bf16.xpose.msrb.mxu0 %v1395_v41 }
 0x856   :  { %v1346_v41 = vsel %vm1053_vm6, %v1341_v40, 0 }
 0x857   :  { %1355 = vmatpush.bf16.msra.mxu3 %v1346_v41  ;;  %v804_v41 = vld [vmem:[%s6703_s11 + $0x10] sm:$0xff] }
 0x877   :  { %v1178_v4 = vpop.f32.mrf.mxu1 }
 0x87f   :  { %v1180_v46 = vpop.f32.mrf.mxu1 }
 0x887   :  { %v1269_v47 = vpop.f32.mrf.mxu1 }
 0x888   :  { %v1276_v48 = vsel %vm849_vm5, %v1269_v47, -inf }
 0x889   :  { %1277 = vmax.xlane.f32.xlu2 %v1276_v48 }
 0x88f   :  { %v1271_v5 = vpop.f32.mrf.mxu1 }
 0x897   :  { %v1383_v49 = vpop.f32.mrf.mxu1 }
 0x898   :  { %v1410_v50 = vsel %vm849_vm5, %v1383_v49, -inf }
 0x899   :  { %1411 = vmax.xlane.f32.xlu0 %v1410_v50 }
 0x89f   :  { %v1385_v52 = vpop.f32.mrf.mxu1 }
 0x8a1   :  { %1318 = vrot.lane.b32.xlu2 %v6065_v45, %s5623_s25 }
 0x8a9   :  { %1525 = vrot.lane.b32.xlu2 %v6044_v14, %s5625_s30 }
 0x8ac   :  { %v1287_v54 = vpop.xlane.xlu1 %1286 }
 0x8ad   :  { %4909 = vrcp.f32 %v1287_v54 }
 0x8b1   :  { %1523 = vrot.lane.b32.xlu2 %v6035_v2, %s5625_s30 }
 0x8b3   :  { %v4910_v58 = vpop.eup %4909 }
 0x8b4   :  { %v1293_v59 = vmul.f32 %v4910_v58, %v4906_v32 }
 0x8b6   :  { %v1295_v61 = vpack.c.bf16 %v1293_v59, %v1293_v59 }
 0x8b8   :  { %4384 = vmatmul.msk.bf16.vlgmr.msra.gmra.mxu0 %vm849_vm5, %v1295_v61 }
 0x8b9   :  { %1517 = vmatpush.bf16.xpose.msra.mxu0 %v1508_v62  ;;  %1639 = vrot.lane.b32.xlu2 %v6033_v63, %s5626_s6 }
 0x8c4   :  { %v1501_v7 = vpop.permute.xlu1 %1500 }
 0x8c8   :  { %4388 = vmatmul.msk.bf16.vlgmr.msrb.gmra.mxu0 %vm810_vm3, %v1388_v53 }
 0x8d1   :  { %v1199_v1 = vpop.f32.mrf.mxu0 }
 0x8d2   :  { %v1203_v3 = vpack.c.bf16 %v1199_v1, %v1178_v4 }
 0x8d4   :  { %4381 = vmatmul.msk.bf16.vlgmr.msrb.gmra.mxu2 %vm810_vm3, %v1203_v3 }
 0x8d8   :  { %4392 = vmatmul.msk.bf16.vlgmr.msra.gmra.mxu0 %vm810_vm3, %v1501_v7 }
 0x8d9   :  { %v1201_v8 = vpop.f32.mrf.mxu0 }
 0x8fc   :  { %v1278_v9 = vpop.xlane.xlu2 %1277 }
 0x8fd   :  { %v1280_v10 = vsub.f32 %v1269_v47, %v1278_v9 }
 0x8ff   :  { %v1283_v12 = vmul.f32 1.442695, %v1280_v10 }
 0x901   :  { %4911 = vpow2.f32 %v1283_v12 }
 0x904   :  { %v1319_v13 = vpop.permute.xlu2 %1318 }
 0x905   :  { %v1324_v15 = vsel %vm879_vm4, %v1319_v13, 0 }
 0x906   :  { %1333 = vmatpush.bf16.msra.mxu2 %v1324_v15 }
 0x907   :  { %v4912_v16 = vpop.eup %4911 }
 0x908   :  { %v1288_v18 = vsel %vm849_vm5, %v4912_v16, 0.0 }
 0x909   :  { %1289 = vadd.xlane.f32.xlu1 %v1288_v18 }
 0x90c   :  { %v1412_v19 = vpop.xlane.xlu0 %1411  ;;  %v1526_v39 = vpop.permute.xlu2 %1525 }
 0x90d   :  { %v1416_v20 = vsub.f32 %v1383_v49, %v1412_v19  ;;  %v1531_v49 = vsel %vm810_vm3, %v1526_v39, 0 }
 0x90f   :  { %v1418_v21 = vmul.f32 1.442695, %v1416_v20 }
 0x911   :  { %4913 = vpow2.f32 %v1418_v21 }
 0x914   :  { %v1524_v46 = vpop.permute.xlu2 %1523 }
 0x917   :  { %v4914_v22 = vpop.eup %4913 }
 0x918   :  { %v1422_v23 = vsel %vm849_vm5, %v4914_v22, 0.0 }
 0x919   :  { %1423 = vadd.xlane.f32.xlu0 %v1422_v23 }
 0x91c   :  { %v1640_v50 = vpop.permute.xlu2 %1639 }
 0x91d   :  { %v1645_v53 = vsel %vm810_vm3, %v1640_v50, 0 }
 0x92d   :  { %1434 = vrot.lane.b32.xlu0 %v6054_v28, %s5624_s21 }
 0x935   :  { %v6167_v24 = vpop.f32.mrf.mxu0  ;;  %1637 = vrot.lane.b32.xlu0 %v6027_v51, %s5626_s6 }
 0x93d   :  { %v1316_v25 = vpop.f32.mrf.mxu0  ;;  %1455 = vrot.lane.b32.xlu0 %v6065_v45, %s5624_s21 }
 0x945   :  { %v1406_v26 = vpop.f32.mrf.mxu0  ;;  %1570 = vrot.lane.b32.xlu0 %v6054_v28, %s5625_s30 }
 0x946   :  { %v1413_v27 = vsel %vm849_vm5, %v1406_v26, -inf }
 0x947   :  { %1414 = vmax.xlane.f32.xlu1 %v1413_v27 }
 0x94d   :  { %v1408_v29 = vpop.f32.mrf.mxu0  ;;  %1660 = vrot.lane.b32.xlu0 %v6035_v2, %s5626_s6 }
 0x955   :  { %v1519_v30 = vpop.f32.mrf.mxu0 }
 0x956   :  { %v1546_v31 = vsel %vm849_vm5, %v1519_v30, -inf }
 0x957   :  { %v1220_v32 = vpop.f32.mrf.mxu2  ;;  %1547 = vmax.xlane.f32.xlu1 %v1546_v31 }
 0x958   :  { %v6180_v33 = vadd.f32 %v1220_v32, %v6116_v11 }
 0x95d   :  { %v1521_v34 = vpop.f32.mrf.mxu0 }
 0x95f   :  { %v6196_v9 = vpop.f32.mrf.mxu2 }
 0x97c   :  { %v1290_v35 = vpop.xlane.xlu1 %1289 }
 0x97d   :  { %4915 = vrcp.f32 %v1290_v35 }
 0x983   :  { %v4916_v36 = vpop.eup %4915 }
 0x984   :  { %v1294_v37 = vmul.f32 %v4916_v36, %v4912_v16 }
 0x986   :  { %v1296_v38 = vpack.c.bf16 %v1294_v37, %v1294_v37 }
 0x988   :  { %4385 = vmatmul.msk.bf16.vlgmr.msra.gmra.mxu2 %vm849_vm5, %v1296_v38 }
 0x98c   :  { %v1424_v4 = vpop.xlane.xlu0 %1423 }
 0x98d   :  { %4917 = vrcp.f32 %v1424_v4  ;;  %v1477_v4 = vpack.c.bf16 %v804_v41, %v804_v41 }
 0x993   :  { %v4918_v47 = vpop.eup %4917 }
 0x994   :  { %v1430_v11 = vmul.f32 %v4918_v47, %v4914_v22 }
 0x996   :  { %v1432_v52 = vpack.c.bf16 %v1430_v11, %v1430_v11 }
 0x99f   :  { %v1435_v48 = vpop.permute.xlu0 %1434 }
 0x9a0   :  { %v1440_v5 = vsel %vm879_vm4, %v1435_v48, 0 }
 0x9a1   :  { %1449 = vmatpush.bf16.msrb.mxu2 %v1440_v5 }
 0x9a4   :  { %4389 = vmatmul.msk.bf16.vlgmr.msrb.gmra.mxu2 %vm849_vm5, %v1432_v52 }
 0x9a5   :  { %1540 = vmatpush.bf16.xpose.msra.mxu2 %v1531_v49  ;;  %v1614_v49 = vrot.slane %v1477_v4, 2 }
 0x9a7   :  { %v1638_v54 = vpop.permute.xlu0 %1637 }
 0x9ad   :  { %1654 = vmatpush.bf16.xpose.msrb.mxu2 %v1645_v53  ;;  %v1619_v53 = vsel %vm1053_vm6, %v1614_v49, 0 }
 0x9ae   :  { %1628 = vmatpush.bf16.msrb.mxu0 %v1619_v53 }
 0x9af   :  { %v1456_v55 = vpop.permute.xlu0 %1455 }
 0x9b0   :  { %v1461_v56 = vsel %vm879_vm4, %v1456_v55, 0 }
 0x9b1   :  { %1470 = vmatpush.bf16.msrb.mxu3 %v1461_v56 }
 0x9b4   :  { %4393 = vmatmul.msk.bf16.vlgmr.msra.gmra.mxu2 %vm810_vm3, %v1524_v46  ;;  %v1482_v46 = vsel %vm1053_vm6, %v1477_v4, 0 }
 0x9b5   :  { %1491 = vmatpush.bf16.msrb.mxu1 %v1482_v46 }
 0x9b7   :  { %v1571_v10 = vpop.permute.xlu0 %1570 }
 0x9b8   :  { %v1576_v15 = vsel %vm879_vm4, %v1571_v10, 0 }
 0x9ba   :  { %v1415_v57 = vpop.xlane.xlu1 %1414 }
 0x9bb   :  { %v1417_v58 = vsub.f32 %v1406_v26, %v1415_v57 }
 0x9bd   :  { %v1420_v59 = vmul.f32 1.442695, %v1417_v58 }
 0x9bf   :  { %4919 = vpow2.f32 %v1420_v59  ;;  %v1661_v38 = vpop.permute.xlu0 %1660 }
 0x9c4   :  { %4397 = vmatmul.msk.bf16.vlgmr.msrb.gmra.mxu2 %vm810_vm3, %v1638_v54 }
 0x9c5   :  { %v4920_v60 = vpop.eup %4919 }
 0x9c6   :  { %v1425_v61 = vsel %vm849_vm5, %v4920_v60, 0.0 }
 0x9c7   :  { %1426 = vadd.xlane.f32.xlu2 %v1425_v61 }
 0x9ca   :  { %v1548_v62 = vpop.xlane.xlu1 %1547 }
 0x9cb   :  { %v1552_v1 = vsub.f32 %v1519_v30, %v1548_v62 }
 0x9cd   :  { %v1554_v3 = vmul.f32 1.442695, %v1552_v1 }
 0x9cf   :  { %4921 = vpow2.f32 %v1554_v3 }
 0x9d5   :  { %v4922_v7 = vpop.eup %4921 }
 0x9d6   :  { %v1558_v8 = vsel %vm849_vm5, %v4922_v7, 0.0 }
 0x9d7   :  { %1559 = vadd.xlane.f32.xlu1 %v1558_v8 }
 0x9f0   :  { %1662 = vrot.lane.b32.xlu1 %v6044_v14, %s5626_s6 }
 0xa0b   :  { %v1335_v12 = vpop.f32.mrf.mxu2 }
 0xa0c   :  { %v1339_v13 = vpack.c.bf16 %v1335_v12, %v6167_v24 }
 0xa0e   :  { %4386 = vmatmul.msk.bf16.vlgmr.msra.gmra.mxu3 %vm810_vm3, %v1339_v13 }
 0xa0f   :  { %1585 = vmatpush.bf16.msra.mxu3 %v1576_v15 }
 0xa13   :  { %v1337_v16 = vpop.f32.mrf.mxu2 }
 0xa27   :  { %v1451_v18 = vpop.f32.mrf.mxu2 }
 0xa2f   :  { %v1453_v19 = vpop.f32.mrf.mxu2 }
 0xa37   :  { %v1542_v20 = vpop.f32.mrf.mxu2 }
 0xa38   :  { %v1549_v21 = vsel %vm849_vm5, %v1542_v20, -inf }
 0xa39   :  { %1550 = vmax.xlane.f32.xlu0 %v1549_v21 }
 0xa3a   :  { %v1427_v22 = vpop.xlane.xlu2 %1426 }
 0xa3b   :  { %4923 = vrcp.f32 %v1427_v22 }
 0xa3f   :  { %v1544_v23 = vpop.f32.mrf.mxu2 }
 0xa41   :  { %v4924_v25 = vpop.eup %4923 }
 0xa42   :  { %v1431_v26 = vmul.f32 %v4924_v25, %v4920_v60 }
 0xa44   :  { %v1433_v27 = vpack.c.bf16 %v1431_v26, %v1431_v26 }
 0xa46   :  { %4390 = vmatmul.msk.bf16.vlgmr.msrb.gmra.mxu3 %vm849_vm5, %v1433_v27 }
 0xa47   :  { %v1656_v24 = vpop.f32.mrf.mxu2 }
 0xa48   :  { %v1683_v29 = vsel %vm849_vm5, %v1656_v24, -inf }
 0xa49   :  { %1684 = vmax.xlane.f32.xlu1 %v1683_v29 }
 0xa4a   :  { %v1560_v30 = vpop.xlane.xlu1 %1559 }
 0xa4b   :  { %4925 = vrcp.f32 %v1560_v30 }
 0xa4f   :  { %v1658_v31 = vpop.f32.mrf.mxu2 }
 0xa51   :  { %v4926_v32 = vpop.eup %4925 }
 0xa52   :  { %v1566_v34 = vmul.f32 %v4926_v32, %v4922_v7 }
 0xa54   :  { %v1568_v35 = vpack.c.bf16 %v1566_v34, %v1566_v34 }
 0xa56   :  { %4394 = vmatmul.msk.bf16.vlgmr.msra.gmra.mxu3 %vm849_vm5, %v1568_v35 }
 0xa62   :  { %v1663_v36 = vpop.permute.xlu1 %1662  ;;  %1798 = vrot.lane.b32.xlu1 %v6044_v14, %s5627_s7 }
 0xa63   :  { %v1668_v37 = vsel %vm810_vm3, %v1663_v36, 0 }
 0xa64   :  { %1677 = vmatpush.bf16.xpose.msrb.mxu3 %v1668_v37 }
 0xa6a   :  { %1728 = vrot.lane.b32.xlu1 %v6065_v45, %s5626_s6 }
 0xa6b   :  { %4398 = vmatmul.msk.bf16.vlgmr.msrb.gmra.mxu3 %vm810_vm3, %v1661_v38 }
 0xa91   :  { %v1357_v39 = vpop.f32.mrf.mxu3 }
 0xa92   :  { %v6212_v40 = vadd.f32 %v1357_v39, %v6180_v33 }
 0xa99   :  { %v6218_v54 = vpop.f32.mrf.mxu3 }
 0xaac   :  { %v1551_v47 = vpop.xlane.xlu0 %1550 }
 0xaad   :  { %v1553_v14 = vsub.f32 %v1542_v20, %v1551_v47 }
 0xaaf   :  { %v1556_v11 = vmul.f32 1.442695, %v1553_v14 }
 0xab1   :  { %4927 = vpow2.f32 %v1556_v11 }
 0xab7   :  { %v4928_v48 = vpop.eup %4927 }
 0xab8   :  { %v1561_v5 = vsel %vm849_vm5, %v4928_v48, 0.0 }
 0xab9   :  { %1562 = vadd.xlane.f32.xlu2 %v1561_v5 }
 0xabc   :  { %v1685_v50 = vpop.xlane.xlu1 %1684 }
 0xabd   :  { %v1689_v52 = vsub.f32 %v1656_v24, %v1685_v50 }
 0xabf   :  { %v1691_v33 = vmul.f32 1.442695, %v1689_v52 }
 0xac1   :  { %4929 = vpow2.f32 %v1691_v33 }
 0xac7   :  { %v4930_v55 = vpop.eup %4929 }
 0xac8   :  { %v1695_v56 = vsel %vm849_vm5, %v4930_v55, 0.0 }
 0xac9   :  { %1696 = vadd.xlane.f32.xlu0 %v1695_v56  ;;  %v1472_v57 = vpop.f32.mrf.mxu3 }
 0xaca   :  { %v1476_v58 = vpack.c.bf16 %v1472_v57, %v1451_v18 }
 0xacc   :  { %4391 = vmatmul.msk.bf16.vlgmr.msrb.gmra.mxu1 %vm810_vm3, %v1476_v58 }
 0xad1   :  { %v1474_v59 = vpop.f32.mrf.mxu3  ;;  %1591 = vrot.lane.b32.xlu2 %v6065_v45, %s5625_s30 }
 0xad4   :  { %v1799_v60 = vpop.permute.xlu1 %1798 }
 0xad5   :  { %v1804_v20 = vsel %vm810_vm3, %v1799_v60, 0 }
 0xad9   :  { %v1587_v61 = vpop.f32.mrf.mxu3  ;;  %1707 = vrot.lane.b32.xlu2 %v6054_v28, %s5626_s6 }
 0xadc   :  { %v1729_v62 = vpop.permute.xlu1 %1728 }
 0xadd   :  { %v1734_v1 = vsel %vm879_vm4, %v1729_v62, 0  ;;  %1775 = vrot.lane.b32.xlu0 %v6033_v63, %s5627_s7 }
 0xade   :  { %1743 = vmatpush.bf16.msra.mxu0 %v1734_v1 }
 0xae1   :  { %v1589_v3 = vpop.f32.mrf.mxu3  ;;  %1773 = vrot.lane.b32.xlu2 %v6027_v51, %s5627_s7 }
 0xae9   :  { %1796 = vrot.lane.b32.xlu2 %v6035_v2, %s5627_s7 }
 0xaee   :  { %v1679_v7 = vpop.f32.mrf.mxu3 }
 0xaef   :  { %v1686_v10 = vsel %vm849_vm5, %v1679_v7, -inf }
 0xaf6   :  { %v1681_v8 = vpop.f32.mrf.mxu3 }
 0xb07   :  { %1687 = vmax.xlane.f32.xlu0 %v1686_v10 }
 0xb2c   :  { %v1563_v12 = vpop.xlane.xlu2 %1562 }
 0xb2d   :  { %4931 = vrcp.f32 %v1563_v12 }
 0xb33   :  { %v4932_v13 = vpop.eup %4931 }
 0xb34   :  { %v1567_v15 = vmul.f32 %v4932_v13, %v4928_v48  ;;  %v1592_v16 = vpop.permute.xlu2 %1591 }
 0xb35   :  { %v1597_v63 = vsel %vm879_vm4, %v1592_v16, 0 }
 0xb36   :  { %v1569_v18 = vpack.c.bf16 %v1567_v15, %v1567_v15  ;;  %1606 = vmatpush.bf16.msra.mxu1 %v1597_v63 }
 0xb39   :  { %4395 = vmatmul.msk.bf16.vlgmr.msra.gmra.mxu1 %vm849_vm5, %v1569_v18 }
 0xb3c   :  { %v1708_v51 = vpop.permute.xlu2 %1707  ;;  %v1697_v19 = vpop.xlane.xlu0 %1696 }
 0xb3d   :  { %v1713_v2 = vsel %vm879_vm4, %v1708_v51, 0  ;;  %4933 = vrcp.f32 %v1697_v19 }
 0xb3e   :  { %1722 = vmatpush.bf16.msrb.mxu1 %v1713_v2 }
 0xb42   :  { %1813 = vmatpush.bf16.xpose.msra.mxu1 %v1804_v20 }
 0xb43   :  { %v4934_v21 = vpop.eup %4933 }
 0xb44   :  { %v1703_v22 = vmul.f32 %v4934_v21, %v4930_v55  ;;  %v1774_v27 = vpop.permute.xlu2 %1773 }
 0xb46   :  { %v1705_v23 = vpack.c.bf16 %v1703_v22, %v1703_v22 }
 0xb49   :  { %v1493_v25 = vpop.f32.mrf.mxu1  ;;  %4399 = vmatmul.msk.bf16.vlgmr.msrb.gmra.mxu1 %vm849_vm5, %v1705_v23 }
 0xb4a   :  { %v1498_v26 = vadd.f32 %v1493_v25, %v6212_v40 }
 0xb4c   :  { %v1797_v30 = vpop.permute.xlu2 %1796 }
 0xb4f   :  { %v1776_v24 = vpop.permute.xlu0 %1775 }
 0xb50   :  { %v1781_v29 = vsel %vm810_vm3, %v1776_v24, 0 }
 0xb51   :  { %1790 = vmatpush.bf16.xpose.msra.mxu3 %v1781_v29  ;;  %v6244_v37 = vpop.f32.mrf.mxu1 }
 0xb58   :  { %4402 = vmatmul.msk.bf16.vlgmr.msra.gmra.mxu3 %vm810_vm3, %v1774_v27 }
 0xb59   :  { %4403 = vmatmul.msk.bf16.vlgmr.msra.gmra.mxu1 %vm810_vm3, %v1797_v30 }
 0xb7a   :  { %v1688_v31 = vpop.xlane.xlu0 %1687 }
 0xb7b   :  { %v1690_v32 = vsub.f32 %v1679_v7, %v1688_v31  ;;  %v805_v7 = vld [vmem:[%s6703_s11 + $0x18] sm:$0xff] }
 0xb7c   :  { %v1750_v8 = vpack.c.bf16 %v805_v7, %v805_v7 }
 0xb7d   :  { %v1693_v34 = vmul.f32 1.442695, %v1690_v32 }
 0xb7e   :  { %v1755_v12 = vsel %vm1053_vm6, %v1750_v8, 0  ;;  %v1887_v29 = vrot.slane %v1750_v8, 2  ;;  %v4696_v8 = vld [vmem:[%s6704_s23 + $0x8] sm:$0xff] }
 0xb7f   :  { %4935 = vpow2.f32 %v1693_v34  ;;  %1764 = vmatpush.bf16.msra.mxu2 %v1755_v12  ;;  %2011 = vmatpush.bf16.msrb.mxu1 %v4696_v8 }
 0xb80   :  { %v1892_v30 = vsel %vm1053_vm6, %v1887_v29, 0  ;;  %v4843_v29 = vld [vmem:[#allocation19] ss:$0 sm:$0xff] }
 0xb81   :  { %1901 = vmatpush.bf16.msrb.mxu3 %v1892_v30 }
 0xb85   :  { %v4936_v35 = vpop.eup %4935 }
 0xb86   :  { %v1698_v36 = vsel %vm849_vm5, %v4936_v35, 0.0 }
 0xb87   :  { %1699 = vadd.xlane.f32.xlu2 %v1698_v36 }
 0xbb6   :  { %v1608_v38 = vpop.f32.mrf.mxu1 }
 0xbb7   :  { %v1612_v39 = vpack.c.bf16 %v1608_v38, %v1587_v61 }
 0xbb9   :  { %4396 = vmatmul.msk.bf16.vlgmr.msrb.gmra.mxu0 %vm810_vm3, %v1612_v39  ;;  %v1089_v39 = vadd.f32 %v6158_v0, %v6138_v44 }
 0xbbe   :  { %v1610_v40 = vpop.f32.mrf.mxu1 }
 0xbbf   :  { %v1226_v40 = vadd.f32 %v6196_v9, %v1089_v39 }
 0xbc6   :  { %v1724_v41 = vpop.f32.mrf.mxu1 }
 0xbce   :  { %v1726_v4 = vpop.f32.mrf.mxu1 }
 0xbd6   :  { %v1815_v46 = vpop.f32.mrf.mxu1 }
 0xbd7   :  { %v1822_v47 = vsel %vm849_vm5, %v1815_v46, -inf }
 0xbd8   :  { %1823 = vmax.xlane.f32.xlu1 %v1822_v47 }
 0xbdb   :  { %v1792_v14 = vpop.f32.mrf.mxu3 }
 0xbdc   :  { %v1819_v11 = vsel %vm849_vm5, %v1792_v14, -inf }
 0xbdd   :  { %1820 = vmax.xlane.f32.xlu0 %v1819_v11 }
 0xbde   :  { %v1817_v48 = vpop.f32.mrf.mxu1 }
 0xbe3   :  { %v1794_v5 = vpop.f32.mrf.mxu3 }
 0xbf1   :  { %1843 = vrot.lane.b32.xlu1 %v6054_v28, %s5627_s7 }
 0xbfa   :  { %v1700_v49 = vpop.xlane.xlu2 %1699 }
 0xbfb   :  { %4937 = vrcp.f32 %v1700_v49 }
 0xc01   :  { %v4938_v50 = vpop.eup %4937 }
 0xc02   :  { %v1704_v52 = vmul.f32 %v4938_v50, %v4936_v35 }
 0xc04   :  { %v1706_v53 = vpack.c.bf16 %v1704_v52, %v1704_v52 }
 0xc06   :  { %4400 = vmatmul.msk.bf16.vlgmr.msra.gmra.mxu0 %vm849_vm5, %v1706_v53 }
 0xc36   :  { %v1630_v33 = vpop.f32.mrf.mxu0 }
 0xc37   :  { %v1635_v55 = vadd.f32 %v1630_v33, %v1498_v26 }
 0xc3e   :  { %v1632_v15 = vpop.f32.mrf.mxu0 }
 0xc4b   :  { %v1824_v56 = vpop.xlane.xlu1 %1823 }
 0xc4c   :  { %v1826_v57 = vsub.f32 %v1815_v46, %v1824_v56  ;;  %v1363_v46 = vadd.f32 %v6218_v54, %v1226_v40  ;;  %v5628_v54 = vmov 32.0  }
 0xc4e   :  { %v1829_v58 = vmul.f32 1.442695, %v1826_v57 }
 0xc50   :  { %4939 = vpow2.f32 %v1829_v58  ;;  %v1821_v59 = vpop.xlane.xlu0 %1820 }
 0xc51   :  { %v1825_v60 = vsub.f32 %v1792_v14, %v1821_v59  ;;  %v1499_v14 = vadd.f32 %v6244_v37, %v1363_v46  ;;  %v4703_v46 = vld [vmem:[%s6705_s1 + $0x30] sm:$0xff] }
 0xc53   :  { %v1827_v61 = vmul.f32 1.442695, %v1825_v60  ;;  %v1636_v48 = vadd.f32 %v1632_v15, %v1499_v14  ;;  %v4695_v15 = vld [vmem:[%s6704_s23] sm:$0xff] }
 0xc54   :  { %2012 = vmatpush.bf16.msrb.mxu1 %v4695_v15  ;;  %v4701_v14 = vld [vmem:[%s6705_s1 + $0x20] sm:$0xff] }
 0xc55   :  { %4941 = vpow2.f32 %v1827_v61 }
 0xc56   :  { %v4940_v62 = vpop.eup %4939 }
 0xc57   :  { %v1834_v28 = vsel %vm849_vm5, %v4940_v62, 0.0 }
 0xc58   :  { %1835 = vadd.xlane.f32.xlu2 %v1834_v28 }
 0xc5b   :  { %v4942_v1 = vpop.eup %4941 }
 0xc5c   :  { %v1831_v3 = vsel %vm849_vm5, %v4942_v1, 0.0 }
 0xc5d   :  { %1832 = vadd.xlane.f32.xlu0 %v1831_v3 }
 0xc63   :  { %v1844_v10 = vpop.permute.xlu1 %1843 }
 0xc64   :  { %v1849_v13 = vsel %vm879_vm4, %v1844_v10, 0 }
 0xc65   :  { %1858 = vmatpush.bf16.msrb.mxu0 %v1849_v13 }
 0xc70   :  { %1864 = vrot.lane.b32.xlu2 %v6065_v45, %s5627_s7 }
 0xc83   :  { %v1745_v16 = vpop.f32.mrf.mxu0 }
 0xc84   :  { %v1749_v63 = vpack.c.bf16 %v1745_v16, %v1724_v41  ;;  %v4842_v41 = vld [vmem:[#allocation14] ss:$0 sm:$0xff] }
 0xc86   :  { %4401 = vmatmul.msk.bf16.vlgmr.msra.gmra.mxu2 %vm810_vm3, %v1749_v63 }
 0xc8b   :  { %v1747_v18 = vpop.f32.mrf.mxu0 }
 0xccb   :  { %v1836_v51 = vpop.xlane.xlu2 %1835 }
 0xccc   :  { %4943 = vrcp.f32 %v1836_v51 }
 0xcd0   :  { %v1833_v19 = vpop.xlane.xlu0 %1832 }
 0xcd1   :  { %4945 = vrcp.f32 %v1833_v19 }
 0xcd2   :  { %v4944_v2 = vpop.eup %4943  ;;  %4947 = vrcp.f32 %v5628_v54 }
 0xcd3   :  { %v1840_v20 = vmul.f32 %v4944_v2, %v4940_v62  ;;  %v1865_v21 = vpop.permute.xlu2 %1864 }
 0xcd4   :  { %v1870_v22 = vsel %vm879_vm4, %v1865_v21, 0 }
 0xcd5   :  { %v1842_v23 = vpack.c.bf16 %v1840_v20, %v1840_v20  ;;  %1879 = vmatpush.bf16.msrb.mxu2 %v1870_v22 }
 0xcd7   :  { %v4946_v25 = vpop.eup %4945 }
 0xcd8   :  { %v1839_v26 = vmul.f32 %v4946_v25, %v4942_v1  ;;  %4405 = vmatmul.msk.bf16.vlgmr.msrb.gmra.mxu2 %vm849_vm5, %v1842_v23  ;;  %v4948_v33 = vpop.eup %4947 }
 0xcd9   :  { %v1927_v37 = vmul.f32 32.0, %v4948_v33  ;;  %vm1931_vm7 = vweird.f32 %v4948_v33 }
 0xcda   :  { %v1841_v45 = vpack.c.bf16 %v1839_v26, %v1839_v26 }
 0xcdc   :  { %4404 = vmatmul.msk.bf16.vlgmr.msrb.gmra.mxu0 %vm849_vm5, %v1841_v45 }
 0xd09   :  { %v1766_v27 = vpop.f32.mrf.mxu2 }
 0xd0a   :  { %v1771_v24 = vadd.f32 %v1766_v27, %v1635_v55  ;;  %v1928_v55 = vsub.f32 1.0, %v1927_v37 }
 0xd0c   :  { %v1929_v56 = vmul.f32 %v4948_v33, %v1928_v55 }
 0xd11   :  { %v1768_v31 = vpop.f32.mrf.mxu2 }
 0xd12   :  { %v1772_v49 = vadd.f32 %v1768_v31, %v1636_v48  ;;  %v4699_v48 = vld [vmem:[%s6705_s1 + $0x10] sm:$0xff] }
 0xd59   :  { %v1860_v32 = vpop.f32.mrf.mxu0 }
 0xd5b   :  { %v1881_v34 = vpop.f32.mrf.mxu2 }
 0xd5c   :  { %v1885_v35 = vpack.c.bf16 %v1881_v34, %v1860_v32  ;;  %v4844_v34 = vld [vmem:[#allocation20] ss:$0 sm:$0xff] }
 0xd5e   :  { %4406 = vmatmul.msk.bf16.vlgmr.msrb.gmra.mxu3 %vm810_vm3, %v1885_v35 }
 0xd61   :  { %v1862_v36 = vpop.f32.mrf.mxu0 }
 0xd63   :  { %v1883_v38 = vpop.f32.mrf.mxu2 }
 0xde1   :  { %v1903_v4 = vpop.f32.mrf.mxu3 }
 0xde2   :  { %v1908_v47 = vadd.f32 %v1903_v4, %v1771_v24  ;;  %v4704_v4 = vld [vmem:[%s6705_s1 + $0x38] sm:$0xff] }
 0xde3   :  { %2106 = vmatpush.bf16.msra.mxu0 %v4704_v4 }
 0xde4   :  { %v1914_v11 = vadd.f32 %v4842_v41, %v1908_v47  ;;  %v4702_v47 = vld [vmem:[%s6705_s1 + $0x28] sm:$0xff] }
 0xde6   :  { %v1916_v5 = vadd.f32 %v1914_v11, %v6016_v42  ;;  %v1930_v42 = vadd.f32 %v4948_v33, %v1929_v56  ;;  %v4700_v11 = vld [vmem:[%s6705_s1 + $0x18] sm:$0xff] }
 0xde7   :  { %2107 = vmatpush.bf16.msra.mxu0 %v4703_v46 }
 0xde8   :  { %v1920_v50 = vsel %vm464_vm0, %v1916_v5, 0.0  ;;  %v6274_v57 = vsel %vm1931_vm7, %v4948_v33, %v1930_v42 }
 0xde9   :  { %1921 = vadd.xlane.f32.xlu0 %v1920_v50  ;;  %v1905_v52 = vpop.f32.mrf.mxu3  ;;  %v4845_v50 = vld [vmem:[#allocation16] ss:$0 sm:$0xff] }
 0xdea   :  { %v1909_v53 = vadd.f32 %v1905_v52, %v1772_v49  ;;  %v4697_v49 = vld [vmem:[%s6705_s1] sm:$0xff] }
 0xdeb   :  { %2108 = vmatpush.bf16.msra.mxu0 %v4702_v47 }
 0xdec   :  { %v1915_v44 = vadd.f32 %v4842_v41, %v1909_v53 }
 0xdee   :  { %v1917_v0 = vadd.f32 %v1915_v44, %v6018_v43 }
 0xdef   :  { %2109 = vmatpush.bf16.msra.mxu0 %v4701_v14 }
 0xdf0   :  { %v1923_v9 = vsel %vm464_vm0, %v1917_v0, 0.0 }
 0xdf1   :  { %1924 = vadd.xlane.f32.xlu0 %v1923_v9 }
 0xdf3   :  { %2110 = vmatpush.bf16.msra.mxu0 %v4700_v11 }
 0xdf7   :  { %2111 = vmatpush.bf16.msra.mxu0 %v4699_v48 }
 0xe5c   :  { %v1922_v58 = vpop.xlane.xlu0 %1921 }
 0xe5d   :  { %v1933_v59 = vmul.f32 %v6274_v57, %v1922_v58 }
 0xe5f   :  { %v1935_v60 = vsub.f32 %v1916_v5, %v1933_v59  ;;  %v4698_v5 = vld [vmem:[%s6705_s1 + $0x8] sm:$0xff] }
 0xe60   :  { %2112 = vmatpush.bf16.msra.mxu0 %v4698_v5 }
 0xe61   :  { %v1937_v43 = vmul.f32 %v1935_v60, %v1935_v60 }
 0xe63   :  { %v1939_v61 = vsel %vm464_vm0, %v1937_v43, 0.0 }
 0xe64   :  { %1940 = vadd.xlane.f32.xlu0 %v1939_v61  ;;  %v1925_v62 = vpop.xlane.xlu0 %1924  ;;  %2113 = vmatpush.bf16.msra.mxu0 %v4697_v49 }
 0xe65   :  { %v1934_v28 = vmul.f32 %v6274_v57, %v1925_v62 }
 0xe67   :  { %v1936_v1 = vsub.f32 %v1917_v0, %v1934_v28 }
 0xe69   :  { %v1938_v3 = vmul.f32 %v1936_v1, %v1936_v1 }
 0xe6b   :  { %v1942_v7 = vsel %vm464_vm0, %v1938_v3, 0.0 }
 0xe6c   :  { %1943 = vadd.xlane.f32.xlu2 %v1942_v7 }
 0xed7   :  { %v1941_v10 = vpop.xlane.xlu0 %1940 }
 0xed8   :  { %v1945_v12 = vmul.f32 %v1941_v10, %v6274_v57 }
 0xeda   :  { %v1947_v13 = vadd.f32 1e-05, %v1945_v12  ;;  %v4846_v12 = vld [vmem:[#allocation17] ss:$0 sm:$0xff] }
 0xedc   :  { %4949 = vrsqrt.f32 %v1947_v13  ;;  %vm1955_vm9 = vweird.f32 %v1947_v13 }
 0xedf   :  { %v1944_v16 = vpop.xlane.xlu2 %1943 }
 0xee0   :  { %v1946_v63 = vmul.f32 %v1944_v16, %v6274_v57 }
 0xee2   :  { %v4950_v18 = vpop.eup %4949  ;;  %v1948_v51 = vadd.f32 1e-05, %v1946_v63 }
 0xee3   :  { %v1950_v19 = vmul.f32 %v4950_v18, %v1947_v13  ;;  %vm1956_vm8 = vweird.f32 %v4950_v18 }
 0xee4   :  { %4951 = vrsqrt.f32 %v1948_v51  ;;  %vm1957_vm10 = vmor %vm1955_vm9, %vm1956_vm8  ;;  %vm1965_vm12 = vweird.f32 %v1948_v51 }
 0xee5   :  { %v1951_v2 = vmul.f32 %v4950_v18, %v1950_v19 }
 0xee7   :  { %v1952_v20 = vmul.f32 0.5, %v1951_v2 }
 0xee9   :  { %v1953_v21 = vsub.f32 1.5, %v1952_v20 }
 0xeea   :  { %v4952_v22 = vpop.eup %4951 }
 0xeeb   :  { %v1954_v23 = vmul.f32 %v4950_v18, %v1953_v21  ;;  %v1960_v25 = vmul.f32 %v4952_v22, %v1948_v51  ;;  %vm1966_vm11 = vweird.f32 %v4952_v22 }
 0xeec   :  { %vm1967_vm13 = vmor %vm1965_vm12, %vm1966_vm11 }
 0xeed   :  { %v1961_v26 = vmul.f32 %v4952_v22, %v1960_v25  ;;  %v1958_v45 = vsel %vm1957_vm10, %v4950_v18, %v1954_v23 }
 0xeee   :  { %v1969_v30 = vmul.f32 %v1958_v45, %v1935_v60 }
 0xeef   :  { %v1962_v27 = vmul.f32 0.5, %v1961_v26 }
 0xef0   :  { %v1974_v35 = vmul.f32 %v4843_v29, %v1969_v30  ;;  %v4706_v30 = vld [vmem:[%s6698_s0 + $0x18] sm:$0xff] }
 0xef1   :  { %v1963_v24 = vsub.f32 1.5, %v1962_v27  ;;  %2210 = vmatpush.bf16.msra.mxu2 %v4706_v30 }
 0xef2   :  { %v1979_v39 = vadd.f32 %v4844_v34, %v1974_v35 }
 0xef3   :  { %v1964_v31 = vmul.f32 %v4952_v22, %v1963_v24 }
 0xef5   :  { %v1968_v32 = vsel %vm1967_vm13, %v4952_v22, %v1964_v31  ;;  %v4708_v31 = vld [vmem:[%s6699_s13 + $0x18] sm:$0xff] }
 0xef6   :  { %v1970_v36 = vmul.f32 %v1968_v32, %v1936_v1  ;;  %v4710_v32 = vld [vmem:[%s6700_s14 + $0x18] sm:$0xff]  ;;  %2246 = vmatpush.bf16.msra.mxu3 %v4708_v31 }
 0xef7   :  { %2282 = vmatpush.bf16.msra.mxu1 %v4710_v32 }
 0xef8   :  { %v1975_v38 = vmul.f32 %v4843_v29, %v1970_v36 }
 0xefa   :  { %v1980_v40 = vadd.f32 %v4844_v34, %v1975_v38  ;;  %v4705_v38 = vld [vmem:[%s6698_s0 + $0x10] sm:$0xff]  ;;  %s5529_s0 = scalar_lea.hbm %s5826_s19, 16 }
 0xefb   :  { %2211 = vmatpush.bf16.msra.mxu2 %v4705_v38 }
 0xefc   :  { %v1985_v41 = vpack.c.bf16 %v1980_v40, %v1979_v39 }
 0xefe   :  { %4415 = vmatmul.msk.bf16.vlgmr.msrb.gmra.mxu1 %vm464_vm0, %v1985_v41 }
 0xf7b   :  { %v2014_v52 = vpop.f32.mrf.mxu1 }
 0xf7c   :  { %v2015_v53 = vadd.f32 %v4845_v50, %v2014_v52 }
 0xf7e   :  { %v2021_v44 = vmul.f32 0.044715, %v2015_v53  ;;  %v2019_v28 = vmul.f32 0.5, %v2015_v53 }
 0xf80   :  { %v2023_v0 = vmul.f32 %v2021_v44, %v2015_v53 }
 0xf82   :  { %v2025_v9 = vmul.f32 %v2023_v0, %v2015_v53 }
 0xf83   :  { %v2016_v54 = vpop.f32.mrf.mxu1 }
 0xf84   :  { %v2027_v33 = vadd.f32 %v2025_v9, %v2015_v53  ;;  %v2017_v37 = vadd.f32 %v4845_v50, %v2016_v54  ;;  %v4847_v54 = vld [vmem:[#allocation22] ss:$0 sm:$0xff] }
 0xf86   :  { %v2022_v55 = vmul.f32 0.044715, %v2017_v37  ;;  %v2029_v56 = vmul.f32 0.7978846, %v2027_v33  ;;  %v2020_v1 = vmul.f32 0.5, %v2017_v37 }
 0xf88   :  { %v2024_v42 = vmul.f32 %v2022_v55, %v2017_v37  ;;  %4953 = vtanh.f32 %v2029_v56  ;;  %v4848_v56 = vld [vmem:[#allocation23] ss:$0 sm:$0xff] }
 0xf8a   :  { %v2026_v58 = vmul.f32 %v2024_v42, %v2017_v37 }
 0xf8c   :  { %v2028_v59 = vadd.f32 %v2026_v58, %v2017_v37 }
 0xf8e   :  { %v2030_v60 = vmul.f32 0.7978846, %v2028_v59  ;;  %v4954_v43 = vpop.eup %4953 }
 0xf8f   :  { %v2033_v61 = vadd.f32 1.0, %v4954_v43 }
 0xf90   :  { %4955 = vtanh.f32 %v2030_v60 }
 0xf91   :  { %v2035_v7 = vmul.f32 %v2033_v61, %v2019_v28 }
 0xf96   :  { %v4956_v62 = vpop.eup %4955 }
 0xf97   :  { %v2034_v3 = vadd.f32 1.0, %v4956_v62  ;;  %v4849_v62 = vld [vmem:[#allocation13 + $0x1] ss:$0 sm:$0xff] }
 0xf99   :  { %v2036_v8 = vmul.f32 %v2034_v3, %v2020_v1  ;;  %v4850_v3 = vld [vmem:[%s6701_s27 + $0x1] ss:$0 sm:$0xff] }
 0xf9b   :  { %v2053_v10 = vpack.c.bf16 %v2036_v8, %v2035_v7  ;;  %v4851_v7 = vld [vmem:[%s6702_s20 + $0x1] ss:$0 sm:$0xff] }
 0xf9d   :  { %2114 = vmatmul.bf16.vlgmr.msra.gmra.mxu0 %v2053_v10 }
0x101a   :  { %v2115_v13 = vpop.f32.mrf.mxu0 }
0x101b   :  { %v2116_v15 = vadd.f32 %v4846_v12, %v2115_v13 }
0x101d   :  { %v2120_v16 = vadd.f32 %v2116_v15, %v1979_v39  ;;  %v4707_v39 = vld [vmem:[%s6699_s13 + $0x10] sm:$0xff] }
0x101e   :  { %2247 = vmatpush.bf16.msra.mxu3 %v4707_v39 }
0x101f   :  { %v2124_v63 = vsel %vm464_vm0, %v2120_v16, 0.0 }
0x1020   :  { %2125 = vadd.xlane.f32.xlu0 %v2124_v63 }
0x1022   :  { %v2117_v18 = vpop.f32.mrf.mxu0 }
0x1023   :  { %v2118_v51 = vadd.f32 %v4846_v12, %v2117_v18 }
0x1025   :  { %v2121_v19 = vadd.f32 %v2118_v51, %v1980_v40  ;;  %v4709_v40 = vld [vmem:[%s6700_s14 + $0x10] sm:$0xff] }
0x1026   :  { %2283 = vmatpush.bf16.msra.mxu1 %v4709_v40 }
0x1027   :  { %v2127_v2 = vsel %vm464_vm0, %v2121_v19, 0.0 }
0x1028   :  { %2128 = vadd.xlane.f32.xlu1 %v2127_v2 }
0x1093   :  { %v2126_v20 = vpop.xlane.xlu0 %2125 }
0x1094   :  { %v2130_v21 = vmul.f32 %v2126_v20, %v6274_v57 }
0x1096   :  { %v2132_v22 = vsub.f32 %v2120_v16, %v2130_v21 }
0x1098   :  { %v2134_v23 = vmul.f32 %v2132_v22, %v2132_v22 }
0x109a   :  { %v2136_v25 = vsel %vm464_vm0, %v2134_v23, 0.0 }
0x109b   :  { %v2129_v26 = vpop.xlane.xlu1 %2128  ;;  %2137 = vadd.xlane.f32.xlu0 %v2136_v25 }
0x109c   :  { %v2131_v45 = vmul.f32 %v2129_v26, %v6274_v57 }
0x109e   :  { %v2133_v27 = vsub.f32 %v2121_v19, %v2131_v45 }
0x10a0   :  { %v2135_v24 = vmul.f32 %v2133_v27, %v2133_v27 }
0x10a2   :  { %v2139_v29 = vsel %vm464_vm0, %v2135_v24, 0.0 }
0x10a3   :  { %2140 = vadd.xlane.f32.xlu0 %v2139_v29 }
0x110e   :  { %v2138_v34 = vpop.xlane.xlu0 %2137 }
0x110f   :  { %v2142_v35 = vmul.f32 %v2138_v34, %v6274_v57 }
0x1111   :  { %v2144_v36 = vadd.f32 1e-05, %v2142_v35 }
0x1113   :  { %4957 = vrsqrt.f32 %v2144_v36  ;;  %vm2152_vm15 = vweird.f32 %v2144_v36 }
0x1116   :  { %v2141_v41 = vpop.xlane.xlu0 %2140 }
0x1117   :  { %v2143_v4 = vmul.f32 %v2141_v41, %v6274_v57 }
0x1119   :  { %v4958_v46 = vpop.eup %4957  ;;  %v2145_v47 = vadd.f32 1e-05, %v2143_v4 }
0x111a   :  { %v2147_v14 = vmul.f32 %v4958_v46, %v2144_v36  ;;  %vm2153_vm14 = vweird.f32 %v4958_v46 }
0x111b   :  { %4959 = vrsqrt.f32 %v2145_v47  ;;  %vm2154_vm1 = vmor %vm2152_vm15, %vm2153_vm14  ;;  %vm2162_vm7 = vweird.f32 %v2145_v47 }
0x111c   :  { %v2148_v11 = vmul.f32 %v4958_v46, %v2147_v14 }
0x111e   :  { %v2149_v48 = vmul.f32 0.5, %v2148_v11 }
0x1120   :  { %v2150_v5 = vsub.f32 1.5, %v2149_v48 }
0x1121   :  { %v4960_v49 = vpop.eup %4959 }
0x1122   :  { %v2151_v50 = vmul.f32 %v4958_v46, %v2150_v5  ;;  %v2157_v52 = vmul.f32 %v4960_v49, %v2145_v47  ;;  %vm2163_vm2 = vweird.f32 %v4960_v49 }
0x1123   :  { %vm2164_vm8 = vmor %vm2162_vm7, %vm2163_vm2 }
0x1124   :  { %v2158_v53 = vmul.f32 %v4960_v49, %v2157_v52  ;;  %v2155_v44 = vsel %vm2154_vm1, %v4958_v46, %v2151_v50 }
0x1125   :  { %v2166_v33 = vmul.f32 %v2155_v44, %v2132_v22 }
0x1126   :  { %v2159_v0 = vmul.f32 0.5, %v2158_v53 }
0x1127   :  { %v2171_v42 = vmul.f32 %v4847_v54, %v2166_v33 }
0x1128   :  { %v2160_v9 = vsub.f32 1.5, %v2159_v0 }
0x1129   :  { %v6307_v60 = vadd.f32 %v4848_v56, %v2171_v42 }
0x112a   :  { %v2161_v37 = vmul.f32 %v4960_v49, %v2160_v9 }
0x112c   :  { %v2165_v55 = vsel %vm2164_vm8, %v4960_v49, %v2161_v37  ;;  %vm3703_vm8 = vcmask 56320  }
0x112d   :  { %v2167_v58 = vmul.f32 %v2165_v55, %v2133_v27 }
0x112f   :  { %v2172_v59 = vmul.f32 %v4847_v54, %v2167_v58 }
0x1131   :  { %v6309_v43 = vadd.f32 %v4848_v56, %v2172_v59 }
0x1133   :  { %v2183_v61 = vpack.c.bf16 %v6309_v43, %v6307_v60 }
0x1135   :  { %4461 = vmatmul.msk.bf16.vlgmr.msra.gmra.mxu2 %vm464_vm0, %v2183_v61  ;;  %4475 = vmatmul.msk.bf16.vlgmr.msra.gmra.mxu3 %vm464_vm0, %v2183_v61 }
0x1136   :  { %4488 = vmatmul.msk.bf16.vlgmr.msra.gmra.mxu1 %vm464_vm0, %v2183_v61 }
0x11b3   :  { %v2285_v28 = vpop.f32.mrf.mxu1 }
0x11b4   :  { %v2286_v1 = vadd.f32 %v4849_v62, %v2285_v28 }
0x11b6   :  { %v6318_v8 = vpack.c.bf16 %v2286_v1, %v2286_v1 }
0x11b8   :  { %v2367_v10 = vsel %vm879_vm4, %v6318_v8, 0  ;;  %v2213_v12 = vpop.f32.mrf.mxu2  ;;  %v2249_v13 = vpop.f32.mrf.mxu3  ;;  %v2486_v56 = vunpack.c.l.b16 %v6318_v8 }
0x11b9   :  { %v2214_v15 = vadd.f32 %v4850_v3, %v2213_v12  ;;  %v2250_v16 = vadd.f32 %v4851_v7, %v2249_v13  ;;  %2376 = vmatpush.bf16.msrb.mxu1 %v2367_v10 }
0x11ba   :  { %v6353_v42 = vpack.c.b16 %v2486_v56, %v2486_v56 }
0x11bb   :  { %v2295_v63 = vpack.c.bf16 %v2214_v15, %v2214_v15  ;;  %v2297_v18 = vpack.c.bf16 %v2250_v16, %v2250_v16  ;;  %v2287_v51 = vpop.f32.mrf.mxu1 }
0x11bc   :  { %v2288_v19 = vadd.f32 %v4849_v62, %v2287_v51 }
0x11bd   :  { %v2404_v2 = vunpack.c.l.b16 %v2295_v63  ;;  %v2303_v20 = vsel %vm810_vm3, %v2297_v18, 0  ;;  %v2409_v21 = vunpack.c.l.b16 %v2297_v18 }
0x11be   :  { %v2362_v22 = vpack.c.bf16 %v2288_v19, %v2288_v19  ;;  %2312 = vmatpush.bf16.xpose.msrb.mxu2 %v2303_v20 }
0x11bf   :  { %v6323_v23 = vpack.c.b16 %v2404_v2, %v2404_v2  ;;  %v6325_v25 = vpack.c.b16 %v2409_v21, %v2409_v21 }
0x11c0   :  { %v2215_v26 = vpop.f32.mrf.mxu2  ;;  %v2251_v45 = vpop.f32.mrf.mxu3  ;;  %v2386_v27 = vsel %vm879_vm4, %v2362_v22, 0  ;;  %v2510_v59 = vunpack.c.l.b16 %v2362_v22 }
0x11c1   :  { %v2216_v24 = vadd.f32 %v4850_v3, %v2215_v26  ;;  %v2252_v29 = vadd.f32 %v4851_v7, %v2251_v45  ;;  %2395 = vmatpush.bf16.msrb.mxu0 %v2386_v27  ;;  %2411 = vrot.lane.b32.xlu0 %v6325_v25, %s5621_s28 }
0x11c2   :  { %2406 = vrot.lane.b32.xlu2 %v6323_v23, %s5621_s28  ;;  %v6360_v61 = vpack.c.b16 %v2510_v59, %v2510_v59 }
0x11c3   :  { %v2296_v30 = vpack.c.bf16 %v2216_v24, %v2216_v24  ;;  %v2298_v31 = vpack.c.bf16 %v2252_v29, %v2252_v29 }
0x11c5   :  { %v2433_v32 = vunpack.c.l.b16 %v2296_v30  ;;  %v2438_v34 = vunpack.c.l.b16 %v2298_v31  ;;  %4493 = vmatmul.msk.bf16.vlgmr.msrb.gmra.mxu2 %vm810_vm3, %v2295_v63  ;;  %v2322_v35 = vsel %vm810_vm3, %v2298_v31, 0 }
0x11c6   :  { %2331 = vmatpush.bf16.xpose.msrb.mxu3 %v2322_v35 }
0x11c7   :  { %v6334_v36 = vpack.c.b16 %v2433_v32, %v2433_v32  ;;  %v6336_v38 = vpack.c.b16 %v2438_v34, %v2438_v34 }
0x11c9   :  { %2440 = vrot.lane.b32.xlu1 %v6336_v38, %s5621_s28  ;;  %2435 = vrot.lane.b32.xlu0 %v6334_v36, %s5621_s28 }
0x11cd   :  { %4494 = vmatmul.msk.bf16.vlgmr.msrb.gmra.mxu3 %vm810_vm3, %v2296_v30 }
0x121c   :  { %v2407_v41 = vpop.permute.xlu2 %2406 }
0x1233   :  { %v2412_v39 = vpop.permute.xlu0 %2411 }
0x1234   :  { %v2417_v40 = vsel %vm810_vm3, %v2412_v39, 0 }
0x1235   :  { %2426 = vmatpush.bf16.xpose.msra.mxu2 %v2417_v40 }
0x123b   :  { %v2441_v4 = vpop.permute.xlu1 %2440  ;;  %v2436_v47 = vpop.permute.xlu0 %2435 }
0x123c   :  { %v2446_v46 = vsel %vm810_vm3, %v2441_v4, 0  ;;  %4497 = vmatmul.msk.bf16.vlgmr.msra.gmra.mxu2 %vm810_vm3, %v2407_v41 }
0x123d   :  { %2455 = vmatpush.bf16.xpose.msra.mxu3 %v2446_v46 }
0x1244   :  { %4498 = vmatmul.msk.bf16.vlgmr.msra.gmra.mxu3 %vm810_vm3, %v2436_v47 }
0x1248   :  { %v2314_v14 = vpop.f32.mrf.mxu2 }
0x1249   :  { %v2337_v11 = vsel %vm849_vm5, %v2314_v14, -inf }
0x124a   :  { %2338 = vmax.xlane.f32.xlu0 %v2337_v11 }
0x1250   :  { %v2316_v48 = vpop.f32.mrf.mxu2  ;;  %v6348_v5 = vpop.f32.mrf.mxu3 }
0x1251   :  { %v2340_v20 = vsel %vm849_vm5, %v6348_v5, -inf }
0x1258   :  { %v2335_v49 = vpop.f32.mrf.mxu3 }
0x12bd   :  { %v2339_v50 = vpop.xlane.xlu0 %2338 }
0x12be   :  { %v2343_v52 = vsub.f32 %v2314_v14, %v2339_v50 }
0x12bf   :  { %v2428_v53 = vpop.f32.mrf.mxu2 }
0x12c0   :  { %v2345_v44 = vmul.f32 1.442695, %v2343_v52  ;;  %v2461_v0 = vsel %vm849_vm5, %v2428_v53, -inf }
0x12c1   :  { %2462 = vmax.xlane.f32.xlu2 %v2461_v0 }
0x12c2   :  { %4961 = vpow2.f32 %v2345_v44 }
0x12c7   :  { %v2430_v9 = vpop.f32.mrf.mxu2  ;;  %v2457_v54 = vpop.f32.mrf.mxu3 }
0x12c8   :  { %v4962_v33 = vpop.eup %4961  ;;  %v2464_v58 = vsel %vm849_vm5, %v2457_v54, -inf }
0x12c9   :  { %v2349_v37 = vsel %vm849_vm5, %v4962_v33, 0.0 }
0x12ca   :  { %2350 = vadd.xlane.f32.xlu1 %v2349_v37 }
0x12cf   :  { %v2459_v55 = vpop.f32.mrf.mxu3 }
0x12d9   :  { %2488 = vrot.lane.b32.xlu2 %v6353_v42, %s5621_s28 }
0x12e3   :  { %2576 = vrot.lane.b32.xlu1 %v6323_v23, %s5622_s8 }
0x1302   :  { %2465 = vmax.xlane.f32.xlu2 %v2464_v58 }
0x131a   :  { %2512 = vrot.lane.b32.xlu2 %v6360_v61, %s5621_s28 }
0x1322   :  { %2714 = vrot.lane.b32.xlu2 %v6325_v25, %s5623_s25 }
0x1334   :  { %v2463_v62 = vpop.xlane.xlu2 %2462 }
0x1335   :  { %v2467_v28 = vsub.f32 %v2428_v53, %v2463_v62 }
0x1337   :  { %v2469_v1 = vmul.f32 1.442695, %v2467_v28 }
0x1339   :  { %4963 = vpow2.f32 %v2469_v1 }
0x133c   :  { %v2489_v3 = vpop.permute.xlu2 %2488 }
0x133d   :  { %v2494_v7 = vsel %vm879_vm4, %v2489_v3, 0  ;;  %v2351_v8 = vpop.xlane.xlu1 %2350 }
0x133e   :  { %4965 = vrcp.f32 %v2351_v8  ;;  %2503 = vmatpush.bf16.msra.mxu1 %v2494_v7 }
0x133f   :  { %v4964_v10 = vpop.eup %4963 }
0x1340   :  { %v2473_v12 = vsel %vm849_vm5, %v4964_v10, 0.0 }
0x1341   :  { %2474 = vadd.xlane.f32.xlu0 %v2473_v12 }
0x1344   :  { %v4966_v13 = vpop.eup %4965 }
0x1345   :  { %v2357_v15 = vmul.f32 %v4966_v13, %v4962_v33 }
0x1347   :  { %v2359_v16 = vpack.c.bf16 %v2357_v15, %v2357_v15 }
0x1349   :  { %4495 = vmatmul.msk.bf16.vlgmr.msrb.gmra.mxu1 %vm849_vm5, %v2359_v16 }
0x1355   :  { %2578 = vrot.lane.b32.xlu0 %v6325_v25, %s5622_s8  ;;  %v2577_v34 = vpop.permute.xlu1 %2576 }
0x1375   :  { %v2466_v63 = vpop.xlane.xlu2 %2465 }
0x1376   :  { %v2468_v18 = vsub.f32 %v2457_v54, %v2466_v63 }
0x1378   :  { %v2471_v51 = vmul.f32 1.442695, %v2468_v18 }
0x137a   :  { %4967 = vpow2.f32 %v2471_v51 }
0x137d   :  { %v2513_v19 = vpop.permute.xlu2 %2512 }
0x137e   :  { %v2518_v2 = vsel %vm879_vm4, %v2513_v19, 0 }
0x137f   :  { %2341 = vmax.xlane.f32.xlu0 %v2340_v20  ;;  %2527 = vmatpush.bf16.msra.mxu0 %v2518_v2 }
0x1380   :  { %v4968_v21 = vpop.eup %4967 }
0x1381   :  { %v2476_v22 = vsel %vm849_vm5, %v4968_v21, 0.0 }
0x1385   :  { %v2715_v59 = vpop.permute.xlu2 %2714 }
0x1386   :  { %v2720_v28 = vsel %vm810_vm3, %v2715_v59, 0 }
0x1387   :  { %2477 = vadd.xlane.f32.xlu0 %v2476_v22 }
0x139b   :  { %2601 = vrot.lane.b32.xlu0 %v6336_v38, %s5622_s8 }
0x13a3   :  { %2712 = vrot.lane.b32.xlu0 %v6323_v23, %s5623_s25 }
0x13b4   :  { %v2475_v26 = vpop.xlane.xlu0 %2474 }
0x13b5   :  { %4969 = vrcp.f32 %v2475_v26 }
0x13bb   :  { %v4970_v45 = vpop.eup %4969 }
0x13bc   :  { %v2481_v27 = vmul.f32 %v4970_v45, %v4964_v10 }
0x13be   :  { %v2483_v24 = vpack.c.bf16 %v2481_v27, %v2481_v27 }
0x13c0   :  { %4499 = vmatmul.msk.bf16.vlgmr.msra.gmra.mxu1 %vm849_vm5, %v2483_v24 }
0x13c6   :  { %v6380_v29 = vpop.f32.mrf.mxu1 }
0x13c7   :  { %v2579_v30 = vpop.permute.xlu0 %2578 }
0x13c8   :  { %v2584_v31 = vsel %vm810_vm3, %v2579_v30, 0 }
0x13c9   :  { %2593 = vmatpush.bf16.xpose.msrb.mxu1 %v2584_v31 }
0x13ce   :  { %v2380_v32 = vpop.f32.mrf.mxu1 }
0x13d0   :  { %4503 = vmatmul.msk.bf16.vlgmr.msrb.gmra.mxu1 %vm810_vm3, %v2577_v34 }
0x13f2   :  { %v2342_v35 = vpop.xlane.xlu0 %2341 }
0x13f3   :  { %v2344_v39 = vsub.f32 %v6348_v5, %v2342_v35  ;;  %v4489_v5 = vld [vmem:[%s6703_s11 + $0x20] sm:$0xff] }
0x13f4   :  { %v2402_v49 = vpack.c.bf16 %v4489_v5, %v4489_v5 }
0x13f5   :  { %v2347_v40 = vmul.f32 1.442695, %v2344_v39 }
0x13f6   :  { %v2535_v50 = vrot.slane %v2402_v49, 2  ;;  %v2560_v16 = vsel %vm1053_vm6, %v2402_v49, 0 }
0x13f7   :  { %4971 = vpow2.f32 %v2347_v40  ;;  %2569 = vmatpush.bf16.msrb.mxu3 %v2560_v16 }
0x13f8   :  { %v2540_v44 = vsel %vm1053_vm6, %v2535_v50, 0 }
0x13f9   :  { %2549 = vmatpush.bf16.msrb.mxu2 %v2540_v44 }
0x13fa   :  { %v2478_v53 = vpop.xlane.xlu0 %2477 }
0x13fd   :  { %v4972_v41 = vpop.eup %4971 }
0x13fe   :  { %v2352_v4 = vsel %vm849_vm5, %v4972_v41, 0.0 }
0x13ff   :  { %2353 = vadd.xlane.f32.xlu1 %v2352_v4 }
0x140d   :  { %v2602_v54 = vpop.permute.xlu0 %2601 }
0x140e   :  { %v2607_v37 = vsel %vm810_vm3, %v2602_v54, 0 }
0x1415   :  { %v2713_v7 = vpop.permute.xlu0 %2712 }
0x1418   :  { %2599 = vrot.lane.b32.xlu1 %v6334_v36, %s5622_s8 }
0x1420   :  { %2646 = vrot.lane.b32.xlu1 %v6353_v42, %s5622_s8 }
0x1428   :  { %2737 = vrot.lane.b32.xlu1 %v6336_v38, %s5623_s25 }
0x1430   :  { %2735 = vrot.lane.b32.xlu1 %v6334_v36, %s5623_s25 }
0x143d   :  { %v2505_v46 = vpop.f32.mrf.mxu1 }
0x1445   :  { %v2507_v47 = vpop.f32.mrf.mxu1 }
0x144d   :  { %v2595_v14 = vpop.f32.mrf.mxu1 }
0x144e   :  { %v2622_v11 = vsel %vm849_vm5, %v2595_v14, -inf }
0x144f   :  { %2623 = vmax.xlane.f32.xlu2 %v2622_v11 }
0x1455   :  { %v2597_v48 = vpop.f32.mrf.mxu1 }
0x1467   :  { %2851 = vrot.lane.b32.xlu2 %v6325_v25, %s5624_s21 }
0x1472   :  { %v2354_v52 = vpop.xlane.xlu1 %2353 }
0x1473   :  { %4973 = vrcp.f32 %v2354_v52 }
0x1474   :  { %4975 = vrcp.f32 %v2478_v53 }
0x1479   :  { %v4974_v0 = vpop.eup %4973 }
0x147a   :  { %v2358_v9 = vmul.f32 %v4974_v0, %v4972_v41  ;;  %v4976_v55 = vpop.eup %4975 }
0x147b   :  { %v2482_v56 = vmul.f32 %v4976_v55, %v4968_v21 }
0x147c   :  { %v2360_v33 = vpack.c.bf16 %v2358_v9, %v2358_v9 }
0x147d   :  { %v2484_v62 = vpack.c.bf16 %v2482_v56, %v2482_v56 }
0x147e   :  { %4496 = vmatmul.msk.bf16.vlgmr.msrb.gmra.mxu0 %vm849_vm5, %v2360_v33 }
0x147f   :  { %2616 = vmatpush.bf16.xpose.msrb.mxu0 %v2607_v37 }
0x148a   :  { %v2600_v58 = vpop.permute.xlu1 %2599 }
0x148e   :  { %4500 = vmatmul.msk.bf16.vlgmr.msra.gmra.mxu0 %vm849_vm5, %v2484_v62 }
0x148f   :  { %2729 = vmatpush.bf16.xpose.msra.mxu0 %v2720_v28 }
0x1492   :  { %v2647_v1 = vpop.permute.xlu1 %2646 }
0x1493   :  { %v2652_v3 = vsel %vm879_vm4, %v2647_v1, 0 }
0x1494   :  { %2661 = vmatpush.bf16.msra.mxu2 %v2652_v3 }
0x149a   :  { %v2738_v19 = vpop.permute.xlu1 %2737 }
0x149b   :  { %v2743_v21 = vsel %vm810_vm3, %v2738_v19, 0 }
0x149e   :  { %4504 = vmatmul.msk.bf16.vlgmr.msrb.gmra.mxu0 %vm810_vm3, %v2600_v58 }
0x14a2   :  { %v2736_v41 = vpop.permute.xlu1 %2735 }
0x14ae   :  { %4508 = vmatmul.msk.bf16.vlgmr.msra.gmra.mxu0 %vm810_vm3, %v2713_v7 }
0x14c2   :  { %v2624_v8 = vpop.xlane.xlu2 %2623 }
0x14c3   :  { %v2628_v10 = vsub.f32 %v2595_v14, %v2624_v8 }
0x14c5   :  { %v2630_v12 = vmul.f32 1.442695, %v2628_v10 }
0x14c7   :  { %4977 = vpow2.f32 %v2630_v12 }
0x14ca   :  { %v2852_v35 = vpop.permute.xlu2 %2851 }
0x14cb   :  { %v2857_v40 = vsel %vm810_vm3, %v2852_v35, 0 }
0x14cd   :  { %v4978_v13 = vpop.eup %4977 }
0x14ce   :  { %v2634_v15 = vsel %vm849_vm5, %v4978_v13, 0.0 }
0x14cf   :  { %2635 = vadd.xlane.f32.xlu0 %v2634_v15 }
0x14e3   :  { %2849 = vrot.lane.b32.xlu0 %v6323_v23, %s5624_s21 }
0x14fb   :  { %v2397_v63 = vpop.f32.mrf.mxu0 }
0x14fc   :  { %v2401_v18 = vpack.c.bf16 %v2397_v63, %v6380_v29 }
0x14fe   :  { %4502 = vmatmul.msk.bf16.vlgmr.msrb.gmra.mxu3 %vm810_vm3, %v2401_v18 }
0x1503   :  { %v2399_v51 = vpop.f32.mrf.mxu0 }
0x150b   :  { %v2529_v2 = vpop.f32.mrf.mxu0 }
0x150c   :  { %v2533_v20 = vpack.c.bf16 %v2529_v2, %v2505_v46 }
0x150e   :  { %4501 = vmatmul.msk.bf16.vlgmr.msrb.gmra.mxu2 %vm810_vm3, %v2533_v20 }
0x150f   :  { %2752 = vmatpush.bf16.xpose.msrb.mxu2 %v2743_v21 }
0x1513   :  { %v2531_v22 = vpop.f32.mrf.mxu0 }
0x151b   :  { %v2618_v26 = vpop.f32.mrf.mxu0 }
0x151c   :  { %v2625_v45 = vsel %vm849_vm5, %v2618_v26, -inf }
0x151d   :  { %2626 = vmax.xlane.f32.xlu1 %v2625_v45 }
0x1523   :  { %v2620_v27 = vpop.f32.mrf.mxu0 }
0x152b   :  { %v2731_v24 = vpop.f32.mrf.mxu0 }
0x152c   :  { %v2758_v29 = vsel %vm849_vm5, %v2731_v24, -inf }
0x152d   :  { %2759 = vmax.xlane.f32.xlu2 %v2758_v29 }
0x1533   :  { %v2733_v30 = vpop.f32.mrf.mxu0 }
0x1536   :  { %2667 = vrot.lane.b32.xlu1 %v6360_v61, %s5622_s8 }
0x1542   :  { %v2636_v31 = vpop.xlane.xlu0 %2635 }
0x1543   :  { %4979 = vrcp.f32 %v2636_v31 }
0x1545   :  { %2782 = vrot.lane.b32.xlu2 %v6353_v42, %s5623_s25 }
0x1549   :  { %v4980_v32 = vpop.eup %4979 }
0x154a   :  { %v2642_v34 = vmul.f32 %v4980_v32, %v4978_v13 }
0x154c   :  { %v2644_v39 = vpack.c.bf16 %v2642_v34, %v2642_v34 }
0x154e   :  { %4505 = vmatmul.msk.bf16.vlgmr.msra.gmra.mxu2 %vm849_vm5, %v2644_v39 }
0x154f   :  { %2866 = vmatpush.bf16.xpose.msra.mxu2 %v2857_v40 }
0x1555   :  { %v2850_v4 = vpop.permute.xlu0 %2849 }
0x155e   :  { %4509 = vmatmul.msk.bf16.vlgmr.msrb.gmra.mxu2 %vm810_vm3, %v2736_v41 }
0x156e   :  { %4513 = vmatmul.msk.bf16.vlgmr.msra.gmra.mxu2 %vm810_vm3, %v2850_v4 }
0x1581   :  { %v2571_v47 = vpop.f32.mrf.mxu3 }
0x1590   :  { %v2627_v46 = vpop.xlane.xlu1 %2626 }
0x1591   :  { %v2629_v14 = vsub.f32 %v2618_v26, %v2627_v46  ;;  %v2551_v11 = vpop.f32.mrf.mxu2  ;;  %v4490_v26 = vld [vmem:[%s6703_s11 + $0x28] sm:$0xff] }
0x1592   :  { %v6424_v48 = vadd.f32 %v2571_v47, %v2551_v11  ;;  %v6456_v45 = vpack.c.bf16 %v4490_v26, %v4490_v26 }
0x1593   :  { %v2632_v5 = vmul.f32 1.442695, %v2629_v14  ;;  %v2573_v14 = vpop.f32.mrf.mxu3 }
0x1594   :  { %v2694_v27 = vsel %vm1053_vm6, %v6456_v45, 0 }
0x1595   :  { %4981 = vpow2.f32 %v2632_v5  ;;  %2703 = vmatpush.bf16.msra.mxu1 %v2694_v27 }
0x1599   :  { %v6438_v56 = vpop.f32.mrf.mxu2 }
0x159b   :  { %v4982_v49 = vpop.eup %4981 }
0x159c   :  { %v2637_v50 = vsel %vm849_vm5, %v4982_v49, 0.0 }
0x159d   :  { %2638 = vadd.xlane.f32.xlu0 %v2637_v50 }
0x15a0   :  { %v2760_v52 = vpop.xlane.xlu2 %2759 }
0x15a1   :  { %v2764_v53 = vsub.f32 %v2731_v24, %v2760_v52 }
0x15a3   :  { %v2766_v44 = vmul.f32 1.442695, %v2764_v53 }
0x15a5   :  { %4983 = vpow2.f32 %v2766_v44 }
0x15a8   :  { %v2668_v0 = vpop.permute.xlu1 %2667  ;;  %v2783_v9 = vpop.permute.xlu2 %2782 }
0x15a9   :  { %v2673_v54 = vsel %vm879_vm4, %v2668_v0, 0  ;;  %v2788_v33 = vsel %vm879_vm4, %v2783_v9, 0 }
0x15aa   :  { %2682 = vmatpush.bf16.msra.mxu3 %v2673_v54 }
0x15ab   :  { %v4984_v37 = vpop.eup %4983 }
0x15ac   :  { %v2770_v55 = vsel %vm849_vm5, %v4984_v37, 0.0 }
0x15ad   :  { %2771 = vadd.xlane.f32.xlu1 %v2770_v55 }
0x15ae   :  { %2797 = vmatpush.bf16.msrb.mxu3 %v2788_v33 }
0x15b1   :  { %2874 = vrot.lane.b32.xlu0 %v6336_v38, %s5624_s21 }
0x15b9   :  { %2872 = vrot.lane.b32.xlu0 %v6334_v36, %s5624_s21 }
0x15c1   :  { %2987 = vrot.lane.b32.xlu0 %v6325_v25, %s5625_s30 }
0x15c6   :  { %2985 = vrot.lane.b32.xlu1 %v6323_v23, %s5625_s30 }
0x15d1   :  { %v2663_v58 = vpop.f32.mrf.mxu2 }
0x15d9   :  { %v2665_v59 = vpop.f32.mrf.mxu2 }
0x15e1   :  { %v2754_v62 = vpop.f32.mrf.mxu2 }
0x15e2   :  { %v2761_v28 = vsel %vm849_vm5, %v2754_v62, -inf }
0x15e3   :  { %2762 = vmax.xlane.f32.xlu2 %v2761_v28 }
0x15e9   :  { %v2756_v1 = vpop.f32.mrf.mxu2 }
0x15f1   :  { %v2868_v3 = vpop.f32.mrf.mxu2 }
0x15f2   :  { %v2895_v7 = vsel %vm849_vm5, %v2868_v3, -inf }
0x15f3   :  { %2896 = vmax.xlane.f32.xlu0 %v2895_v7 }
0x15f9   :  { %v2870_v8 = vpop.f32.mrf.mxu2 }
0x15fb   :  { %2803 = vrot.lane.b32.xlu2 %v6360_v61, %s5623_s25 }
0x1603   :  { %3010 = vrot.lane.b32.xlu2 %v6336_v38, %s5625_s30 }
0x160b   :  { %3008 = vrot.lane.b32.xlu2 %v6334_v36, %s5625_s30 }
0x1610   :  { %v2639_v10 = vpop.xlane.xlu0 %2638 }
0x1611   :  { %4985 = vrcp.f32 %v2639_v10 }
0x1613   :  { %3124 = vrot.lane.b32.xlu2 %v6325_v25, %s5626_s6 }
0x1617   :  { %v4986_v12 = vpop.eup %4985 }
0x1618   :  { %v2643_v13 = vmul.f32 %v4986_v12, %v4982_v49 }
0x161a   :  { %v2645_v15 = vpack.c.bf16 %v2643_v13, %v2643_v13 }
0x161c   :  { %4506 = vmatmul.msk.bf16.vlgmr.msra.gmra.mxu3 %vm849_vm5, %v2645_v15 }
0x1620   :  { %v2772_v16 = vpop.xlane.xlu1 %2771 }
0x1621   :  { %4987 = vrcp.f32 %v2772_v16 }
0x1623   :  { %v2875_v63 = vpop.permute.xlu0 %2874 }
0x1624   :  { %v2880_v18 = vsel %vm810_vm3, %v2875_v63, 0 }
0x1625   :  { %2889 = vmatpush.bf16.xpose.msra.mxu3 %v2880_v18 }
0x1627   :  { %v4988_v51 = vpop.eup %4987 }
0x1628   :  { %v2778_v19 = vmul.f32 %v4988_v51, %v4984_v37  ;;  %v2574_v51 = vadd.f32 %v2573_v14, %v6438_v56 }
0x162a   :  { %v2780_v2 = vpack.c.bf16 %v2778_v19, %v2778_v19 }
0x162b   :  { %v2873_v20 = vpop.permute.xlu0 %2872 }
0x162c   :  { %4510 = vmatmul.msk.bf16.vlgmr.msrb.gmra.mxu3 %vm849_vm5, %v2780_v2 }
0x1633   :  { %v2988_v21 = vpop.permute.xlu0 %2987 }
0x1634   :  { %v2993_v22 = vsel %vm810_vm3, %v2988_v21, 0 }
0x1635   :  { %3002 = vmatpush.bf16.xpose.msrb.mxu3 %v2993_v22 }
0x1638   :  { %v2986_v24 = vpop.permute.xlu1 %2985 }
0x163c   :  { %4514 = vmatmul.msk.bf16.vlgmr.msra.gmra.mxu3 %vm810_vm3, %v2873_v20  ;;  %v2826_v20 = vrot.slane %v6456_v45, 2 }
0x163e   :  { %v2831_v26 = vsel %vm1053_vm6, %v2826_v20, 0 }
0x163f   :  { %2840 = vmatpush.bf16.msrb.mxu0 %v2831_v26 }
0x164c   :  { %4518 = vmatmul.msk.bf16.vlgmr.msrb.gmra.mxu3 %vm810_vm3, %v2986_v24 }
0x1656   :  { %v2763_v29 = vpop.xlane.xlu2 %2762 }
0x1657   :  { %v2765_v30 = vsub.f32 %v2754_v62, %v2763_v29 }
0x1659   :  { %v2768_v31 = vmul.f32 1.442695, %v2765_v30 }
0x165b   :  { %4989 = vpow2.f32 %v2768_v31 }
0x165e   :  { %v2804_v32 = vpop.permute.xlu2 %2803 }
0x165f   :  { %v2809_v34 = vsel %vm879_vm4, %v2804_v32, 0 }
0x1660   :  { %2818 = vmatpush.bf16.msrb.mxu1 %v2809_v34 }
0x1661   :  { %v4990_v35 = vpop.eup %4989 }
0x1662   :  { %v2773_v39 = vsel %vm849_vm5, %v4990_v35, 0.0 }
0x1663   :  { %2774 = vadd.xlane.f32.xlu1 %v2773_v39 }
0x1666   :  { %v2897_v40 = vpop.xlane.xlu0 %2896  ;;  %v3011_v62 = vpop.permute.xlu2 %3010 }
0x1667   :  { %v2901_v41 = vsub.f32 %v2868_v3, %v2897_v40  ;;  %v3016_v12 = vsel %vm810_vm3, %v3011_v62, 0 }
0x1669   :  { %v2903_v4 = vmul.f32 1.442695, %v2901_v41 }
0x166b   :  { %4991 = vpow2.f32 %v2903_v4 }
0x166e   :  { %v3009_v1 = vpop.permute.xlu2 %3008 }
0x1671   :  { %v4992_v46 = vpop.eup %4991 }
0x1672   :  { %v2907_v47 = vsel %vm849_vm5, %v4992_v46, 0.0 }
0x1673   :  { %2908 = vadd.xlane.f32.xlu0 %v2907_v47 }
0x1676   :  { %v3125_v13 = vpop.permute.xlu2 %3124 }
0x1677   :  { %v3130_v16 = vsel %vm810_vm3, %v3125_v13, 0  ;;  %v4491_v13 = vld [vmem:[%s6703_s11 + $0x30] sm:$0xff] }
0x1687   :  { %2919 = vrot.lane.b32.xlu0 %v6353_v42, %s5624_s21 }
0x169f   :  { %v2684_v11 = vpop.f32.mrf.mxu3 }
0x16a0   :  { %v2688_v5 = vpack.c.bf16 %v2684_v11, %v2663_v58 }
0x16a2   :  { %4507 = vmatmul.msk.bf16.vlgmr.msra.gmra.mxu1 %vm810_vm3, %v2688_v5 }
0x16a7   :  { %v2686_v49 = vpop.f32.mrf.mxu3 }
0x16af   :  { %v6467_v50 = vpop.f32.mrf.mxu3 }
0x16b7   :  { %v2801_v52 = vpop.f32.mrf.mxu3 }
0x16bf   :  { %v2891_v53 = vpop.f32.mrf.mxu3 }
0x16c0   :  { %v2898_v44 = vsel %vm849_vm5, %v2891_v53, -inf }
0x16c1   :  { %2899 = vmax.xlane.f32.xlu1 %v2898_v44 }
0x16c7   :  { %v2893_v0 = vpop.f32.mrf.mxu3 }
0x16cf   :  { %v3004_v9 = vpop.f32.mrf.mxu3 }
0x16d0   :  { %v3031_v54 = vsel %vm849_vm5, %v3004_v9, -inf }
0x16d1   :  { %3032 = vmax.xlane.f32.xlu0 %v3031_v54 }
0x16d6   :  { %v2775_v33 = vpop.xlane.xlu1 %2774 }
0x16d7   :  { %4993 = vrcp.f32 %v2775_v33  ;;  %v3006_v37 = vpop.f32.mrf.mxu3 }
0x16da   :  { %3122 = vrot.lane.b32.xlu1 %v6323_v23, %s5626_s6 }
0x16dd   :  { %v4994_v55 = vpop.eup %4993 }
0x16de   :  { %v2779_v58 = vmul.f32 %v4994_v55, %v4990_v35 }
0x16e0   :  { %v2781_v59 = vpack.c.bf16 %v2779_v58, %v2779_v58 }
0x16e2   :  { %2940 = vrot.lane.b32.xlu1 %v6360_v61, %s5624_s21  ;;  %4511 = vmatmul.msk.bf16.vlgmr.msrb.gmra.mxu1 %vm849_vm5, %v2781_v59 }
0x16e5   :  { %3055 = vrot.lane.b32.xlu0 %v6353_v42, %s5625_s30 }
0x16e6   :  { %v2909_v28 = vpop.xlane.xlu0 %2908 }
0x16e7   :  { %4995 = vrcp.f32 %v2909_v28 }
0x16ed   :  { %3145 = vrot.lane.b32.xlu0 %v6334_v36, %s5626_s6  ;;  %v4996_v3 = vpop.eup %4995 }
0x16ee   :  { %v2915_v7 = vmul.f32 %v4996_v3, %v4992_v46 }
0x16f0   :  { %v2917_v15 = vpack.c.bf16 %v2915_v7, %v2915_v7 }
0x16f9   :  { %v2920_v8 = vpop.permute.xlu0 %2919 }
0x16fa   :  { %v2925_v10 = vsel %vm879_vm4, %v2920_v8, 0 }
0x16fb   :  { %2934 = vmatpush.bf16.msra.mxu1 %v2925_v10 }
0x16fe   :  { %4515 = vmatmul.msk.bf16.vlgmr.msra.gmra.mxu1 %vm849_vm5, %v2917_v15  ;;  %v2962_v15 = vpack.c.bf16 %v4491_v13, %v4491_v13 }
0x16ff   :  { %3025 = vmatpush.bf16.xpose.msrb.mxu1 %v3016_v12 }
0x1707   :  { %3139 = vmatpush.bf16.xpose.msra.mxu1 %v3130_v16  ;;  %v2967_v16 = vsel %vm1053_vm6, %v2962_v15, 0 }
0x1708   :  { %2976 = vmatpush.bf16.msrb.mxu2 %v2967_v16 }
0x170e   :  { %4519 = vmatmul.msk.bf16.vlgmr.msrb.gmra.mxu1 %vm810_vm3, %v3009_v1 }
0x171f   :  { %v2705_v63 = vpop.f32.mrf.mxu1 }
0x1720   :  { %v6486_v18 = vadd.f32 %v2705_v63, %v6424_v48 }
0x1727   :  { %v2707_v19 = vpop.f32.mrf.mxu1 }
0x1728   :  { %v6489_v2 = vadd.f32 %v2707_v19, %v2574_v51 }
0x1734   :  { %v2900_v21 = vpop.xlane.xlu1 %2899 }
0x1735   :  { %v2902_v22 = vsub.f32 %v2891_v53, %v2900_v21 }
0x1737   :  { %v2905_v27 = vmul.f32 1.442695, %v2902_v22 }
0x1739   :  { %4997 = vpow2.f32 %v2905_v27 }
0x173f   :  { %v4998_v24 = vpop.eup %4997 }
0x1740   :  { %v2910_v29 = vsel %vm849_vm5, %v4998_v24, 0.0 }
0x1741   :  { %2911 = vadd.xlane.f32.xlu2 %v2910_v29 }
0x1744   :  { %v3033_v48 = vpop.xlane.xlu0 %3032 }
0x1745   :  { %v3037_v30 = vsub.f32 %v3004_v9, %v3033_v48 }
0x1747   :  { %v3039_v31 = vmul.f32 1.442695, %v3037_v30 }
0x1749   :  { %4999 = vpow2.f32 %v3039_v31 }
0x174c   :  { %v3123_v56 = vpop.permute.xlu1 %3122 }
0x174d   :  { %4523 = vmatmul.msk.bf16.vlgmr.msra.gmra.mxu1 %vm810_vm3, %v3123_v56 }
0x174f   :  { %v5000_v32 = vpop.eup %4999 }
0x1750   :  { %v3043_v45 = vsel %vm849_vm5, %v5000_v32, 0.0 }
0x1751   :  { %3044 = vadd.xlane.f32.xlu1 %v3043_v45 }
0x1754   :  { %v2941_v34 = vpop.permute.xlu1 %2940 }
0x1755   :  { %v2946_v35 = vsel %vm879_vm4, %v2941_v34, 0 }
0x1756   :  { %2955 = vmatpush.bf16.msra.mxu0 %v2946_v35 }
0x1757   :  { %v3056_v39 = vpop.permute.xlu0 %3055 }
0x1758   :  { %v3061_v4 = vsel %vm879_vm4, %v3056_v39, 0 }
0x1759   :  { %3147 = vrot.lane.b32.xlu2 %v6336_v38, %s5626_s6 }
0x175f   :  { %v2820_v40 = vpop.f32.mrf.mxu1  ;;  %v3146_v58 = vpop.permute.xlu0 %3145 }
0x1760   :  { %v2824_v41 = vpack.c.bf16 %v2820_v40, %v6467_v50 }
0x1762   :  { %4512 = vmatmul.msk.bf16.vlgmr.msrb.gmra.mxu0 %vm810_vm3, %v2824_v41 }
0x1763   :  { %3070 = vmatpush.bf16.msrb.mxu0 %v3061_v4 }
0x1767   :  { %v2822_v46 = vpop.f32.mrf.mxu1 }
0x177b   :  { %v2936_v47 = vpop.f32.mrf.mxu1 }
0x1783   :  { %v2938_v14 = vpop.f32.mrf.mxu1 }
0x178b   :  { %v3027_v11 = vpop.f32.mrf.mxu1 }
0x178c   :  { %v3034_v5 = vsel %vm849_vm5, %v3027_v11, -inf }
0x178d   :  { %3035 = vmax.xlane.f32.xlu0 %v3034_v5 }
0x1793   :  { %v3029_v49 = vpop.f32.mrf.mxu1 }
0x17a1   :  { %3260 = vrot.lane.b32.xlu0 %v6325_v25, %s5627_s7 }
0x17a9   :  { %3283 = vrot.lane.b32.xlu0 %v6336_v38, %s5627_s7 }
0x17b1   :  { %3281 = vrot.lane.b32.xlu0 %v6334_v36, %s5627_s7 }
0x17b4   :  { %v2912_v50 = vpop.xlane.xlu2 %2911 }
0x17b5   :  { %5001 = vrcp.f32 %v2912_v50 }
0x17bb   :  { %v5002_v52 = vpop.eup %5001 }
0x17bc   :  { %v2916_v53 = vmul.f32 %v5002_v52, %v4998_v24  ;;  %v3148_v44 = vpop.permute.xlu2 %3147 }
0x17bd   :  { %v3153_v9 = vsel %vm810_vm3, %v3148_v44, 0 }
0x17be   :  { %v2918_v0 = vpack.c.bf16 %v2916_v53, %v2916_v53 }
0x17c0   :  { %4516 = vmatmul.msk.bf16.vlgmr.msra.gmra.mxu0 %vm849_vm5, %v2918_v0 }
0x17c1   :  { %3162 = vmatpush.bf16.xpose.msra.mxu0 %v3153_v9 }
0x17c4   :  { %v3045_v54 = vpop.xlane.xlu1 %3044 }
0x17c5   :  { %5003 = vrcp.f32 %v3045_v54 }
0x17ca   :  { %v3141_v25 = vpop.f32.mrf.mxu1 }
0x17cb   :  { %v5004_v33 = vpop.eup %5003  ;;  %v3168_v38 = vsel %vm849_vm5, %v3141_v25, -inf }
0x17cc   :  { %v3051_v37 = vmul.f32 %v5004_v33, %v5000_v32  ;;  %3169 = vmax.xlane.f32.xlu2 %v3168_v38 }
0x17ce   :  { %v3053_v36 = vpack.c.bf16 %v3051_v37, %v3051_v37 }
0x17d0   :  { %4520 = vmatmul.msk.bf16.vlgmr.msrb.gmra.mxu0 %vm849_vm5, %v3053_v36 }
0x17d2   :  { %v3143_v55 = vpop.f32.mrf.mxu1 }
0x17df   :  { %v2842_v59 = vpop.f32.mrf.mxu0 }
0x17e0   :  { %v2847_v62 = vadd.f32 %v2842_v59, %v6486_v18  ;;  %4524 = vmatmul.msk.bf16.vlgmr.msra.gmra.mxu0 %vm810_vm3, %v3146_v58 }
0x17e4   :  { %3192 = vrot.lane.b32.xlu2 %v6353_v42, %s5626_s6 }
0x17ec   :  { %3258 = vrot.lane.b32.xlu2 %v6323_v23, %s5627_s7  ;;  %v6525_v23 = vpop.f32.mrf.mxu0 }
0x1800   :  { %v3036_v28 = vpop.xlane.xlu0 %3035 }
0x1801   :  { %v3038_v1 = vsub.f32 %v3027_v11, %v3036_v28 }
0x1803   :  { %v3041_v3 = vmul.f32 1.442695, %v3038_v1 }
0x1805   :  { %5005 = vpow2.f32 %v3041_v3 }
0x180b   :  { %v5006_v7 = vpop.eup %5005 }
0x180c   :  { %v3046_v8 = vsel %vm849_vm5, %v5006_v7, 0.0 }
0x180d   :  { %3047 = vadd.xlane.f32.xlu1 %v3046_v8 }
0x1813   :  { %v3261_v10 = vpop.permute.xlu0 %3260 }
0x1814   :  { %v3266_v12 = vsel %vm810_vm3, %v3261_v10, 0 }
0x1815   :  { %3275 = vmatpush.bf16.xpose.msrb.mxu0 %v3266_v12 }
0x181b   :  { %v3284_v40 = vpop.permute.xlu0 %3283 }
0x181c   :  { %v3289_v46 = vsel %vm810_vm3, %v3284_v40, 0 }
0x1823   :  { %v3282_v55 = vpop.permute.xlu0 %3281 }
0x1826   :  { %3076 = vrot.lane.b32.xlu1 %v6360_v61, %s5625_s30 }
0x183d   :  { %v2957_v63 = vpop.f32.mrf.mxu0 }
0x183e   :  { %v2961_v18 = vpack.c.bf16 %v2957_v63, %v2936_v47  ;;  %v3099_v47 = vrot.slane %v2962_v15, 2 }
0x183f   :  { %v3170_v51 = vpop.xlane.xlu2 %3169 }
0x1840   :  { %v3174_v19 = vsub.f32 %v3141_v25, %v3170_v51  ;;  %4517 = vmatmul.msk.bf16.vlgmr.msrb.gmra.mxu2 %vm810_vm3, %v2961_v18  ;;  %v3104_v14 = vsel %vm1053_vm6, %v3099_v47, 0 }
0x1841   :  { %3113 = vmatpush.bf16.msra.mxu3 %v3104_v14 }
0x1842   :  { %v3176_v20 = vmul.f32 1.442695, %v3174_v19 }
0x1844   :  { %5007 = vpow2.f32 %v3176_v20 }
0x1845   :  { %v2959_v21 = vpop.f32.mrf.mxu0 }
0x1847   :  { %v3193_v22 = vpop.permute.xlu2 %3192 }
0x1848   :  { %v3198_v41 = vsel %vm879_vm4, %v3193_v22, 0 }
0x184a   :  { %v5008_v26 = vpop.eup %5007 }
0x184b   :  { %v3180_v29 = vsel %vm849_vm5, %v5008_v26, 0.0 }
0x184d   :  { %v3072_v27 = vpop.f32.mrf.mxu0 }
0x184f   :  { %v3259_v24 = vpop.permute.xlu2 %3258 }
0x1850   :  { %3181 = vadd.xlane.f32.xlu1 %v3180_v29  ;;  %4528 = vmatmul.msk.bf16.vlgmr.msrb.gmra.mxu0 %vm810_vm3, %v3259_v24 }
0x1855   :  { %v3074_v48 = vpop.f32.mrf.mxu0 }
0x185d   :  { %v3164_v30 = vpop.f32.mrf.mxu0 }
0x185e   :  { %v3171_v31 = vsel %vm849_vm5, %v3164_v30, -inf }
0x185f   :  { %3172 = vmax.xlane.f32.xlu2 %v3171_v31 }
0x1865   :  { %v3166_v56 = vpop.f32.mrf.mxu0 }
0x1869   :  { %3213 = vrot.lane.b32.xlu1 %v6360_v61, %s5626_s6 }
0x1880   :  { %v3048_v32 = vpop.xlane.xlu1 %3047 }
0x1881   :  { %5009 = vrcp.f32 %v3048_v32 }
0x1887   :  { %v5010_v45 = vpop.eup %5009 }
0x1888   :  { %v3052_v34 = vmul.f32 %v5010_v45, %v5006_v7 }
0x188a   :  { %v3054_v4 = vpack.c.bf16 %v3052_v34, %v3052_v34 }
0x1898   :  { %v3077_v35 = vpop.permute.xlu1 %3076 }
0x1899   :  { %v3082_v39 = vsel %vm879_vm4, %v3077_v35, 0 }
0x189a   :  { %3091 = vmatpush.bf16.msra.mxu2 %v3082_v39 }
0x189d   :  { %4521 = vmatmul.msk.bf16.vlgmr.msra.gmra.mxu2 %vm849_vm5, %v3054_v4 }
0x189e   :  { %3207 = vmatpush.bf16.msrb.mxu2 %v3198_v41 }
0x18a2   :  { %3298 = vmatpush.bf16.xpose.msra.mxu2 %v3289_v46 }
0x18c3   :  { %v3182_v11 = vpop.xlane.xlu1 %3181  ;;  %v2978_v5 = vpop.f32.mrf.mxu2 }
0x18c4   :  { %5011 = vrcp.f32 %v3182_v11  ;;  %v2983_v49 = vadd.f32 %v2978_v5, %v2847_v62 }
0x18ca   :  { %v5012_v50 = vpop.eup %5011 }
0x18cb   :  { %v3188_v52 = vmul.f32 %v5012_v50, %v5008_v26  ;;  %v2980_v59 = vpop.f32.mrf.mxu2 }
0x18cd   :  { %v3190_v53 = vpack.c.bf16 %v3188_v52, %v3188_v52  ;;  %v3277_v44 = vpop.f32.mrf.mxu0 }
0x18ce   :  { %v3304_v0 = vsel %vm849_vm5, %v3277_v44, -inf }
0x18cf   :  { %4525 = vmatmul.msk.bf16.vlgmr.msrb.gmra.mxu2 %vm849_vm5, %v3190_v53  ;;  %3305 = vmax.xlane.f32.xlu1 %v3304_v0 }
0x18d2   :  { %v3173_v9 = vpop.xlane.xlu2 %3172 }
0x18d3   :  { %v3175_v54 = vsub.f32 %v3164_v30, %v3173_v9  ;;  %v4492_v30 = vld [vmem:[%s6703_s11 + $0x38] sm:$0xff] }
0x18d4   :  { %v3235_v31 = vpack.c.bf16 %v4492_v30, %v4492_v30 }
0x18d5   :  { %v3178_v25 = vmul.f32 1.442695, %v3175_v54  ;;  %v3279_v33 = vpop.f32.mrf.mxu0 }
0x18d6   :  { %v3240_v56 = vsel %vm1053_vm6, %v3235_v31, 0 }
0x18d7   :  { %5013 = vpow2.f32 %v3178_v25  ;;  %3249 = vmatpush.bf16.msrb.mxu1 %v3240_v56  ;;  %v3372_v25 = vrot.slane %v3235_v31, 2 }
0x18d9   :  { %v3377_v33 = vsel %vm1053_vm6, %v3372_v25, 0  ;;  %v4718_v25 = vld [vmem:[%s6705_s1 + $0x68] sm:$0xff] }
0x18da   :  { %3386 = vmatpush.bf16.msra.mxu0 %v3377_v33  ;;  %v4717_v33 = vld [vmem:[%s6705_s1 + $0x60] sm:$0xff] }
0x18db   :  { %v3214_v38 = vpop.permute.xlu1 %3213 }
0x18dc   :  { %v3219_v37 = vsel %vm879_vm4, %v3214_v38, 0 }
0x18dd   :  { %v5014_v36 = vpop.eup %5013  ;;  %3228 = vmatpush.bf16.msrb.mxu3 %v3219_v37 }
0x18de   :  { %v3183_v58 = vsel %vm849_vm5, %v5014_v36, 0.0 }
0x18df   :  { %3184 = vadd.xlane.f32.xlu0 %v3183_v58  ;;  %4529 = vmatmul.msk.bf16.vlgmr.msra.gmra.mxu2 %vm810_vm3, %v3282_v55  ;;  %v4852_v55 = vld [vmem:[#allocation14 + $0x1] ss:$0 sm:$0xff] }
0x1920   :  { %v3093_v62 = vpop.f32.mrf.mxu2 }
0x1921   :  { %v3097_v28 = vpack.c.bf16 %v3093_v62, %v3072_v27  ;;  %v2848_v27 = vadd.f32 %v6525_v23, %v6489_v2 }
0x1923   :  { %4522 = vmatmul.msk.bf16.vlgmr.msra.gmra.mxu3 %vm810_vm3, %v3097_v28  ;;  %v2984_v24 = vadd.f32 %v2980_v59, %v2848_v27 }
0x1928   :  { %v3095_v1 = vpop.f32.mrf.mxu2 }
0x1942   :  { %v3306_v3 = vpop.xlane.xlu1 %3305 }
0x1943   :  { %v3310_v7 = vsub.f32 %v3277_v44, %v3306_v3 }
0x1945   :  { %v3312_v8 = vmul.f32 1.442695, %v3310_v7 }
0x1947   :  { %5015 = vpow2.f32 %v3312_v8 }
0x194d   :  { %v5016_v10 = vpop.eup %5015 }
0x194e   :  { %v3316_v12 = vsel %vm849_vm5, %v5016_v10, 0.0 }
0x194f   :  { %3317 = vadd.xlane.f32.xlu0 %v3316_v12 }
0x1952   :  { %v3185_v13 = vpop.xlane.xlu0 %3184  ;;  %v3209_v15 = vpop.f32.mrf.mxu2 }
0x1953   :  { %5017 = vrcp.f32 %v3185_v13 }
0x1959   :  { %v5018_v16 = vpop.eup %5017 }
0x195a   :  { %v3189_v63 = vmul.f32 %v5018_v16, %v5014_v36  ;;  %v3211_v18 = vpop.f32.mrf.mxu2 }
0x195c   :  { %v3191_v51 = vpack.c.bf16 %v3189_v63, %v3189_v63 }
0x195e   :  { %4526 = vmatmul.msk.bf16.vlgmr.msrb.gmra.mxu3 %vm849_vm5, %v3191_v51 }
0x1962   :  { %v3300_v19 = vpop.f32.mrf.mxu2 }
0x1963   :  { %3328 = vrot.lane.b32.xlu0 %v6353_v42, %s5627_s7  ;;  %v3307_v20 = vsel %vm849_vm5, %v3300_v19, -inf }
0x1964   :  { %3308 = vmax.xlane.f32.xlu2 %v3307_v20 }
0x196a   :  { %v3302_v21 = vpop.f32.mrf.mxu2 }
0x19a6   :  { %v3115_v22 = vpop.f32.mrf.mxu3 }
0x19a7   :  { %v3120_v26 = vadd.f32 %v3115_v22, %v2983_v49 }
0x19ae   :  { %v3117_v29 = vpop.f32.mrf.mxu3 }
0x19af   :  { %v3121_v48 = vadd.f32 %v3117_v29, %v2984_v24  ;;  %v4711_v29 = vld [vmem:[%s6704_s23 + $0x10] sm:$0xff] }
0x19c2   :  { %v3318_v32 = vpop.xlane.xlu0 %3317 }
0x19c3   :  { %5019 = vrcp.f32 %v3318_v32 }
0x19c9   :  { %v5020_v42 = vpop.eup %5019 }
0x19ca   :  { %v3324_v45 = vmul.f32 %v5020_v42, %v5016_v10 }
0x19cc   :  { %v3326_v40 = vpack.c.bf16 %v3324_v45, %v3324_v45 }
0x19d5   :  { %v3329_v34 = vpop.permute.xlu0 %3328 }
0x19d6   :  { %v3334_v35 = vsel %vm879_vm4, %v3329_v34, 0 }
0x19d7   :  { %3343 = vmatpush.bf16.msra.mxu3 %v3334_v35  ;;  %v3309_v39 = vpop.xlane.xlu2 %3308 }
0x19d8   :  { %v3311_v41 = vsub.f32 %v3300_v19, %v3309_v39 }
0x19da   :  { %v3314_v2 = vmul.f32 1.442695, %v3311_v41  ;;  %4530 = vmatmul.msk.bf16.vlgmr.msra.gmra.mxu3 %vm849_vm5, %v3326_v40 }
0x19dc   :  { %5021 = vpow2.f32 %v3314_v2 }
0x19e1   :  { %v3230_v23 = vpop.f32.mrf.mxu3 }
0x19e2   :  { %v5022_v4 = vpop.eup %5021  ;;  %v3234_v46 = vpack.c.bf16 %v3230_v23, %v3209_v15 }
0x19e3   :  { %v3319_v47 = vsel %vm849_vm5, %v5022_v4, 0.0 }
0x19e4   :  { %4527 = vmatmul.msk.bf16.vlgmr.msrb.gmra.mxu1 %vm810_vm3, %v3234_v46  ;;  %3320 = vadd.xlane.f32.xlu2 %v3319_v47  ;;  %v4853_v46 = vld [vmem:[#allocation19 + $0x1] ss:$0 sm:$0xff] }
0x19e9   :  { %v3232_v14 = vpop.f32.mrf.mxu3 }
0x19fc   :  { %3349 = vrot.lane.b32.xlu2 %v6360_v61, %s5627_s7 }
0x1a57   :  { %v3321_v11 = vpop.xlane.xlu2 %3320 }
0x1a58   :  { %5023 = vrcp.f32 %v3321_v11 }
0x1a5d   :  { %v3345_v5 = vpop.f32.mrf.mxu3 }
0x1a5e   :  { %v5024_v49 = vpop.eup %5023 }
0x1a5f   :  { %v3325_v50 = vmul.f32 %v5024_v49, %v5022_v4  ;;  %v3350_v52 = vpop.permute.xlu2 %3349 }
0x1a60   :  { %v3355_v53 = vsel %vm879_vm4, %v3350_v52, 0 }
0x1a61   :  { %v3327_v44 = vpack.c.bf16 %v3325_v50, %v3325_v50  ;;  %v3251_v0 = vpop.f32.mrf.mxu1  ;;  %3364 = vmatpush.bf16.msra.mxu1 %v3355_v53 }
0x1a62   :  { %v3256_v9 = vadd.f32 %v3251_v0, %v3120_v26 }
0x1a64   :  { %4531 = vmatmul.msk.bf16.vlgmr.msra.gmra.mxu1 %vm849_vm5, %v3327_v44 }
0x1a65   :  { %v3347_v54 = vpop.f32.mrf.mxu3 }
0x1a66   :  { %v4719_v54 = vld [vmem:[%s6705_s1 + $0x70] sm:$0xff] }
0x1a69   :  { %v3253_v61 = vpop.f32.mrf.mxu1 }
0x1a6a   :  { %v3257_v1 = vadd.f32 %v3253_v61, %v3121_v48  ;;  %v4716_v61 = vld [vmem:[%s6705_s1 + $0x58] sm:$0xff] }
0x1ae1   :  { %v3366_v38 = vpop.f32.mrf.mxu1 }
0x1ae2   :  { %v3370_v37 = vpack.c.bf16 %v3366_v38, %v3345_v5  ;;  %v4854_v5 = vld [vmem:[#allocation20 + $0x1] ss:$0 sm:$0xff]  ;;  %v4715_v38 = vld [vmem:[%s6705_s1 + $0x50] sm:$0xff] }
0x1ae4   :  { %4532 = vmatmul.msk.bf16.vlgmr.msra.gmra.mxu0 %vm810_vm3, %v3370_v37  ;;  %v4714_v37 = vld [vmem:[%s6705_s1 + $0x48] sm:$0xff] }
0x1ae9   :  { %v3368_v36 = vpop.f32.mrf.mxu1 }
0x1aea   :  { %v4713_v36 = vld [vmem:[%s6705_s1 + $0x40] sm:$0xff] }
0x1b61   :  { %v3388_v58 = vpop.f32.mrf.mxu0 }
0x1b62   :  { %v3393_v59 = vadd.f32 %v3388_v58, %v3256_v9  ;;  %v4720_v9 = vld [vmem:[%s6705_s1 + $0x78] sm:$0xff] }
0x1b63   :  { %3591 = vmatpush.bf16.msrb.mxu3 %v4720_v9 }
0x1b64   :  { %v3400_v62 = vadd.f32 %v4852_v55, %v3393_v59 }
0x1b66   :  { %v3402_v28 = vadd.f32 %v3400_v62, %v6307_v60 }
0x1b67   :  { %3592 = vmatpush.bf16.msrb.mxu3 %v4719_v54 }
0x1b68   :  { %v3408_v3 = vsel %vm464_vm0, %v3402_v28, 0.0 }
0x1b69   :  { %3409 = vadd.xlane.f32.xlu1 %v3408_v3  ;;  %v3390_v7 = vpop.f32.mrf.mxu0 }
0x1b6a   :  { %v3394_v8 = vadd.f32 %v3390_v7, %v3257_v1 }
0x1b6b   :  { %3593 = vmatpush.bf16.msrb.mxu3 %v4718_v25 }
0x1b6c   :  { %v3401_v10 = vadd.f32 %v4852_v55, %v3394_v8  ;;  %v4855_v55 = vld [vmem:[#allocation16 + $0x1] ss:$0 sm:$0xff] }
0x1b6e   :  { %v3403_v12 = vadd.f32 %v3401_v10, %v6309_v43  ;;  %v4712_v43 = vld [vmem:[%s6704_s23 + $0x18] sm:$0xff] }
0x1b6f   :  { %3494 = vmatpush.bf16.msrb.mxu2 %v4712_v43  ;;  %3594 = vmatpush.bf16.msrb.mxu3 %v4717_v33 }
0x1b70   :  { %v3411_v13 = vsel %vm464_vm0, %v3403_v12, 0.0 }
0x1b71   :  { %3412 = vadd.xlane.f32.xlu0 %v3411_v13 }
0x1b73   :  { %3495 = vmatpush.bf16.msrb.mxu2 %v4711_v29  ;;  %3595 = vmatpush.bf16.msrb.mxu3 %v4716_v61 }
0x1b77   :  { %3596 = vmatpush.bf16.msrb.mxu3 %v4715_v38 }
0x1b7b   :  { %3597 = vmatpush.bf16.msrb.mxu3 %v4714_v37  ;;  %v4857_v37 = vld [vmem:[#allocation22 + $0x1] ss:$0 sm:$0xff] }
0x1b7f   :  { %3598 = vmatpush.bf16.msrb.mxu3 %v4713_v36 }
0x1bdc   :  { %v3410_v15 = vpop.xlane.xlu1 %3409 }
0x1bdd   :  { %v3414_v16 = vmul.f32 %v3410_v15, %v6274_v57 }
0x1bdf   :  { %v3416_v63 = vsub.f32 %v3402_v28, %v3414_v16 }
0x1be1   :  { %v3418_v18 = vmul.f32 %v3416_v63, %v3416_v63 }
0x1be3   :  { %v3420_v60 = vsel %vm464_vm0, %v3418_v18, 0.0 }
0x1be4   :  { %3421 = vadd.xlane.f32.xlu1 %v3420_v60  ;;  %v3413_v51 = vpop.xlane.xlu0 %3412 }
0x1be5   :  { %v3415_v19 = vmul.f32 %v3413_v51, %v6274_v57 }
0x1be7   :  { %v3417_v20 = vsub.f32 %v3403_v12, %v3415_v19 }
0x1be9   :  { %v3419_v21 = vmul.f32 %v3417_v20, %v3417_v20 }
0x1beb   :  { %v3423_v22 = vsel %vm464_vm0, %v3419_v21, 0.0 }
0x1bec   :  { %3424 = vadd.xlane.f32.xlu2 %v3423_v22 }
0x1c57   :  { %v3422_v26 = vpop.xlane.xlu1 %3421 }
0x1c58   :  { %v3426_v27 = vmul.f32 %v3422_v26, %v6274_v57 }
0x1c5a   :  { %v3428_v24 = vadd.f32 1e-05, %v3426_v27 }
0x1c5c   :  { %5025 = vrsqrt.f32 %v3428_v24  ;;  %vm3436_vm6 = vweird.f32 %v3428_v24 }
0x1c5f   :  { %v3425_v48 = vpop.xlane.xlu2 %3424 }
0x1c60   :  { %v3427_v30 = vmul.f32 %v3425_v48, %v6274_v57 }
0x1c62   :  { %v5026_v31 = vpop.eup %5025  ;;  %v3429_v56 = vadd.f32 1e-05, %v3427_v30 }
0x1c63   :  { %v3431_v32 = vmul.f32 %v5026_v31, %v3428_v24  ;;  %vm3437_vm3 = vweird.f32 %v5026_v31  ;;  %v4856_v24 = vld [vmem:[#allocation17 + $0x1] ss:$0 sm:$0xff] }
0x1c64   :  { %5027 = vrsqrt.f32 %v3429_v56  ;;  %vm3438_vm9 = vmor %vm3436_vm6, %vm3437_vm3  ;;  %vm3446_vm11 = vweird.f32 %v3429_v56 }
0x1c65   :  { %v3432_v42 = vmul.f32 %v5026_v31, %v3431_v32 }
0x1c67   :  { %v3433_v45 = vmul.f32 0.5, %v3432_v42 }
0x1c69   :  { %v3434_v34 = vsub.f32 1.5, %v3433_v45 }
0x1c6a   :  { %v5028_v35 = vpop.eup %5027 }
0x1c6b   :  { %v3435_v39 = vmul.f32 %v5026_v31, %v3434_v34  ;;  %v3441_v40 = vmul.f32 %v5028_v35, %v3429_v56  ;;  %vm3447_vm10 = vweird.f32 %v5028_v35 }
0x1c6c   :  { %vm3448_vm12 = vmor %vm3446_vm11, %vm3447_vm10 }
0x1c6d   :  { %v3442_v41 = vmul.f32 %v5028_v35, %v3441_v40  ;;  %v3439_v2 = vsel %vm3438_vm9, %v5026_v31, %v3435_v39 }
0x1c6e   :  { %v3450_v47 = vmul.f32 %v3439_v2, %v3416_v63 }
0x1c6f   :  { %v3443_v23 = vmul.f32 0.5, %v3442_v41 }
0x1c70   :  { %v3455_v49 = vmul.f32 %v4853_v46, %v3450_v47  ;;  %v4722_v47 = vld [vmem:[%s6706_s2 + $0x8] sm:$0xff] }
0x1c71   :  { %v3444_v4 = vsub.f32 1.5, %v3443_v23  ;;  %3695 = vmatpush.bf16.msrb.mxu1 %v4722_v47 }
0x1c72   :  { %v3460_v53 = vadd.f32 %v4854_v5, %v3455_v49  ;;  %v4721_v49 = vld [vmem:[%s6706_s2] sm:$0xff] }
0x1c73   :  { %v3445_v14 = vmul.f32 %v5028_v35, %v3444_v4 }
0x1c75   :  { %v3449_v11 = vsel %vm3448_vm12, %v5028_v35, %v3445_v14  ;;  %3696 = vmatpush.bf16.msrb.mxu1 %v4721_v49 }
0x1c76   :  { %v3451_v50 = vmul.f32 %v3449_v11, %v3417_v20 }
0x1c78   :  { %v3456_v52 = vmul.f32 %v4853_v46, %v3451_v50 }
0x1c7a   :  { %v3461_v44 = vadd.f32 %v4854_v5, %v3456_v52 }
0x1c7c   :  { %v3467_v0 = vpack.c.bf16 %v3461_v44, %v3460_v53 }
0x1c7e   :  { %4545 = vmatmul.msk.bf16.vlgmr.msrb.gmra.mxu2 %vm464_vm0, %v3467_v0 }
0x1d01   :  { %v3497_v58 = vpop.f32.mrf.mxu2 }
0x1d02   :  { %v3498_v59 = vadd.f32 %v4855_v55, %v3497_v58 }
0x1d04   :  { %v3504_v62 = vmul.f32 0.044715, %v3498_v59  ;;  %v3502_v19 = vmul.f32 0.5, %v3498_v59 }
0x1d06   :  { %v3506_v28 = vmul.f32 %v3504_v62, %v3498_v59 }
0x1d08   :  { %v3508_v1 = vmul.f32 %v3506_v28, %v3498_v59 }
0x1d09   :  { %v3499_v3 = vpop.f32.mrf.mxu2 }
0x1d0a   :  { %v3510_v7 = vadd.f32 %v3508_v1, %v3498_v59  ;;  %v3500_v8 = vadd.f32 %v4855_v55, %v3499_v3  ;;  %v4858_v59 = vld [vmem:[#allocation23 + $0x1] ss:$0 sm:$0xff] }
0x1d0c   :  { %v3505_v10 = vmul.f32 0.044715, %v3500_v8  ;;  %v3512_v12 = vmul.f32 0.7978846, %v3510_v7  ;;  %v3503_v20 = vmul.f32 0.5, %v3500_v8 }
0x1d0e   :  { %v3507_v13 = vmul.f32 %v3505_v10, %v3500_v8  ;;  %5029 = vtanh.f32 %v3512_v12 }
0x1d10   :  { %v3509_v15 = vmul.f32 %v3507_v13, %v3500_v8 }
0x1d12   :  { %v3511_v16 = vadd.f32 %v3509_v15, %v3500_v8 }
0x1d14   :  { %v3513_v63 = vmul.f32 0.7978846, %v3511_v16  ;;  %v5030_v18 = vpop.eup %5029 }
0x1d15   :  { %v3516_v60 = vadd.f32 1.0, %v5030_v18 }
0x1d16   :  { %5031 = vtanh.f32 %v3513_v63 }
0x1d17   :  { %v3518_v22 = vmul.f32 %v3516_v60, %v3502_v19 }
0x1d1c   :  { %v5032_v51 = vpop.eup %5031 }
0x1d1d   :  { %v3517_v21 = vadd.f32 1.0, %v5032_v51 }
0x1d1f   :  { %v3519_v43 = vmul.f32 %v3517_v21, %v3503_v20 }
0x1d21   :  { %v3537_v26 = vpack.c.bf16 %v3519_v43, %v3518_v22  ;;  %v4859_v22 = vld [vmem:[%s6707_s5] ss:$0 sm:$0xff] }
0x1d23   :  { %3599 = vmatmul.bf16.vlgmr.msrb.gmra.mxu3 %v3537_v26 }
0x1da6   :  { %v3600_v27 = vpop.f32.mrf.mxu3 }
0x1da7   :  { %v3601_v31 = vadd.f32 %v4856_v24, %v3600_v27 }
0x1da9   :  { %v3605_v32 = vadd.f32 %v3601_v31, %v3460_v53 }
0x1dab   :  { %v3611_v42 = vsel %vm464_vm0, %v3605_v32, 0.0 }
0x1dae   :  { %v3602_v29 = vpop.f32.mrf.mxu3 }
0x1daf   :  { %v3603_v48 = vadd.f32 %v4856_v24, %v3602_v29 }
0x1db1   :  { %v3606_v30 = vadd.f32 %v3603_v48, %v3461_v44 }
0x1db3   :  { %v3614_v56 = vsel %vm464_vm0, %v3606_v30, 0.0 }
0x1db4   :  { %3615 = vadd.xlane.f32.xlu1 %v3614_v56 }
0x1dbc   :  { %3612 = vadd.xlane.f32.xlu1 %v3611_v42 }
0x1e27   :  { %v3616_v45 = vpop.xlane.xlu1 %3615 }
0x1e28   :  { %v3618_v34 = vmul.f32 %v3616_v45, %v6274_v57 }
0x1e2a   :  { %v3620_v35 = vsub.f32 %v3606_v30, %v3618_v34 }
0x1e2c   :  { %v3622_v39 = vmul.f32 %v3620_v35, %v3620_v35 }
0x1e2e   :  { %v3626_v40 = vsel %vm464_vm0, %v3622_v39, 0.0 }
0x1e2f   :  { %3627 = vadd.xlane.f32.xlu1 %v3626_v40  ;;  %v3613_v41 = vpop.xlane.xlu1 %3612 }
0x1e30   :  { %v3617_v2 = vmul.f32 %v3613_v41, %v6274_v57 }
0x1e32   :  { %v3619_v23 = vsub.f32 %v3605_v32, %v3617_v2 }
0x1e34   :  { %v3621_v4 = vmul.f32 %v3619_v23, %v3619_v23 }
0x1e36   :  { %v3623_v46 = vsel %vm464_vm0, %v3621_v4, 0.0 }
0x1e37   :  { %3624 = vadd.xlane.f32.xlu1 %v3623_v46 }
0x1ea2   :  { %v3628_v14 = vpop.xlane.xlu1 %3627 }
0x1ea3   :  { %v3630_v11 = vmul.f32 %v3628_v14, %v6274_v57 }
0x1ea5   :  { %v3632_v5 = vadd.f32 1e-05, %v3630_v11 }
0x1ea7   :  { %5033 = vrsqrt.f32 %v3632_v5  ;;  %vm3649_vm14 = vweird.f32 %v3632_v5 }
0x1eaa   :  { %v3625_v50 = vpop.xlane.xlu1 %3624 }
0x1eab   :  { %v3629_v52 = vmul.f32 %v3625_v50, %v6274_v57  ;;  %v5629_v50 = vmov 1  }
0x1eac   :  { %4821 = vset.pattern.permute.xlu2 %v5629_v50  ;;  %4825 = vset.pattern.permute.xlu0 %v5629_v50 }
0x1ead   :  { %v5034_v53 = vpop.eup %5033  ;;  %v3631_v44 = vadd.f32 1e-05, %v3629_v52  ;;  %v4725_v52 = vld [vmem:[#allocation25 + $0x14] sm:$0xf] }
0x1eae   :  { %v3644_v0 = vmul.f32 %v5034_v53, %v3632_v5  ;;  %vm3650_vm13 = vweird.f32 %v5034_v53 }
0x1eaf   :  { %5035 = vrsqrt.f32 %v3631_v44  ;;  %vm3651_vm15 = vmor %vm3649_vm14, %vm3650_vm13  ;;  %vm3639_vm2 = vweird.f32 %v3631_v44 }
0x1eb0   :  { %v3645_v9 = vmul.f32 %v5034_v53, %v3644_v0 }
0x1eb2   :  { %v3646_v54 = vmul.f32 0.5, %v3645_v9  ;;  %v4726_v9 = vld [vmem:[#allocation25 + $0x14] sm:$0xf0] }
0x1eb4   :  { %v3647_v25 = vsub.f32 1.5, %v3646_v54 }
0x1eb5   :  { %v5036_v33 = vpop.eup %5035 }
0x1eb6   :  { %v3648_v61 = vmul.f32 %v5034_v53, %v3647_v25  ;;  %v3634_v38 = vmul.f32 %v5036_v33, %v3631_v44  ;;  %vm3640_vm1 = vweird.f32 %v5036_v33  ;;  %v4635_v44 = vld [vmem:[#allocation25 + $0x10] sm:$0xf]  ;;  %v4723_v25 = vld [vmem:[#allocation25 + $0x4] sm:$0xf] }
0x1eb7   :  { %vm3641_vm7 = vmor %vm3639_vm2, %vm3640_vm1  ;;  %v4636_v54 = vor.u32 %v4726_v9, %v4635_v44 }
0x1eb8   :  { %v3652_v36 = vsel %vm3651_vm15, %v5034_v53, %v3648_v61  ;;  %v3635_v55 = vmul.f32 %v5036_v33, %v3634_v38  ;;  %v4637_v53 = vld [vmem:[#allocation25 + $0x18] sm:$0xf0]  ;;  %v4627_v61 = vld [vmem:[#allocation25] sm:$0xf] }
0x1eb9   :  { %v3654_v58 = vmul.f32 %v3652_v36, %v3620_v35  ;;  %v4640_v0 = vor.u32 %v4725_v52, %v4637_v53 }
0x1eba   :  { %v3636_v62 = vmul.f32 0.5, %v3635_v55  ;;  %v5630_v55 = vmov 2  }
0x1ebb   :  { %v3659_v57 = vmul.f32 %v4857_v37, %v3654_v58  ;;  %4822 = vset.pattern.permute.xlu1 %v5630_v55 }
0x1ebc   :  { %v3637_v28 = vsub.f32 1.5, %v3636_v62 }
0x1ebd   :  { %v3664_v1 = vadd.f32 %v4858_v59, %v3659_v57 }
0x1ebe   :  { %v3638_v3 = vmul.f32 %v5036_v33, %v3637_v28 }
0x1ebf   :  { %v3727_v7 = vpack.c.bf16 %v3664_v1, %v3664_v1 }
0x1ec0   :  { %v3642_v8 = vsel %vm3641_vm7, %v5036_v33, %v3638_v3  ;;  %v4629_v33 = vld [vmem:[#allocation25 + $0x8] sm:$0xf0] }
0x1ec1   :  { %v3653_v10 = vmul.f32 %v3642_v8, %v3619_v23  ;;  %v3745_v12 = vsel %vm464_vm0, %v3727_v7, 0  ;;  %v3807_v51 = vsel %vm879_vm4, %v3727_v7, 0  ;;  %v4632_v38 = vor.u32 %v4723_v25, %v4629_v33 }
0x1ec2   :  { %3754 = vmatpush.bf16.xpose.msra.mxu2 %v3745_v12 }
0x1ec3   :  { %v3658_v13 = vmul.f32 %v4857_v37, %v3653_v10  ;;  %v4724_v37 = vld [vmem:[#allocation25 + $0x4] sm:$0xf0] }
0x1ec4   :  { %v4628_v36 = vor.u32 %v4724_v37, %v4627_v61 }
0x1ec5   :  { %v3663_v15 = vadd.f32 %v4858_v59, %v3658_v13 }
0x1ec7   :  { %v6595_v16 = vpack.c.bf16 %v3664_v1, %v3663_v15  ;;  %v3726_v63 = vpack.c.bf16 %v3663_v15, %v3663_v15 }
0x1ec9   :  { %4602 = vmatmul.msk.bf16.vlgmr.msrb.gmra.mxu1 %vm464_vm0, %v6595_v16  ;;  %4604 = vmatmul.msk.bf16.vlgmr.msra.gmra.mxu2 %vm464_vm0, %v3727_v7  ;;  %v3729_v18 = vsel %vm464_vm0, %v3726_v63, 0  ;;  %v3789_v60 = vsel %vm879_vm4, %v3726_v63, 0 }
0x1eca   :  { %3738 = vmatpush.bf16.xpose.msrb.mxu0 %v3729_v18  ;;  %3798 = vmatpush.bf16.msra.mxu1 %v3789_v60 }
0x1ece   :  { %3908 = vmatpush.bf16.msrb.mxu1 %v4636_v54 }
0x1ed1   :  { %4603 = vmatmul.msk.bf16.vlgmr.msrb.gmra.mxu0 %vm464_vm0, %v3726_v63 }
0x1ed2   :  { %3816 = vmatpush.bf16.msra.mxu0 %v3807_v51  ;;  %3909 = vmatpush.bf16.msrb.mxu1 %v4628_v36  ;;  %v5631_v51 = vmov 3  }
0x1ed6   :  { %3922 = vmatpush.bf16.msrb.mxu0 %v4640_v0 }
0x1eda   :  { %3923 = vmatpush.bf16.msrb.mxu0 %v4632_v38 }
0x1f46   :  { %v3698_v27 = vpop.f32.mrf.mxu1 }
0x1f47   :  { %v3699_v29 = vadd.f32 %v4859_v22, %v3698_v27 }
0x1f49   :  { %v3704_v31 = vsel %vm3703_vm8, %v3699_v29, -inf }
0x1f4c   :  { %v3756_v19 = vpop.f32.mrf.mxu2 }
0x1f4d   :  { %v3761_v20 = vmul.f32 0.17677669, %v3756_v19  ;;  %v5632_v19 = vmov 5  }
0x1f4e   :  { %v3740_v21 = vpop.f32.mrf.mxu0  ;;  %v3700_v47 = vpop.f32.mrf.mxu1 }
0x1f4f   :  { %v3760_v43 = vmul.f32 0.17677669, %v3740_v21  ;;  %v3765_v26 = vsel %vm849_vm5, %v3761_v20, -inf  ;;  %v3701_v14 = vadd.f32 %v4859_v22, %v3700_v47  ;;  %v4730_v21 = vld [vmem:[#allocation26 + $0x14] sm:$0xf0] }
0x1f50   :  { %3766 = vmax.xlane.f32.xlu1 %v3765_v26  ;;  %v4729_v22 = vld [vmem:[#allocation26 + $0x14] sm:$0xf]  ;;  %v4619_v26 = vld [vmem:[#allocation26 + $0x18] sm:$0xf0] }
0x1f51   :  { %v3762_v24 = vsel %vm849_vm5, %v3760_v43, -inf  ;;  %v3707_v49 = vsel %vm3703_vm8, %v3701_v14, -inf  ;;  %v4622_v27 = vor.u32 %v4729_v22, %v4619_v26  ;;  %v4731_v22 = vld [vmem:[%s6709_s4] sm:$0xff] }
0x1f52   :  { %3763 = vmax.xlane.f32.xlu0 %v3762_v24  ;;  %v4609_v24 = vld [vmem:[#allocation26] sm:$0xf] }
0x1f53   :  { %3874 = vmatpush.bf16.msra.mxu3 %v4622_v27 }
0x1f54   :  { %v3758_v48 = vpop.f32.mrf.mxu2 }
0x1f55   :  { %v4727_v48 = vld [vmem:[#allocation26 + $0x4] sm:$0xf] }
0x1f56   :  { %v3742_v30 = vpop.f32.mrf.mxu0 }
0x1f58   :  { %3705 = vmax.xlane.f32.xlu1 %v3704_v31 }
0x1fc3   :  { %v3767_v56 = vpop.xlane.xlu1 %3766 }
0x1fc4   :  { %v3769_v32 = vsub.f32 %v3761_v20, %v3767_v56  ;;  %v4617_v20 = vld [vmem:[#allocation26 + $0x10] sm:$0xf]  ;;  %v5633_v56 = vmov 6  }
0x1fc5   :  { %v3764_v42 = vpop.xlane.xlu0 %3763 }
0x1fc6   :  { %v3772_v45 = vmul.f32 1.442695, %v3769_v32  ;;  %v3768_v34 = vsub.f32 %v3760_v43, %v3764_v42  ;;  %v4618_v43 = vor.u32 %v4730_v21, %v4617_v20  ;;  %v4732_v20 = vld [vmem:[%s6709_s4 + $0x8] sm:$0xff] }
0x1fc8   :  { %5037 = vpow2.f32 %v3772_v45  ;;  %v3770_v35 = vmul.f32 1.442695, %v3768_v34  ;;  %3860 = vmatpush.bf16.msrb.mxu2 %v4618_v43 }
0x1fca   :  { %5039 = vpow2.f32 %v3770_v35 }
0x1fcb   :  { %v3706_v39 = vpop.xlane.xlu1 %3705 }
0x1fcc   :  { %v3710_v40 = vsub.f32 %v3699_v29, %v3706_v39  ;;  %v4728_v29 = vld [vmem:[#allocation26 + $0x4] sm:$0xf0] }
0x1fcd   :  { %v4610_v30 = vor.u32 %v4728_v29, %v4609_v24 }
0x1fce   :  { %v5038_v41 = vpop.eup %5037  ;;  %v3712_v2 = vmul.f32 1.442695, %v3710_v40 }
0x1fcf   :  { %v3777_v23 = vsel %vm849_vm5, %v5038_v41, 0.0  ;;  %3861 = vmatpush.bf16.msrb.mxu2 %v4610_v30 }
0x1fd0   :  { %v5040_v4 = vpop.eup %5039  ;;  %5041 = vpow2.f32 %v3712_v2  ;;  %3778 = vadd.xlane.f32.xlu0 %v3777_v23  ;;  %v5634_v2 = vmov 4  }
0x1fd1   :  { %v3774_v46 = vsel %vm849_vm5, %v5040_v4, 0.0 }
0x1fd2   :  { %3775 = vadd.xlane.f32.xlu2 %v3774_v46  ;;  %v3930_v46 = vld [vmem:[%s6708_s26] sm:$0x3] }
0x1fd3   :  { %v3933_v9 = vperm.slane %v3930_v46, 1  ;;  %4096 = vmatpush.bf16.msra.mxu2 %v4732_v20 }
0x1fd6   :  { %v5042_v11 = vpop.eup %5041 }
0x1fd7   :  { %v3716_v5 = vsel %vm3703_vm8, %v5042_v11, 0.0  ;;  %4097 = vmatpush.bf16.msra.mxu2 %v4731_v22 }
0x1fd8   :  { %3717 = vadd.xlane.f32.xlu0 %v3716_v5 }
0x1fda   :  { %3708 = vmax.xlane.f32.xlu2 %v3707_v49 }
0x2043   :  { %v3779_v58 = vpop.xlane.xlu0 %3778 }
0x2044   :  { %5043 = vrcp.f32 %v3779_v58 }
0x2045   :  { %v3776_v59 = vpop.xlane.xlu2 %3775 }
0x2046   :  { %5045 = vrcp.f32 %v3776_v59 }
0x204a   :  { %v5044_v62 = vpop.eup %5043 }
0x204b   :  { %v3783_v57 = vmul.f32 %v5044_v62, %v5038_v41  ;;  %v3718_v28 = vpop.xlane.xlu0 %3717 }
0x204c   :  { %v5046_v1 = vpop.eup %5045  ;;  %5047 = vrcp.f32 %v3718_v28 }
0x204d   :  { %v3785_v3 = vpack.c.bf16 %v3783_v57, %v3783_v57  ;;  %v3782_v7 = vmul.f32 %v5046_v1, %v5040_v4  ;;  %v3709_v8 = vpop.xlane.xlu2 %3708 }
0x204e   :  { %v3711_v10 = vsub.f32 %v3701_v14, %v3709_v8 }
0x204f   :  { %v3784_v12 = vpack.c.bf16 %v3782_v7, %v3782_v7  ;;  %4606 = vmatmul.msk.bf16.vlgmr.msra.gmra.mxu0 %vm849_vm5, %v3785_v3 }
0x2050   :  { %v3714_v13 = vmul.f32 1.442695, %v3711_v10 }
0x2051   :  { %4605 = vmatmul.msk.bf16.vlgmr.msra.gmra.mxu1 %vm849_vm5, %v3784_v12 }
0x2052   :  { %v5048_v15 = vpop.eup %5047  ;;  %5049 = vpow2.f32 %v3714_v13 }
0x2053   :  { %v3724_v63 = vmul.f32 %v5048_v15, %v5042_v11  ;;  %v3932_v11 = vperm.slane %v3930_v46, 0 }
0x2055   :  { %3955 = vperm.xlu2 %4821, %v3724_v63  }
0x2058   :  { %v5050_v18 = vpop.eup %5049 }
0x2059   :  { %v3719_v60 = vsel %vm3703_vm8, %v5050_v18, 0.0 }
0x205a   :  { %3720 = vadd.xlane.f32.xlu1 %v3719_v60 }
0x205d   :  { %4827 = vset.pattern.permute.xlu2 %v5630_v55 }
0x205f   :  { %4642 = vmatmul.msk.bf16.vlgmr.msrb.gmra.mxu0 %vm464_vm0, %v6595_v16 }
0x2061   :  { %4641 = vmatmul.msk.bf16.vlgmr.msrb.gmra.mxu1 %vm464_vm0, %v6595_v16  ;;  %v4611_v16 = vld [vmem:[#allocation26 + $0x8] sm:$0xf0] }
0x2062   :  { %v4614_v31 = vor.u32 %v4727_v48, %v4611_v16 }
0x2064   :  { %3875 = vmatpush.bf16.msra.mxu3 %v4614_v31 }
0x2073   :  { %3975 = vperm.xlu1 %4822, %v3724_v63  }
0x207b   :  { %4823 = vset.pattern.permute.xlu1 %v5631_v51 }
0x207c   :  { %3995 = vperm.xlu1 %4823, %v3724_v63  }
0x2084   :  { %4824 = vset.pattern.permute.xlu1 %v5632_v19 }
0x2085   :  { %4027 = vperm.xlu1 %4824, %v3724_v63  }
0x208d   :  { %4830 = vset.pattern.permute.xlu1 %v5633_v56 }
0x20af   :  { %v3956_v23 = vpop.permute.xlu2 %3955 }
0x20cc   :  { %v3818_v32 = vpop.f32.mrf.mxu0 }
0x20cd   :  { %v3721_v42 = vpop.xlane.xlu1 %3720 }
0x20ce   :  { %5051 = vrcp.f32 %v3721_v42  ;;  %v3800_v45 = vpop.f32.mrf.mxu1 }
0x20cf   :  { %v3830_v34 = vpack.c.bf16 %v3818_v32, %v3800_v45 }
0x20d1   :  { %4623 = vmatmul.msk.bf16.vlgmr.msrb.gmra.mxu2 %vm464_vm0, %v3830_v34  ;;  %4624 = vmatmul.msk.bf16.vlgmr.msra.gmra.mxu3 %vm464_vm0, %v3830_v34 }
0x20d4   :  { %v5052_v35 = vpop.eup %5051  ;;  %v3820_v39 = vpop.f32.mrf.mxu0 }
0x20d5   :  { %v6622_v40 = vmul.f32 %v5052_v35, %v5050_v18 }
0x20d6   :  { %v3802_v41 = vpop.f32.mrf.mxu1 }
0x20d7   :  { %4051 = vperm.xlu1 %4830, %v6622_v40   ;;  %3979 = vperm.xlu2 %4827, %v6622_v40  }
0x20d8   :  { %3959 = vperm.xlu0 %4825, %v6622_v40  }
0x20dc   :  { %v3925_v50 = vpop.f32.mrf.mxu0 }
0x20de   :  { %v3911_v47 = vpop.f32.mrf.mxu1 }
0x20df   :  { %4833 = vset.pattern.permute.xlu1 %v5620_v17  ;;  %4828 = vset.pattern.permute.xlu2 %v5631_v51 }
0x20e0   :  { %4826 = vset.pattern.permute.xlu0 %v5633_v56  ;;  %3947 = vperm.xlu1 %4833, %v6622_v40  }
0x20e1   :  { %3999 = vperm.xlu2 %4828, %v6622_v40   ;;  %4047 = vperm.xlu0 %4826, %v3724_v63  }
0x20e4   :  { %v3927_v58 = vpop.f32.mrf.mxu0 }
0x20e5   :  { %v3976_v4 = vpop.permute.xlu1 %3975 }
0x20e6   :  { %v3913_v33 = vpop.f32.mrf.mxu1 }
0x20e9   :  { %4829 = vset.pattern.permute.xlu2 %v5632_v19  ;;  %4834 = vset.pattern.permute.xlu0 %v5634_v2 }
0x20ea   :  { %4031 = vperm.xlu2 %4829, %v6622_v40  }
0x20ee   :  { %v3996_v53 = vpop.permute.xlu1 %3995 }
0x20f2   :  { %4831 = vset.pattern.permute.xlu2 %v5620_v17 }
0x20f3   :  { %3942 = vperm.xlu2 %4831, %v3724_v63  }
0x20f7   :  { %v4028_v62 = vpop.permute.xlu1 %4027 }
0x20fb   :  { %4832 = vset.pattern.permute.xlu2 %v5634_v2 }
0x20fc   :  { %4015 = vperm.xlu2 %4832, %v3724_v63  }
0x2131   :  { %v3980_v14 = vpop.permute.xlu2 %3979 }
0x213b   :  { %v4000_v36 = vpop.permute.xlu2 %3999 }
0x2144   :  { %v4032_v10 = vpop.permute.xlu2 %4031 }
0x2149   :  { %v4052_v15 = vpop.permute.xlu1 %4051 }
0x214a   :  { %v3960_v57 = vpop.permute.xlu0 %3959 }
0x214d   :  { %v3943_v51 = vpop.permute.xlu2 %3942 }
0x2152   :  { %v3948_v21 = vpop.permute.xlu1 %3947 }
0x2153   :  { %v4048_v63 = vpop.permute.xlu0 %4047 }
0x2154   :  { %v3863_v5 = vpop.f32.mrf.mxu2  ;;  %v3877_v49 = vpop.f32.mrf.mxu3 }
0x2155   :  { %v3912_v52 = vadd.f32 %v3911_v47, %v3863_v5  ;;  %v3926_v0 = vadd.f32 %v3925_v50, %v3877_v49 }
0x2156   :  { %v4016_v19 = vpop.permute.xlu2 %4015 }
0x2157   :  { %v3936_v44 = vadd.f32 %v3932_v11, %v3912_v52  ;;  %v3937_v38 = vadd.f32 %v3933_v9, %v3926_v0  ;;  %v4734_v52 = vld [vmem:[#allocation28 + $0x8] sm:$0xff] }
0x2158   :  { %4152 = vmatpush.bf16.msrb.mxu3 %v4734_v52 }
0x2159   :  { %v3962_v54 = vmul.f32 %v3956_v23, %v3936_v44  ;;  %v3982_v25 = vmul.f32 %v3976_v4, %v3936_v44  ;;  %v4002_v17 = vmul.f32 %v3996_v53, %v3936_v44  ;;  %v4034_v28 = vmul.f32 %v4028_v62, %v3937_v38 }
0x215a   :  { %v4054_v18 = vmul.f32 %v4048_v63, %v3937_v38  ;;  %v3950_v26 = vmul.f32 %v3943_v51, %v3936_v44  ;;  %v4022_v30 = vmul.f32 %v4016_v19, %v3937_v38  ;;  %v4733_v44 = vld [vmem:[#allocation28] sm:$0xff]  ;;  %v4738_v63 = vld [vmem:[#allocation31 + $0x8] sm:$0xff]  ;;  %v4861_v19 = vld [vmem:[%s6711_s29] ss:$0 sm:$0xff] }
0x215b   :  { %3966 = vrot.lane.b32.xlu2 %v3962_v54, %s5635_s9  ;;  %3986 = vrot.lane.b32.xlu1 %v3982_v25, %s5596_s15 }
0x215c   :  { %4006 = vrot.lane.b32.xlu0 %v4002_v17, %s5636_s22  ;;  %v3865_v61 = vpop.f32.mrf.mxu2  ;;  %v3879_v55 = vpop.f32.mrf.mxu3  ;;  %4153 = vmatpush.bf16.msrb.mxu3 %v4733_v44 }
0x215d   :  { %v3914_v37 = vadd.f32 %v3913_v33, %v3865_v61  ;;  %v3928_v1 = vadd.f32 %v3927_v58, %v3879_v55  ;;  %4190 = vmatpush.bf16.msra.mxu1 %v4738_v63 }
0x215f   :  { %v3938_v59 = vadd.f32 %v3932_v11, %v3914_v37  ;;  %v3939_v8 = vadd.f32 %v3933_v9, %v3928_v1 }
0x2161   :  { %v3983_v3 = vmul.f32 %v3980_v14, %v3938_v59  ;;  %v3963_v7 = vmul.f32 %v3960_v57, %v3938_v59  ;;  %v4035_v12 = vmul.f32 %v4032_v10, %v3939_v8  ;;  %v4003_v13 = vmul.f32 %v4000_v36, %v3938_v59 }
0x2162   :  { %v4055_v60 = vmul.f32 %v4052_v15, %v3939_v8  ;;  %v4736_v15 = vld [vmem:[#allocation29 + $0x8] sm:$0xff] }
0x2163   :  { %3988 = vrot.lane.b32.xlu2 %v3983_v3, %s5596_s15  ;;  %4038 = vrot.lane.b32.xlu1 %v4034_v28, %s5635_s9 }
0x2164   :  { %3968 = vrot.lane.b32.xlu0 %v3963_v7, %s5635_s9  ;;  %4216 = vmatpush.bf16.msra.mxu0 %v4736_v15 }
0x216b   :  { %4040 = vrot.lane.b32.xlu2 %v4035_v12, %s5635_s9  ;;  %4008 = vrot.lane.b32.xlu1 %v4003_v13, %s5636_s22 }
0x216c   :  { %4019 = vperm.xlu0 %4834, %v6622_v40  }
0x2173   :  { %4058 = vrot.lane.b32.xlu1 %v4054_v18, %s5596_s15  ;;  %4060 = vrot.lane.b32.xlu2 %v4055_v60, %s5596_s15  ;;  %s6710_s15 = sld [smem:[#allocation60_spill]]  ;;  %v4735_v18 = vld [vmem:[#allocation29] sm:$0xff]  ;;  %v4737_v60 = vld [vmem:[#allocation31] sm:$0xff] }
0x2174   :  { %4835 = vset.pattern.permute.xlu0 %v5633_v56  ;;  %v3951_v56 = vmul.f32 %v3948_v21, %v3938_v59  ;;  %4217 = vmatpush.bf16.msra.mxu0 %v4735_v18 }
0x2175   :  { %4191 = vmatpush.bf16.msra.mxu1 %v4737_v60 }
0x2177   :  { %4678 = vmatmul.msk.bf16.vlgmr.msra.gmra.mxu0 %vm464_vm0, %v5983_v6 }
0x2179   :  { %v4860_v53 = vld [vmem:[%s6710_s15] ss:$0 sm:$0xff] }
0x21b5   :  { %v3967_v43 = vpop.permute.xlu2 %3966 }
0x21b6   :  { %v3972_v27 = vadd.f32 %v3967_v43, %v3950_v26 }
0x21bd   :  { %v3989_v31 = vpop.permute.xlu2 %3988 }
0x21c5   :  { %v4041_v35 = vpop.permute.xlu2 %4040 }
0x21cd   :  { %v3987_v24 = vpop.permute.xlu1 %3986  ;;  %v4061_v14 = vpop.permute.xlu2 %4060 }
0x21ce   :  { %v4007_v29 = vpop.permute.xlu0 %4006  ;;  %v3992_v48 = vadd.f32 %v3987_v24, %v3972_v27  ;;  %v4862_v27 = vld [vmem:[%s5821_s12] ss:$0 sm:$0xff]  ;;  %s5527_s12 = scalar_lea.hbm %s5526_s16, 16 }
0x21cf   :  { %p5528_p11 = scmp.ne.s32.totalorder %s5526_s16, %s5527_s12  ;;  %p5531_p13 = scmp.lt.s32.totalorder %s5529_s0, %s5527_s12 }
0x21d0   :  { %v4012_v16 = vadd.f32 %v4007_v29, %v3992_v48 }
0x21d1   :  { %p5532_p0 = por %p5531_p13, %p5530_p12 }
0x21d2   :  { %v4024_v32 = vadd.f32 %v4022_v30, %v4012_v16 }
0x21d3   :  { %p5533_p1 = pnand %p5532_p0, %p5528_p11 }
0x21d5   :  { %v4039_v42 = vpop.permute.xlu1 %4038 }
0x21d6   :  { %v3969_v45 = vpop.permute.xlu0 %3968  ;;  %v4044_v47 = vadd.f32 %v4039_v42, %v4024_v32 }
0x21d7   :  { %v3973_v34 = vadd.f32 %v3969_v45, %v3951_v56 }
0x21d9   :  { %v3993_v39 = vadd.f32 %v3989_v31, %v3973_v34 }
0x21dd   :  { %v4009_v40 = vpop.permute.xlu1 %4008 }
0x21de   :  { %v4020_v41 = vpop.permute.xlu0 %4019  ;;  %v4013_v2 = vadd.f32 %v4009_v40, %v3993_v39 }
0x21df   :  { %v4023_v23 = vmul.f32 %v4020_v41, %v3939_v8 }
0x21e1   :  { %v4025_v4 = vadd.f32 %v4023_v23, %v4013_v2 }
0x21e3   :  { %v4045_v46 = vadd.f32 %v4041_v35, %v4025_v4 }
0x21e5   :  { %v4059_v11 = vpop.permute.xlu1 %4058  ;;  %v4065_v5 = vadd.f32 %v4061_v14, %v4045_v46 }
0x21e6   :  { %v4064_v49 = vadd.f32 %v4059_v11, %v4044_v47 }
0x21e8   :  { %v4070_v50 = vpack.c.bf16 %v4065_v5, %v4064_v49 }
0x21ea   :  { %4651 = vmatmul.msk.bf16.vlgmr.msra.gmra.mxu2 %vm464_vm0, %v4070_v50 }
0x21f4   :  { %v4219_v26 = vpop.f32.mrf.mxu0 }
0x21fc   :  { %v4221_v30 = vpop.f32.mrf.mxu0 }
0x226d   :  { %v4099_v0 = vpop.f32.mrf.mxu2 }
0x226e   :  { %v4100_v9 = vadd.f32 %v4860_v53, %v4099_v0 }
0x2270   :  { %v4106_v54 = vmul.f32 0.044715, %v4100_v9  ;;  %v4104_v3 = vmul.f32 0.5, %v4100_v9 }
0x2272   :  { %v4108_v25 = vmul.f32 %v4106_v54, %v4100_v9 }
0x2274   :  { %v4110_v17 = vmul.f32 %v4108_v25, %v4100_v9 }
0x2275   :  { %v4101_v33 = vpop.f32.mrf.mxu2 }
0x2276   :  { %v4112_v61 = vadd.f32 %v4110_v17, %v4100_v9  ;;  %v4102_v38 = vadd.f32 %v4860_v53, %v4101_v33 }
0x2278   :  { %v4107_v37 = vmul.f32 0.044715, %v4102_v38  ;;  %v4114_v36 = vmul.f32 0.7978846, %v4112_v61  ;;  %v4105_v7 = vmul.f32 0.5, %v4102_v38 }
0x227a   :  { %v4109_v55 = vmul.f32 %v4107_v37, %v4102_v38  ;;  %5053 = vtanh.f32 %v4114_v36 }
0x227c   :  { %v4111_v58 = vmul.f32 %v4109_v55, %v4102_v38 }
0x227e   :  { %v4113_v59 = vadd.f32 %v4111_v58, %v4102_v38 }
0x2280   :  { %v4115_v62 = vmul.f32 0.7978846, %v4113_v59  ;;  %v5054_v57 = vpop.eup %5053 }
0x2281   :  { %v4118_v28 = vadd.f32 1.0, %v5054_v57 }
0x2282   :  { %5055 = vtanh.f32 %v4115_v62 }
0x2283   :  { %v4120_v10 = vmul.f32 %v4118_v28, %v4104_v3 }
0x2288   :  { %v5056_v1 = vpop.eup %5055 }
0x2289   :  { %v4119_v8 = vadd.f32 1.0, %v5056_v1 }
0x228b   :  { %v4121_v12 = vmul.f32 %v4119_v8, %v4105_v7 }
0x228d   :  { %v4126_v13 = vpack.c.bf16 %v4121_v12, %v4120_v10 }
0x228f   :  { %4660 = vmatmul.msk.bf16.vlgmr.msrb.gmra.mxu3 %vm464_vm0, %v4126_v13 }
0x2312   :  { %v4155_v51 = vpop.f32.mrf.mxu3 }
0x2313   :  { %v4156_v21 = vadd.f32 %v4861_v19, %v4155_v51 }
0x231a   :  { %v4157_v20 = vpop.f32.mrf.mxu3 }
0x231b   :  { %v4158_v22 = vadd.f32 %v4861_v19, %v4157_v20 }
0x231d   :  { %v4168_v43 = vpack.c.bf16 %v4158_v22, %v4156_v21 }
0x231f   :  { %4669 = vmatmul.msk.bf16.vlgmr.msra.gmra.mxu1 %vm464_vm0, %v4168_v43 }
0x239c   :  { %v4193_v24 = vpop.f32.mrf.mxu1 }
0x239d   :  { %v4220_v29 = vadd.f32 %v4219_v26, %v4193_v24 }
0x239f   :  { %v4228_v48 = vadd.f32 %v4862_v27, %v4220_v29 }
0x23a1   :  { %4230 = vst.msk [vmem:[#allocation32] sm:$0xff] %vm464_vm0, %v4228_v48 }
0x23a4   :  { %v4195_v6 = vpop.f32.mrf.mxu1 }
0x23a5   :  { %v4222_v16 = vadd.f32 %v4221_v30, %v4195_v6 }
0x23a7   :  { %v4229_v31 = vadd.f32 %v4862_v27, %v4222_v16 }
0x23a9   :  { %4231 = vst.msk [vmem:[#allocation32 + $0x8] sm:$0xff] %vm464_vm0, %v4229_v31 }
0x23aa   :  { %5536 = shalt.err (!%p5533_p1)
}
0x23ab   :  { %4244 = dma.vmem_to_hbm [thread:$0]  %s4237_s10, 256, %s4239_s17, [#allocation4], %s5607_s24, %s5607_s24, %s5608_s18  }
0x23ac   :  { %5557 = dma.done.wait [#allocation4], 256  }
0x23ad   :  { %5558 = vsyncadd [#allocation4], 4294967040 }
0x23ae   :  { %4249 = vsyncpa [#allocation3], 1 }
0x23af   :  { %4250 = vsyncpa [#allocation6], 1 }
0x23b0   :  { %4251 = vsyncpa [#allocation9], 1 }
0x23b1   :  { %4252 = vsyncpa [#allocation12], 1 }
0x23b2   :  { %4253 = vsyncpa [#allocation15], 1 }
0x23b3   :  { %4254 = vsyncpa [#allocation18], 1 }
0x23b4   :  { %4255 = vsyncpa [#allocation21], 1 }
0x23b5   :  { %4256 = vsyncpa [#allocation24], 1 }
0x23b6   :  { %4257 = vsyncpa [#allocation27], 1 }
0x23b7   :  { %4258 = vsyncpa [#allocation30], 1 }
0x23b8   :  { %4259 = vsyncpa [#allocation4], 1 }

</bundles_post_ra>
